<compile_context>
chip_gen: v5e
topology: v5e:2x2
jax: 0.10.0
libtpu: 0.0.40
codegen_flags: <defaults>
</compile_context>

<pallas_src>
import math

import jax
import jax.numpy as jnp
from jax.experimental import pallas as pl
from jax.experimental.pallas import tpu as pltpu

KSIZE = 7
PAD = 3


def _vmem_plan():
    """Generation-aware (vmem_limit_bytes, per-input-block budget)."""
    phys = 64 << 20                     # conservative fallback = v7x per-TC physical
    try:
        phys = int(getattr(pltpu.get_tpu_info(), "vmem_capacity_bytes", phys))
    except Exception:
        pass
    # Leave headroom for the resident accumulator, output block and internal scratch.
    limit = int(min((phys * 3) // 4, 96 << 20))
    # Input blocks are double-buffered by Pallas (~2x resident).
    block_budget = int(max(4 << 20, limit // 3))
    return limit, block_budget


def _choose_c_tile(C, HW, itemsize, budget):
    """Largest channel tile (full C, or a multiple of 8) within the budget."""
    if C * HW * itemsize <= budget:
        return C
    ct = (budget // (HW * itemsize)) // 8 * 8
    ct = max(8, ct)
    return C if ct >= C else int(ct)


def _make_fused_kernel(C, c_tile, H, W):
    HW = H * W
    needs_mask = (C % c_tile) != 0
    # vreg liveness of the 14-lane-shift conv structure: 7 live (H+6, W) f32 planes.
    per_plane_vregs = (-(-(H + 2 * PAD) // 8)) * (-(-W // 128))
    low_liveness = 7 * per_plane_vregs > 24

    def kernel(w_ref, x_ref, o_ref, acc_ref, plane_ref):
        # w_ref:     (2*K*K,) f32 SMEM; [0:49] avg taps (pre-scaled by 1/C), [49:98] max taps.
        # x_ref:     (1, c_tile, HW) lane-dense input block.
        # o_ref:     (1, 1, H, W) output block (written only in the epilogue).
        # acc_ref:   (2, HW) f32 VMEM scratch: row 0 = running sum, row 1 = running max.
        # plane_ref: (2, H, W) f32 VMEM scratch for the (HW,)->(H,W) relayout.
        c = pl.program_id(1)
        n_c = pl.num_programs(1)

        @pl.when(c == 0)
        def _():
            acc_ref[0] = jnp.zeros((HW,), jnp.float32)
            acc_ref[1] = jnp.full((HW,), -jnp.inf, jnp.float32)

        x_nat = x_ref[0]                          # (c_tile, HW) native dtype
        x32 = x_nat.astype(jnp.float32)

        def _accum(psum, pmax):
            acc_ref[0] = acc_ref[0] + psum
            acc_ref[1] = jnp.maximum(acc_ref[1], pmax)

        if needs_mask:
            # Full blocks: no masking work at all.
            @pl.when(c < n_c - 1)
            def _():
                _accum(jnp.sum(x32, axis=0),
                       jnp.max(x_nat, axis=0).astype(jnp.float32))

            # Tail block: mask the padded (out-of-range) channels.
            @pl.when(c == n_c - 1)
            def _():
                ch = c * c_tile + jax.lax.broadcasted_iota(
                    jnp.int32, (c_tile, 1), 0)
                valid = ch < C
                _accum(jnp.sum(jnp.where(valid, x32, 0.0), axis=0),
                       jnp.max(jnp.where(valid, x32, -jnp.inf), axis=0))
        else:
            _accum(jnp.sum(x32, axis=0),
                   jnp.max(x_nat, axis=0).astype(jnp.float32))

        # ---- fused epilogue: 7x7 conv over [sum, max] + sigmoid ----
        @pl.when(c == n_c - 1)
        def _():
            # Relayout (2, HW) lane-dense accumulator -> (2, H, W) spatial planes
            # via small static row copies (no in-kernel reshape needed).
            for k in range(2):
                for i in range(H):
                    plane_ref[k, i, :] = acc_ref[k, i * W:(i + 1) * W]

            s_p = jnp.pad(plane_ref[0, :, :], ((PAD, PAD), (PAD, PAD)))   # (H+6, W+6)
            m_p = jnp.pad(plane_ref[1, :, :], ((PAD, PAD), (PAD, PAD)))

            # Hoist all SMEM scalar weight reads out of the tap loops.
            wv = [w_ref[i] for i in range(2 * KSIZE * KSIZE)]

            if not low_liveness:
                # kj-outer: 14 lane shifts total, reused across all 7 ki; 7 row shifts.
                q = [None] * KSIZE
                for kj in range(KSIZE):
                    a_kj = s_p[:, kj:kj + W]                  # (H+6, W)
                    m_kj = m_p[:, kj:kj + W]
                    for ki in range(KSIZE):
                        t = (wv[ki * KSIZE + kj] * a_kj
                             + wv[KSIZE * KSIZE + ki * KSIZE + kj] * m_kj)
                        q[ki] = t if q[ki] is None else q[ki] + t
                conv = q[0][0:H, :]
                for ki in range(1, KSIZE):
                    conv = conv + q[ki][ki:ki + H, :]
            else:
                # Low-liveness variant for large maps: single (H, W) accumulator,
                # sublane row-slices per tap (XLU slot) instead of 7 live q planes.
                conv = jnp.zeros((H, W), jnp.float32)
                for kj in range(KSIZE):
                    a_kj = s_p[:, kj:kj + W]
                    m_kj = m_p[:, kj:kj + W]
                    for ki in range(KSIZE):
                        conv = conv + (
                            wv[ki * KSIZE + kj] * a_kj[ki:ki + H, :]
                            + wv[KSIZE * KSIZE + ki * KSIZE + kj] * m_kj[ki:ki + H, :])

            o_ref[0, 0] = jax.nn.sigmoid(conv).astype(o_ref.dtype)

    return kernel


def spatial_attention(x, weight):
    """x: (N, C, H, W); weight: (1, 2, K, K) -> (N, 1, H, W)."""
    N, C, H, W = x.shape
    HW = H * W

    # Fold 1/C into the avg-channel taps so the kernel only needs a channel SUM.
    w32 = weight.astype(jnp.float32)
    w_flat = jnp.concatenate(
        [w32[0, 0].reshape(-1) / C, w32[0, 1].reshape(-1)])   # (2*K*K,)

    # Lane-dense view of the input: H*W on the 128-lane axis (free for NCHW).
    x_flat = x.reshape(N, C, HW)

    vmem_limit, block_budget = _vmem_plan()
    c_tile = _choose_c_tile(C, HW, x.dtype.itemsize, block_budget)
    n_c = pl.cdiv(C, c_tile)

    out = pl.pallas_call(
        _make_fused_kernel(C, c_tile, H, W),
        out_shape=jax.ShapeDtypeStruct((N, 1, H, W), x.dtype),
        grid=(N, n_c),
        in_specs=[
            pl.BlockSpec(memory_space=pltpu.SMEM),                  # conv weights
            pl.BlockSpec((1, c_tile, HW), lambda n, c: (n, c, 0)),  # x channel chunk
        ],
        out_specs=pl.BlockSpec((1, 1, H, W), lambda n, c: (n, 0, 0, 0)),
        scratch_shapes=[
            pltpu.VMEM((2, HW), jnp.float32),     # running sum / max (lane-dense)
            pltpu.VMEM((2, H, W), jnp.float32),   # spatial relayout buffer
        ],
        compiler_params=pltpu.CompilerParams(
            dimension_semantics=("parallel", "arbitrary"),
            vmem_limit_bytes=vmem_limit),
    )(w_flat, x_flat)

    return out


def spatial_attention_ref(x, weight):
    avg = jnp.mean(x, axis=1, keepdims=True)
    mx = jnp.max(x, axis=1, keepdims=True)
    cat = jnp.concatenate([avg, mx], axis=1)
    out = jax.lax.conv_general_dilated(
        cat, weight, window_strides=(1, 1),
        padding=[(PAD, PAD), (PAD, PAD)],
        dimension_numbers=("NCHW", "OIHW", "NCHW"))
    return jax.nn.sigmoid(out)


if __name__ == "__main__":
    key = jax.random.PRNGKey(0)
    kx, kw = jax.random.split(key)

    N, C, H, W = 2, 4, 16, 16
    x = jax.random.normal(kx, (N, C, H, W), dtype=jnp.float32)

    # Deterministic in-script init (kaiming-uniform-like bound, as in nn.Conv2d).
    fan_in = 2 * KSIZE * KSIZE
    bound = 1.0 / math.sqrt(fan_in)
    weight = jax.random.uniform(kw, (1, 2, KSIZE, KSIZE),
                                minval=-bound, maxval=bound, dtype=jnp.float32)

    out = jax.block_until_ready(spatial_attention(x, weight))

    ref = spatial_attention_ref(x, weight)
    assert out.shape == (N, 1, H, W), out.shape
    assert jnp.allclose(out, ref, atol=1e-5, rtol=1e-5), \
        f"max err {jnp.max(jnp.abs(out - ref))}"

    print("KERNEL_OK")
</pallas_src>

<mosaic_0001>
module attributes {stable_mosaic.version = 11 : i64} {
  func.func @kernel(%arg0: i32, %arg1: i32, %arg2: memref<98xf32, #tpu.memory_space<smem>>, %arg3: memref<1x4x256xf32, #tpu.memory_space<vmem>>, %arg4: memref<1x1x16x16xf32, #tpu.memory_space<vmem>>, %arg5: memref<2x256xf32, #tpu.memory_space<vmem>>, %arg6: memref<2x16x16xf32, #tpu.memory_space<vmem>>) attributes {dimension_semantics = [#tpu.dimension_semantics<parallel>, #tpu.dimension_semantics<arbitrary>], iteration_bounds = array<i64: 2, 1>, scalar_prefetch = 0 : i64, scratch_operands = 2 : i64, tpu.core_type = #tpu.core_type<tc>, window_params = [{transform_indices = @transform_0, window_bounds = array<i64: 98>}, {transform_indices = @transform_1, window_bounds = array<i64: 1, 4, 256>}, {transform_indices = @transform_2, window_bounds = array<i64: 1, 1, 16, 16>}]} {
    %c0_i32 = arith.constant 0 : i32
    %0 = arith.cmpi eq, %arg1, %c0_i32 : i32
    %1 = arith.extui %0 : i1 to i32
    %c0_i32_0 = arith.constant 0 : i32
    %2 = arith.cmpi ne, %1, %c0_i32_0 : i32
    scf.if %2 {
      %cst_13 = arith.constant 0.000000e+00 : f32
      %22 = vector.broadcast %cst_13 : f32 to vector<256xf32>
      %c0_14 = arith.constant 0 : index
      %c0_15 = arith.constant 0 : index
      %23 = vector.load %arg5[%c0_14, %c0_15] : memref<2x256xf32, #tpu.memory_space<vmem>>, vector<1x256xf32>
      %24 = vector.shape_cast %23 : vector<1x256xf32> to vector<256xf32>
      %25 = vector.shape_cast %22 : vector<256xf32> to vector<1x256xf32>
      tpu.vector_store %arg5[%c0_14, %c0_15], %25 {strides = array<i32>} : memref<2x256xf32, #tpu.memory_space<vmem>>, vector<1x256xf32>,
      %cst_16 = arith.constant 0xFF800000 : f32
      %26 = vector.broadcast %cst_16 : f32 to vector<256xf32>
      %c1_17 = arith.constant 1 : index
      %c0_18 = arith.constant 0 : index
      %27 = vector.load %arg5[%c1_17, %c0_18] : memref<2x256xf32, #tpu.memory_space<vmem>>, vector<1x256xf32>
      %28 = vector.shape_cast %27 : vector<1x256xf32> to vector<256xf32>
      %29 = vector.shape_cast %26 : vector<256xf32> to vector<1x256xf32>
      tpu.vector_store %arg5[%c1_17, %c0_18], %29 {strides = array<i32>} : memref<2x256xf32, #tpu.memory_space<vmem>>, vector<1x256xf32>,
    } else {
    }
    %c0 = arith.constant 0 : index
    %c0_1 = arith.constant 0 : index
    %c0_2 = arith.constant 0 : index
    %3 = vector.load %arg3[%c0, %c0_1, %c0_2] : memref<1x4x256xf32, #tpu.memory_space<vmem>>, vector<1x4x256xf32>
    %4 = vector.shape_cast %3 : vector<1x4x256xf32> to vector<4x256xf32>
    %cst = arith.constant dense<0.000000e+00> : vector<256xf32>
    %5 = vector.multi_reduction <add>, %4, %cst [0] : vector<4x256xf32> to vector<256xf32>
    %cst_3 = arith.constant dense<0xFF800000> : vector<256xf32>
    %6 = vector.multi_reduction <maximumf>, %4, %cst_3 [0] : vector<4x256xf32> to vector<256xf32>
    %c0_4 = arith.constant 0 : index
    %c0_5 = arith.constant 0 : index
    %7 = vector.load %arg5[%c0_4, %c0_5] : memref<2x256xf32, #tpu.memory_space<vmem>>, vector<1x256xf32>
    %8 = vector.shape_cast %7 : vector<1x256xf32> to vector<256xf32>
    %9 = arith.addf %8, %5 : vector<256xf32>
    %c0_6 = arith.constant 0 : index
    %c0_7 = arith.constant 0 : index
    %10 = vector.load %arg5[%c0_6, %c0_7] : memref<2x256xf32, #tpu.memory_space<vmem>>, vector<1x256xf32>
    %11 = vector.shape_cast %10 : vector<1x256xf32> to vector<256xf32>
    %12 = vector.shape_cast %9 : vector<256xf32> to vector<1x256xf32>
    tpu.vector_store %arg5[%c0_6, %c0_7], %12 {strides = array<i32>} : memref<2x256xf32, #tpu.memory_space<vmem>>, vector<1x256xf32>,
    %c1 = arith.constant 1 : index
    %c0_8 = arith.constant 0 : index
    %13 = vector.load %arg5[%c1, %c0_8] : memref<2x256xf32, #tpu.memory_space<vmem>>, vector<1x256xf32>
    %14 = vector.shape_cast %13 : vector<1x256xf32> to vector<256xf32>
    %15 = arith.maximumf %14, %6 : vector<256xf32>
    %c1_9 = arith.constant 1 : index
    %c0_10 = arith.constant 0 : index
    %16 = vector.load %arg5[%c1_9, %c0_10] : memref<2x256xf32, #tpu.memory_space<vmem>>, vector<1x256xf32>
    %17 = vector.shape_cast %16 : vector<1x256xf32> to vector<256xf32>
    %18 = vector.shape_cast %15 : vector<256xf32> to vector<1x256xf32>
    tpu.vector_store %arg5[%c1_9, %c0_10], %18 {strides = array<i32>} : memref<2x256xf32, #tpu.memory_space<vmem>>, vector<1x256xf32>,
    %c0_i32_11 = arith.constant 0 : i32
    %19 = arith.cmpi eq, %arg1, %c0_i32_11 : i32
    %20 = arith.extui %19 : i1 to i32
    %c0_i32_12 = arith.constant 0 : i32
    %21 = arith.cmpi ne, %20, %c0_i32_12 : i32
    scf.if %21 {
      %c0_13 = arith.constant 0 : index
      %c0_14 = arith.constant 0 : index
      %22 = vector.load %arg5[%c0_13, %c0_14] : memref<2x256xf32, #tpu.memory_space<vmem>>, vector<1x16xf32>
      %23 = vector.shape_cast %22 : vector<1x16xf32> to vector<16xf32>
      %c0_15 = arith.constant 0 : index
      %c0_16 = arith.constant 0 : index
      %c0_17 = arith.constant 0 : index
      %24 = vector.load %arg6[%c0_15, %c0_16, %c0_17] : memref<2x16x16xf32, #tpu.memory_space<vmem>>, vector<1x1x16xf32>
      %25 = vector.shape_cast %24 : vector<1x1x16xf32> to vector<16xf32>
      %26 = vector.shape_cast %23 : vector<16xf32> to vector<1x1x16xf32>
      tpu.vector_store %arg6[%c0_15, %c0_16, %c0_17], %26 {strides = array<i32>} : memref<2x16x16xf32, #tpu.memory_space<vmem>>, vector<1x1x16xf32>,
      %c0_18 = arith.constant 0 : index
      %c16 = arith.constant 16 : index
      %27 = vector.load %arg5[%c0_18, %c16] : memref<2x256xf32, #tpu.memory_space<vmem>>, vector<1x16xf32>
      %28 = vector.shape_cast %27 : vector<1x16xf32> to vector<16xf32>
      %c0_19 = arith.constant 0 : index
      %c1_20 = arith.constant 1 : index
      %c0_21 = arith.constant 0 : index
      %29 = vector.load %arg6[%c0_19, %c1_20, %c0_21] : memref<2x16x16xf32, #tpu.memory_space<vmem>>, vector<1x1x16xf32>
      %30 = vector.shape_cast %29 : vector<1x1x16xf32> to vector<16xf32>
      %31 = vector.shape_cast %28 : vector<16xf32> to vector<1x1x16xf32>
      tpu.vector_store %arg6[%c0_19, %c1_20, %c0_21], %31 {strides = array<i32>} : memref<2x16x16xf32, #tpu.memory_space<vmem>>, vector<1x1x16xf32>,
      %c0_22 = arith.constant 0 : index
      %c32 = arith.constant 32 : index
      %32 = vector.load %arg5[%c0_22, %c32] : memref<2x256xf32, #tpu.memory_space<vmem>>, vector<1x16xf32>
      %33 = vector.shape_cast %32 : vector<1x16xf32> to vector<16xf32>
      %c0_23 = arith.constant 0 : index
      %c2 = arith.constant 2 : index
      %c0_24 = arith.constant 0 : index
      %34 = vector.load %arg6[%c0_23, %c2, %c0_24] : memref<2x16x16xf32, #tpu.memory_space<vmem>>, vector<1x1x16xf32>
      %35 = vector.shape_cast %34 : vector<1x1x16xf32> to vector<16xf32>
      %36 = vector.shape_cast %33 : vector<16xf32> to vector<1x1x16xf32>
      tpu.vector_store %arg6[%c0_23, %c2, %c0_24], %36 {strides = array<i32>} : memref<2x16x16xf32, #tpu.memory_space<vmem>>, vector<1x1x16xf32>,
      %c0_25 = arith.constant 0 : index
      %c48 = arith.constant 48 : index
      %37 = vector.load %arg5[%c0_25, %c48] : memref<2x256xf32, #tpu.memory_space<vmem>>, vector<1x16xf32>
      %38 = vector.shape_cast %37 : vector<1x16xf32> to vector<16xf32>
      %c0_26 = arith.constant 0 : index
      %c3 = arith.constant 3 : index
      %c0_27 = arith.constant 0 : index
      %39 = vector.load %arg6[%c0_26, %c3, %c0_27] : memref<2x16x16xf32, #tpu.memory_space<vmem>>, vector<1x1x16xf32>
      %40 = vector.shape_cast %39 : vector<1x1x16xf32> to vector<16xf32>
      %41 = vector.shape_cast %38 : vector<16xf32> to vector<1x1x16xf32>
      tpu.vector_store %arg6[%c0_26, %c3, %c0_27], %41 {strides = array<i32>} : memref<2x16x16xf32, #tpu.memory_space<vmem>>, vector<1x1x16xf32>,
      %c0_28 = arith.constant 0 : index
      %c64 = arith.constant 64 : index
      %42 = vector.load %arg5[%c0_28, %c64] : memref<2x256xf32, #tpu.memory_space<vmem>>, vector<1x16xf32>
      %43 = vector.shape_cast %42 : vector<1x16xf32> to vector<16xf32>
      %c0_29 = arith.constant 0 : index
      %c4 = arith.constant 4 : index
      %c0_30 = arith.constant 0 : index
      %44 = vector.load %arg6[%c0_29, %c4, %c0_30] : memref<2x16x16xf32, #tpu.memory_space<vmem>>, vector<1x1x16xf32>
      %45 = vector.shape_cast %44 : vector<1x1x16xf32> to vector<16xf32>
      %46 = vector.shape_cast %43 : vector<16xf32> to vector<1x1x16xf32>
      tpu.vector_store %arg6[%c0_29, %c4, %c0_30], %46 {strides = array<i32>} : memref<2x16x16xf32, #tpu.memory_space<vmem>>, vector<1x1x16xf32>,
      %c0_31 = arith.constant 0 : index
      %c80 = arith.constant 80 : index
      %47 = vector.load %arg5[%c0_31, %c80] : memref<2x256xf32, #tpu.memory_space<vmem>>, vector<1x16xf32>
      %48 = vector.shape_cast %47 : vector<1x16xf32> to vector<16xf32>
      %c0_32 = arith.constant 0 : index
      %c5 = arith.constant 5 : index
      %c0_33 = arith.constant 0 : index
      %49 = vector.load %arg6[%c0_32, %c5, %c0_33] : memref<2x16x16xf32, #tpu.memory_space<vmem>>, vector<1x1x16xf32>
      %50 = vector.shape_cast %49 : vector<1x1x16xf32> to vector<16xf32>
      %51 = vector.shape_cast %48 : vector<16xf32> to vector<1x1x16xf32>
      tpu.vector_store %arg6[%c0_32, %c5, %c0_33], %51 {strides = array<i32>} : memref<2x16x16xf32, #tpu.memory_space<vmem>>, vector<1x1x16xf32>,
      %c0_34 = arith.constant 0 : index
      %c96 = arith.constant 96 : index
      %52 = vector.load %arg5[%c0_34, %c96] : memref<2x256xf32, #tpu.memory_space<vmem>>, vector<1x16xf32>
      %53 = vector.shape_cast %52 : vector<1x16xf32> to vector<16xf32>
      %c0_35 = arith.constant 0 : index
      %c6 = arith.constant 6 : index
      %c0_36 = arith.constant 0 : index
      %54 = vector.load %arg6[%c0_35, %c6, %c0_36] : memref<2x16x16xf32, #tpu.memory_space<vmem>>, vector<1x1x16xf32>
      %55 = vector.shape_cast %54 : vector<1x1x16xf32> to vector<16xf32>
      %56 = vector.shape_cast %53 : vector<16xf32> to vector<1x1x16xf32>
      tpu.vector_store %arg6[%c0_35, %c6, %c0_36], %56 {strides = array<i32>} : memref<2x16x16xf32, #tpu.memory_space<vmem>>, vector<1x1x16xf32>,
      %c0_37 = arith.constant 0 : index
      %c112 = arith.constant 112 : index
      %57 = vector.load %arg5[%c0_37, %c112] : memref<2x256xf32, #tpu.memory_space<vmem>>, vector<1x16xf32>
      %58 = vector.shape_cast %57 : vector<1x16xf32> to vector<16xf32>
      %c0_38 = arith.constant 0 : index
      %c7 = arith.constant 7 : index
      %c0_39 = arith.constant 0 : index
      %59 = vector.load %arg6[%c0_38, %c7, %c0_39] : memref<2x16x16xf32, #tpu.memory_space<vmem>>, vector<1x1x16xf32>
      %60 = vector.shape_cast %59 : vector<1x1x16xf32> to vector<16xf32>
      %61 = vector.shape_cast %58 : vector<16xf32> to vector<1x1x16xf32>
      tpu.vector_store %arg6[%c0_38, %c7, %c0_39], %61 {strides = array<i32>} : memref<2x16x16xf32, #tpu.memory_space<vmem>>, vector<1x1x16xf32>,
      %c0_40 = arith.constant 0 : index
      %c128 = arith.constant 128 : index
      %62 = vector.load %arg5[%c0_40, %c128] : memref<2x256xf32, #tpu.memory_space<vmem>>, vector<1x16xf32>
      %63 = vector.shape_cast %62 : vector<1x16xf32> to vector<16xf32>
      %c0_41 = arith.constant 0 : index
      %c8 = arith.constant 8 : index
      %c0_42 = arith.constant 0 : index
      %64 = vector.load %arg6[%c0_41, %c8, %c0_42] : memref<2x16x16xf32, #tpu.memory_space<vmem>>, vector<1x1x16xf32>
      %65 = vector.shape_cast %64 : vector<1x1x16xf32> to vector<16xf32>
      %66 = vector.shape_cast %63 : vector<16xf32> to vector<1x1x16xf32>
      tpu.vector_store %arg6[%c0_41, %c8, %c0_42], %66 {strides = array<i32>} : memref<2x16x16xf32, #tpu.memory_space<vmem>>, vector<1x1x16xf32>,
      %c0_43 = arith.constant 0 : index
      %c144 = arith.constant 144 : index
      %67 = vector.load %arg5[%c0_43, %c144] : memref<2x256xf32, #tpu.memory_space<vmem>>, vector<1x16xf32>
      %68 = vector.shape_cast %67 : vector<1x16xf32> to vector<16xf32>
      %c0_44 = arith.constant 0 : index
      %c9 = arith.constant 9 : index
      %c0_45 = arith.constant 0 : index
      %69 = vector.load %arg6[%c0_44, %c9, %c0_45] : memref<2x16x16xf32, #tpu.memory_space<vmem>>, vector<1x1x16xf32>
      %70 = vector.shape_cast %69 : vector<1x1x16xf32> to vector<16xf32>
      %71 = vector.shape_cast %68 : vector<16xf32> to vector<1x1x16xf32>
      tpu.vector_store %arg6[%c0_44, %c9, %c0_45], %71 {strides = array<i32>} : memref<2x16x16xf32, #tpu.memory_space<vmem>>, vector<1x1x16xf32>,
      %c0_46 = arith.constant 0 : index
      %c160 = arith.constant 160 : index
      %72 = vector.load %arg5[%c0_46, %c160] : memref<2x256xf32, #tpu.memory_space<vmem>>, vector<1x16xf32>
      %73 = vector.shape_cast %72 : vector<1x16xf32> to vector<16xf32>
      %c0_47 = arith.constant 0 : index
      %c10 = arith.constant 10 : index
      %c0_48 = arith.constant 0 : index
      %74 = vector.load %arg6[%c0_47, %c10, %c0_48] : memref<2x16x16xf32, #tpu.memory_space<vmem>>, vector<1x1x16xf32>
      %75 = vector.shape_cast %74 : vector<1x1x16xf32> to vector<16xf32>
      %76 = vector.shape_cast %73 : vector<16xf32> to vector<1x1x16xf32>
      tpu.vector_store %arg6[%c0_47, %c10, %c0_48], %76 {strides = array<i32>} : memref<2x16x16xf32, #tpu.memory_space<vmem>>, vector<1x1x16xf32>,
      %c0_49 = arith.constant 0 : index
      %c176 = arith.constant 176 : index
      %77 = vector.load %arg5[%c0_49, %c176] : memref<2x256xf32, #tpu.memory_space<vmem>>, vector<1x16xf32>
      %78 = vector.shape_cast %77 : vector<1x16xf32> to vector<16xf32>
      %c0_50 = arith.constant 0 : index
      %c11 = arith.constant 11 : index
      %c0_51 = arith.constant 0 : index
      %79 = vector.load %arg6[%c0_50, %c11, %c0_51] : memref<2x16x16xf32, #tpu.memory_space<vmem>>, vector<1x1x16xf32>
      %80 = vector.shape_cast %79 : vector<1x1x16xf32> to vector<16xf32>
      %81 = vector.shape_cast %78 : vector<16xf32> to vector<1x1x16xf32>
      tpu.vector_store %arg6[%c0_50, %c11, %c0_51], %81 {strides = array<i32>} : memref<2x16x16xf32, #tpu.memory_space<vmem>>, vector<1x1x16xf32>,
      %c0_52 = arith.constant 0 : index
      %c192 = arith.constant 192 : index
      %82 = vector.load %arg5[%c0_52, %c192] : memref<2x256xf32, #tpu.memory_space<vmem>>, vector<1x16xf32>
      %83 = vector.shape_cast %82 : vector<1x16xf32> to vector<16xf32>
      %c0_53 = arith.constant 0 : index
      %c12 = arith.constant 12 : index
      %c0_54 = arith.constant 0 : index
      %84 = vector.load %arg6[%c0_53, %c12, %c0_54] : memref<2x16x16xf32, #tpu.memory_space<vmem>>, vector<1x1x16xf32>
      %85 = vector.shape_cast %84 : vector<1x1x16xf32> to vector<16xf32>
      %86 = vector.shape_cast %83 : vector<16xf32> to vector<1x1x16xf32>
      tpu.vector_store %arg6[%c0_53, %c12, %c0_54], %86 {strides = array<i32>} : memref<2x16x16xf32, #tpu.memory_space<vmem>>, vector<1x1x16xf32>,
      %c0_55 = arith.constant 0 : index
      %c208 = arith.constant 208 : index
      %87 = vector.load %arg5[%c0_55, %c208] : memref<2x256xf32, #tpu.memory_space<vmem>>, vector<1x16xf32>
      %88 = vector.shape_cast %87 : vector<1x16xf32> to vector<16xf32>
      %c0_56 = arith.constant 0 : index
      %c13 = arith.constant 13 : index
      %c0_57 = arith.constant 0 : index
      %89 = vector.load %arg6[%c0_56, %c13, %c0_57] : memref<2x16x16xf32, #tpu.memory_space<vmem>>, vector<1x1x16xf32>
      %90 = vector.shape_cast %89 : vector<1x1x16xf32> to vector<16xf32>
      %91 = vector.shape_cast %88 : vector<16xf32> to vector<1x1x16xf32>
      tpu.vector_store %arg6[%c0_56, %c13, %c0_57], %91 {strides = array<i32>} : memref<2x16x16xf32, #tpu.memory_space<vmem>>, vector<1x1x16xf32>,
      %c0_58 = arith.constant 0 : index
      %c224 = arith.constant 224 : index
      %92 = vector.load %arg5[%c0_58, %c224] : memref<2x256xf32, #tpu.memory_space<vmem>>, vector<1x16xf32>
      %93 = vector.shape_cast %92 : vector<1x16xf32> to vector<16xf32>
      %c0_59 = arith.constant 0 : index
      %c14 = arith.constant 14 : index
      %c0_60 = arith.constant 0 : index
      %94 = vector.load %arg6[%c0_59, %c14, %c0_60] : memref<2x16x16xf32, #tpu.memory_space<vmem>>, vector<1x1x16xf32>
      %95 = vector.shape_cast %94 : vector<1x1x16xf32> to vector<16xf32>
      %96 = vector.shape_cast %93 : vector<16xf32> to vector<1x1x16xf32>
      tpu.vector_store %arg6[%c0_59, %c14, %c0_60], %96 {strides = array<i32>} : memref<2x16x16xf32, #tpu.memory_space<vmem>>, vector<1x1x16xf32>,
      %c0_61 = arith.constant 0 : index
      %c240 = arith.constant 240 : index
      %97 = vector.load %arg5[%c0_61, %c240] : memref<2x256xf32, #tpu.memory_space<vmem>>, vector<1x16xf32>
      %98 = vector.shape_cast %97 : vector<1x16xf32> to vector<16xf32>
      %c0_62 = arith.constant 0 : index
      %c15 = arith.constant 15 : index
      %c0_63 = arith.constant 0 : index
      %99 = vector.load %arg6[%c0_62, %c15, %c0_63] : memref<2x16x16xf32, #tpu.memory_space<vmem>>, vector<1x1x16xf32>
      %100 = vector.shape_cast %99 : vector<1x1x16xf32> to vector<16xf32>
      %101 = vector.shape_cast %98 : vector<16xf32> to vector<1x1x16xf32>
      tpu.vector_store %arg6[%c0_62, %c15, %c0_63], %101 {strides = array<i32>} : memref<2x16x16xf32, #tpu.memory_space<vmem>>, vector<1x1x16xf32>,
      %c1_64 = arith.constant 1 : index
      %c0_65 = arith.constant 0 : index
      %102 = vector.load %arg5[%c1_64, %c0_65] : memref<2x256xf32, #tpu.memory_space<vmem>>, vector<1x16xf32>
      %103 = vector.shape_cast %102 : vector<1x16xf32> to vector<16xf32>
      %c1_66 = arith.constant 1 : index
      %c0_67 = arith.constant 0 : index
      %c0_68 = arith.constant 0 : index
      %104 = vector.load %arg6[%c1_66, %c0_67, %c0_68] : memref<2x16x16xf32, #tpu.memory_space<vmem>>, vector<1x1x16xf32>
      %105 = vector.shape_cast %104 : vector<1x1x16xf32> to vector<16xf32>
      %106 = vector.shape_cast %103 : vector<16xf32> to vector<1x1x16xf32>
      tpu.vector_store %arg6[%c1_66, %c0_67, %c0_68], %106 {strides = array<i32>} : memref<2x16x16xf32, #tpu.memory_space<vmem>>, vector<1x1x16xf32>,
      %c1_69 = arith.constant 1 : index
      %c16_70 = arith.constant 16 : index
      %107 = vector.load %arg5[%c1_69, %c16_70] : memref<2x256xf32, #tpu.memory_space<vmem>>, vector<1x16xf32>
      %108 = vector.shape_cast %107 : vector<1x16xf32> to vector<16xf32>
      %c1_71 = arith.constant 1 : index
      %c1_72 = arith.constant 1 : index
      %c0_73 = arith.constant 0 : index
      %109 = vector.load %arg6[%c1_71, %c1_72, %c0_73] : memref<2x16x16xf32, #tpu.memory_space<vmem>>, vector<1x1x16xf32>
      %110 = vector.shape_cast %109 : vector<1x1x16xf32> to vector<16xf32>
      %111 = vector.shape_cast %108 : vector<16xf32> to vector<1x1x16xf32>
      tpu.vector_store %arg6[%c1_71, %c1_72, %c0_73], %111 {strides = array<i32>} : memref<2x16x16xf32, #tpu.memory_space<vmem>>, vector<1x1x16xf32>,
      %c1_74 = arith.constant 1 : index
      %c32_75 = arith.constant 32 : index
      %112 = vector.load %arg5[%c1_74, %c32_75] : memref<2x256xf32, #tpu.memory_space<vmem>>, vector<1x16xf32>
      %113 = vector.shape_cast %112 : vector<1x16xf32> to vector<16xf32>
      %c1_76 = arith.constant 1 : index
      %c2_77 = arith.constant 2 : index
      %c0_78 = arith.constant 0 : index
      %114 = vector.load %arg6[%c1_76, %c2_77, %c0_78] : memref<2x16x16xf32, #tpu.memory_space<vmem>>, vector<1x1x16xf32>
      %115 = vector.shape_cast %114 : vector<1x1x16xf32> to vector<16xf32>
      %116 = vector.shape_cast %113 : vector<16xf32> to vector<1x1x16xf32>
      tpu.vector_store %arg6[%c1_76, %c2_77, %c0_78], %116 {strides = array<i32>} : memref<2x16x16xf32, #tpu.memory_space<vmem>>, vector<1x1x16xf32>,
      %c1_79 = arith.constant 1 : index
      %c48_80 = arith.constant 48 : index
      %117 = vector.load %arg5[%c1_79, %c48_80] : memref<2x256xf32, #tpu.memory_space<vmem>>, vector<1x16xf32>
      %118 = vector.shape_cast %117 : vector<1x16xf32> to vector<16xf32>
      %c1_81 = arith.constant 1 : index
      %c3_82 = arith.constant 3 : index
      %c0_83 = arith.constant 0 : index
      %119 = vector.load %arg6[%c1_81, %c3_82, %c0_83] : memref<2x16x16xf32, #tpu.memory_space<vmem>>, vector<1x1x16xf32>
      %120 = vector.shape_cast %119 : vector<1x1x16xf32> to vector<16xf32>
      %121 = vector.shape_cast %118 : vector<16xf32> to vector<1x1x16xf32>
      tpu.vector_store %arg6[%c1_81, %c3_82, %c0_83], %121 {strides = array<i32>} : memref<2x16x16xf32, #tpu.memory_space<vmem>>, vector<1x1x16xf32>,
      %c1_84 = arith.constant 1 : index
      %c64_85 = arith.constant 64 : index
      %122 = vector.load %arg5[%c1_84, %c64_85] : memref<2x256xf32, #tpu.memory_space<vmem>>, vector<1x16xf32>
      %123 = vector.shape_cast %122 : vector<1x16xf32> to vector<16xf32>
      %c1_86 = arith.constant 1 : index
      %c4_87 = arith.constant 4 : index
      %c0_88 = arith.constant 0 : index
      %124 = vector.load %arg6[%c1_86, %c4_87, %c0_88] : memref<2x16x16xf32, #tpu.memory_space<vmem>>, vector<1x1x16xf32>
      %125 = vector.shape_cast %124 : vector<1x1x16xf32> to vector<16xf32>
      %126 = vector.shape_cast %123 : vector<16xf32> to vector<1x1x16xf32>
      tpu.vector_store %arg6[%c1_86, %c4_87, %c0_88], %126 {strides = array<i32>} : memref<2x16x16xf32, #tpu.memory_space<vmem>>, vector<1x1x16xf32>,
      %c1_89 = arith.constant 1 : index
      %c80_90 = arith.constant 80 : index
      %127 = vector.load %arg5[%c1_89, %c80_90] : memref<2x256xf32, #tpu.memory_space<vmem>>, vector<1x16xf32>
      %128 = vector.shape_cast %127 : vector<1x16xf32> to vector<16xf32>
      %c1_91 = arith.constant 1 : index
      %c5_92 = arith.constant 5 : index
      %c0_93 = arith.constant 0 : index
      %129 = vector.load %arg6[%c1_91, %c5_92, %c0_93] : memref<2x16x16xf32, #tpu.memory_space<vmem>>, vector<1x1x16xf32>
      %130 = vector.shape_cast %129 : vector<1x1x16xf32> to vector<16xf32>
      %131 = vector.shape_cast %128 : vector<16xf32> to vector<1x1x16xf32>
      tpu.vector_store %arg6[%c1_91, %c5_92, %c0_93], %131 {strides = array<i32>} : memref<2x16x16xf32, #tpu.memory_space<vmem>>, vector<1x1x16xf32>,
      %c1_94 = arith.constant 1 : index
      %c96_95 = arith.constant 96 : index
      %132 = vector.load %arg5[%c1_94, %c96_95] : memref<2x256xf32, #tpu.memory_space<vmem>>, vector<1x16xf32>
      %133 = vector.shape_cast %132 : vector<1x16xf32> to vector<16xf32>
      %c1_96 = arith.constant 1 : index
      %c6_97 = arith.constant 6 : index
      %c0_98 = arith.constant 0 : index
      %134 = vector.load %arg6[%c1_96, %c6_97, %c0_98] : memref<2x16x16xf32, #tpu.memory_space<vmem>>, vector<1x1x16xf32>
      %135 = vector.shape_cast %134 : vector<1x1x16xf32> to vector<16xf32>
      %136 = vector.shape_cast %133 : vector<16xf32> to vector<1x1x16xf32>
      tpu.vector_store %arg6[%c1_96, %c6_97, %c0_98], %136 {strides = array<i32>} : memref<2x16x16xf32, #tpu.memory_space<vmem>>, vector<1x1x16xf32>,
      %c1_99 = arith.constant 1 : index
      %c112_100 = arith.constant 112 : index
      %137 = vector.load %arg5[%c1_99, %c112_100] : memref<2x256xf32, #tpu.memory_space<vmem>>, vector<1x16xf32>
      %138 = vector.shape_cast %137 : vector<1x16xf32> to vector<16xf32>
      %c1_101 = arith.constant 1 : index
      %c7_102 = arith.constant 7 : index
      %c0_103 = arith.constant 0 : index
      %139 = vector.load %arg6[%c1_101, %c7_102, %c0_103] : memref<2x16x16xf32, #tpu.memory_space<vmem>>, vector<1x1x16xf32>
      %140 = vector.shape_cast %139 : vector<1x1x16xf32> to vector<16xf32>
      %141 = vector.shape_cast %138 : vector<16xf32> to vector<1x1x16xf32>
      tpu.vector_store %arg6[%c1_101, %c7_102, %c0_103], %141 {strides = array<i32>} : memref<2x16x16xf32, #tpu.memory_space<vmem>>, vector<1x1x16xf32>,
      %c1_104 = arith.constant 1 : index
      %c128_105 = arith.constant 128 : index
      %142 = vector.load %arg5[%c1_104, %c128_105] : memref<2x256xf32, #tpu.memory_space<vmem>>, vector<1x16xf32>
      %143 = vector.shape_cast %142 : vector<1x16xf32> to vector<16xf32>
      %c1_106 = arith.constant 1 : index
      %c8_107 = arith.constant 8 : index
      %c0_108 = arith.constant 0 : index
      %144 = vector.load %arg6[%c1_106, %c8_107, %c0_108] : memref<2x16x16xf32, #tpu.memory_space<vmem>>, vector<1x1x16xf32>
      %145 = vector.shape_cast %144 : vector<1x1x16xf32> to vector<16xf32>
      %146 = vector.shape_cast %143 : vector<16xf32> to vector<1x1x16xf32>
      tpu.vector_store %arg6[%c1_106, %c8_107, %c0_108], %146 {strides = array<i32>} : memref<2x16x16xf32, #tpu.memory_space<vmem>>, vector<1x1x16xf32>,
      %c1_109 = arith.constant 1 : index
      %c144_110 = arith.constant 144 : index
      %147 = vector.load %arg5[%c1_109, %c144_110] : memref<2x256xf32, #tpu.memory_space<vmem>>, vector<1x16xf32>
      %148 = vector.shape_cast %147 : vector<1x16xf32> to vector<16xf32>
      %c1_111 = arith.constant 1 : index
      %c9_112 = arith.constant 9 : index
      %c0_113 = arith.constant 0 : index
      %149 = vector.load %arg6[%c1_111, %c9_112, %c0_113] : memref<2x16x16xf32, #tpu.memory_space<vmem>>, vector<1x1x16xf32>
      %150 = vector.shape_cast %149 : vector<1x1x16xf32> to vector<16xf32>
      %151 = vector.shape_cast %148 : vector<16xf32> to vector<1x1x16xf32>
      tpu.vector_store %arg6[%c1_111, %c9_112, %c0_113], %151 {strides = array<i32>} : memref<2x16x16xf32, #tpu.memory_space<vmem>>, vector<1x1x16xf32>,
      %c1_114 = arith.constant 1 : index
      %c160_115 = arith.constant 160 : index
      %152 = vector.load %arg5[%c1_114, %c160_115] : memref<2x256xf32, #tpu.memory_space<vmem>>, vector<1x16xf32>
      %153 = vector.shape_cast %152 : vector<1x16xf32> to vector<16xf32>
      %c1_116 = arith.constant 1 : index
      %c10_117 = arith.constant 10 : index
      %c0_118 = arith.constant 0 : index
      %154 = vector.load %arg6[%c1_116, %c10_117, %c0_118] : memref<2x16x16xf32, #tpu.memory_space<vmem>>, vector<1x1x16xf32>
      %155 = vector.shape_cast %154 : vector<1x1x16xf32> to vector<16xf32>
      %156 = vector.shape_cast %153 : vector<16xf32> to vector<1x1x16xf32>
      tpu.vector_store %arg6[%c1_116, %c10_117, %c0_118], %156 {strides = array<i32>} : memref<2x16x16xf32, #tpu.memory_space<vmem>>, vector<1x1x16xf32>,
      %c1_119 = arith.constant 1 : index
      %c176_120 = arith.constant 176 : index
      %157 = vector.load %arg5[%c1_119, %c176_120] : memref<2x256xf32, #tpu.memory_space<vmem>>, vector<1x16xf32>
      %158 = vector.shape_cast %157 : vector<1x16xf32> to vector<16xf32>
      %c1_121 = arith.constant 1 : index
      %c11_122 = arith.constant 11 : index
      %c0_123 = arith.constant 0 : index
      %159 = vector.load %arg6[%c1_121, %c11_122, %c0_123] : memref<2x16x16xf32, #tpu.memory_space<vmem>>, vector<1x1x16xf32>
      %160 = vector.shape_cast %159 : vector<1x1x16xf32> to vector<16xf32>
      %161 = vector.shape_cast %158 : vector<16xf32> to vector<1x1x16xf32>
      tpu.vector_store %arg6[%c1_121, %c11_122, %c0_123], %161 {strides = array<i32>} : memref<2x16x16xf32, #tpu.memory_space<vmem>>, vector<1x1x16xf32>,
      %c1_124 = arith.constant 1 : index
      %c192_125 = arith.constant 192 : index
      %162 = vector.load %arg5[%c1_124, %c192_125] : memref<2x256xf32, #tpu.memory_space<vmem>>, vector<1x16xf32>
      %163 = vector.shape_cast %162 : vector<1x16xf32> to vector<16xf32>
      %c1_126 = arith.constant 1 : index
      %c12_127 = arith.constant 12 : index
      %c0_128 = arith.constant 0 : index
      %164 = vector.load %arg6[%c1_126, %c12_127, %c0_128] : memref<2x16x16xf32, #tpu.memory_space<vmem>>, vector<1x1x16xf32>
      %165 = vector.shape_cast %164 : vector<1x1x16xf32> to vector<16xf32>
      %166 = vector.shape_cast %163 : vector<16xf32> to vector<1x1x16xf32>
      tpu.vector_store %arg6[%c1_126, %c12_127, %c0_128], %166 {strides = array<i32>} : memref<2x16x16xf32, #tpu.memory_space<vmem>>, vector<1x1x16xf32>,
      %c1_129 = arith.constant 1 : index
      %c208_130 = arith.constant 208 : index
      %167 = vector.load %arg5[%c1_129, %c208_130] : memref<2x256xf32, #tpu.memory_space<vmem>>, vector<1x16xf32>
      %168 = vector.shape_cast %167 : vector<1x16xf32> to vector<16xf32>
      %c1_131 = arith.constant 1 : index
      %c13_132 = arith.constant 13 : index
      %c0_133 = arith.constant 0 : index
      %169 = vector.load %arg6[%c1_131, %c13_132, %c0_133] : memref<2x16x16xf32, #tpu.memory_space<vmem>>, vector<1x1x16xf32>
      %170 = vector.shape_cast %169 : vector<1x1x16xf32> to vector<16xf32>
      %171 = vector.shape_cast %168 : vector<16xf32> to vector<1x1x16xf32>
      tpu.vector_store %arg6[%c1_131, %c13_132, %c0_133], %171 {strides = array<i32>} : memref<2x16x16xf32, #tpu.memory_space<vmem>>, vector<1x1x16xf32>,
      %c1_134 = arith.constant 1 : index
      %c224_135 = arith.constant 224 : index
      %172 = vector.load %arg5[%c1_134, %c224_135] : memref<2x256xf32, #tpu.memory_space<vmem>>, vector<1x16xf32>
      %173 = vector.shape_cast %172 : vector<1x16xf32> to vector<16xf32>
      %c1_136 = arith.constant 1 : index
      %c14_137 = arith.constant 14 : index
      %c0_138 = arith.constant 0 : index
      %174 = vector.load %arg6[%c1_136, %c14_137, %c0_138] : memref<2x16x16xf32, #tpu.memory_space<vmem>>, vector<1x1x16xf32>
      %175 = vector.shape_cast %174 : vector<1x1x16xf32> to vector<16xf32>
      %176 = vector.shape_cast %173 : vector<16xf32> to vector<1x1x16xf32>
      tpu.vector_store %arg6[%c1_136, %c14_137, %c0_138], %176 {strides = array<i32>} : memref<2x16x16xf32, #tpu.memory_space<vmem>>, vector<1x1x16xf32>,
      %c1_139 = arith.constant 1 : index
      %c240_140 = arith.constant 240 : index
      %177 = vector.load %arg5[%c1_139, %c240_140] : memref<2x256xf32, #tpu.memory_space<vmem>>, vector<1x16xf32>
      %178 = vector.shape_cast %177 : vector<1x16xf32> to vector<16xf32>
      %c1_141 = arith.constant 1 : index
      %c15_142 = arith.constant 15 : index
      %c0_143 = arith.constant 0 : index
      %179 = vector.load %arg6[%c1_141, %c15_142, %c0_143] : memref<2x16x16xf32, #tpu.memory_space<vmem>>, vector<1x1x16xf32>
      %180 = vector.shape_cast %179 : vector<1x1x16xf32> to vector<16xf32>
      %181 = vector.shape_cast %178 : vector<16xf32> to vector<1x1x16xf32>
      tpu.vector_store %arg6[%c1_141, %c15_142, %c0_143], %181 {strides = array<i32>} : memref<2x16x16xf32, #tpu.memory_space<vmem>>, vector<1x1x16xf32>,
      %c0_144 = arith.constant 0 : index
      %c0_145 = arith.constant 0 : index
      %c0_146 = arith.constant 0 : index
      %182 = vector.load %arg6[%c0_144, %c0_145, %c0_146] : memref<2x16x16xf32, #tpu.memory_space<vmem>>, vector<1x16x16xf32>
      %183 = vector.shape_cast %182 : vector<1x16x16xf32> to vector<16x16xf32>
      %c0_i32_147 = arith.constant 0 : i32
      %184 = arith.sitofp %c0_i32_147 : i32 to f32
      %185 = vector.broadcast %184 : f32 to vector<3x16xf32>
      %186 = tpu.concatenate %185, %183 in 0 : vector<3x16xf32>, vector<16x16xf32> -> vector<19x16xf32>
      %187 = vector.broadcast %184 : f32 to vector<3x16xf32>
      %188 = tpu.concatenate %186, %187 in 0 : vector<19x16xf32>, vector<3x16xf32> -> vector<22x16xf32>
      %189 = vector.broadcast %184 : f32 to vector<22x3xf32>
      %190 = tpu.concatenate %189, %188 in 1 : vector<22x3xf32>, vector<22x16xf32> -> vector<22x19xf32>
      %191 = vector.broadcast %184 : f32 to vector<22x3xf32>
      %192 = tpu.concatenate %190, %191 in 1 : vector<22x19xf32>, vector<22x3xf32> -> vector<22x22xf32>
      %c1_148 = arith.constant 1 : index
      %c0_149 = arith.constant 0 : index
      %c0_150 = arith.constant 0 : index
      %193 = vector.load %arg6[%c1_148, %c0_149, %c0_150] : memref<2x16x16xf32, #tpu.memory_space<vmem>>, vector<1x16x16xf32>
      %194 = vector.shape_cast %193 : vector<1x16x16xf32> to vector<16x16xf32>
      %c0_i32_151 = arith.constant 0 : i32
      %195 = arith.sitofp %c0_i32_151 : i32 to f32
      %196 = vector.broadcast %195 : f32 to vector<3x16xf32>
      %197 = tpu.concatenate %196, %194 in 0 : vector<3x16xf32>, vector<16x16xf32> -> vector<19x16xf32>
      %198 = vector.broadcast %195 : f32 to vector<3x16xf32>
      %199 = tpu.concatenate %197, %198 in 0 : vector<19x16xf32>, vector<3x16xf32> -> vector<22x16xf32>
      %200 = vector.broadcast %195 : f32 to vector<22x3xf32>
      %201 = tpu.concatenate %200, %199 in 1 : vector<22x3xf32>, vector<22x16xf32> -> vector<22x19xf32>
      %202 = vector.broadcast %195 : f32 to vector<22x3xf32>
      %203 = tpu.concatenate %201, %202 in 1 : vector<22x19xf32>, vector<22x3xf32> -> vector<22x22xf32>
      %c0_152 = arith.constant 0 : index
      %204 = memref.load %arg2[%c0_152] : memref<98xf32, #tpu.memory_space<smem>>
      %c1_153 = arith.constant 1 : index
      %205 = memref.load %arg2[%c1_153] : memref<98xf32, #tpu.memory_space<smem>>
      %c2_154 = arith.constant 2 : index
      %206 = memref.load %arg2[%c2_154] : memref<98xf32, #tpu.memory_space<smem>>
      %c3_155 = arith.constant 3 : index
      %207 = memref.load %arg2[%c3_155] : memref<98xf32, #tpu.memory_space<smem>>
      %c4_156 = arith.constant 4 : index
      %208 = memref.load %arg2[%c4_156] : memref<98xf32, #tpu.memory_space<smem>>
      %c5_157 = arith.constant 5 : index
      %209 = memref.load %arg2[%c5_157] : memref<98xf32, #tpu.memory_space<smem>>
      %c6_158 = arith.constant 6 : index
      %210 = memref.load %arg2[%c6_158] : memref<98xf32, #tpu.memory_space<smem>>
      %c7_159 = arith.constant 7 : index
      %211 = memref.load %arg2[%c7_159] : memref<98xf32, #tpu.memory_space<smem>>
      %c8_160 = arith.constant 8 : index
      %212 = memref.load %arg2[%c8_160] : memref<98xf32, #tpu.memory_space<smem>>
      %c9_161 = arith.constant 9 : index
      %213 = memref.load %arg2[%c9_161] : memref<98xf32, #tpu.memory_space<smem>>
      %c10_162 = arith.constant 10 : index
      %214 = memref.load %arg2[%c10_162] : memref<98xf32, #tpu.memory_space<smem>>
      %c11_163 = arith.constant 11 : index
      %215 = memref.load %arg2[%c11_163] : memref<98xf32, #tpu.memory_space<smem>>
      %c12_164 = arith.constant 12 : index
      %216 = memref.load %arg2[%c12_164] : memref<98xf32, #tpu.memory_space<smem>>
      %c13_165 = arith.constant 13 : index
      %217 = memref.load %arg2[%c13_165] : memref<98xf32, #tpu.memory_space<smem>>
      %c14_166 = arith.constant 14 : index
      %218 = memref.load %arg2[%c14_166] : memref<98xf32, #tpu.memory_space<smem>>
      %c15_167 = arith.constant 15 : index
      %219 = memref.load %arg2[%c15_167] : memref<98xf32, #tpu.memory_space<smem>>
      %c16_168 = arith.constant 16 : index
      %220 = memref.load %arg2[%c16_168] : memref<98xf32, #tpu.memory_space<smem>>
      %c17 = arith.constant 17 : index
      %221 = memref.load %arg2[%c17] : memref<98xf32, #tpu.memory_space<smem>>
      %c18 = arith.constant 18 : index
      %222 = memref.load %arg2[%c18] : memref<98xf32, #tpu.memory_space<smem>>
      %c19 = arith.constant 19 : index
      %223 = memref.load %arg2[%c19] : memref<98xf32, #tpu.memory_space<smem>>
      %c20 = arith.constant 20 : index
      %224 = memref.load %arg2[%c20] : memref<98xf32, #tpu.memory_space<smem>>
      %c21 = arith.constant 21 : index
      %225 = memref.load %arg2[%c21] : memref<98xf32, #tpu.memory_space<smem>>
      %c22 = arith.constant 22 : index
      %226 = memref.load %arg2[%c22] : memref<98xf32, #tpu.memory_space<smem>>
      %c23 = arith.constant 23 : index
      %227 = memref.load %arg2[%c23] : memref<98xf32, #tpu.memory_space<smem>>
      %c24 = arith.constant 24 : index
      %228 = memref.load %arg2[%c24] : memref<98xf32, #tpu.memory_space<smem>>
      %c25 = arith.constant 25 : index
      %229 = memref.load %arg2[%c25] : memref<98xf32, #tpu.memory_space<smem>>
      %c26 = arith.constant 26 : index
      %230 = memref.load %arg2[%c26] : memref<98xf32, #tpu.memory_space<smem>>
      %c27 = arith.constant 27 : index
      %231 = memref.load %arg2[%c27] : memref<98xf32, #tpu.memory_space<smem>>
      %c28 = arith.constant 28 : index
      %232 = memref.load %arg2[%c28] : memref<98xf32, #tpu.memory_space<smem>>
      %c29 = arith.constant 29 : index
      %233 = memref.load %arg2[%c29] : memref<98xf32, #tpu.memory_space<smem>>
      %c30 = arith.constant 30 : index
      %234 = memref.load %arg2[%c30] : memref<98xf32, #tpu.memory_space<smem>>
      %c31 = arith.constant 31 : index
      %235 = memref.load %arg2[%c31] : memref<98xf32, #tpu.memory_space<smem>>
      %c32_169 = arith.constant 32 : index
      %236 = memref.load %arg2[%c32_169] : memref<98xf32, #tpu.memory_space<smem>>
      %c33 = arith.constant 33 : index
      %237 = memref.load %arg2[%c33] : memref<98xf32, #tpu.memory_space<smem>>
      %c34 = arith.constant 34 : index
      %238 = memref.load %arg2[%c34] : memref<98xf32, #tpu.memory_space<smem>>
      %c35 = arith.constant 35 : index
      %239 = memref.load %arg2[%c35] : memref<98xf32, #tpu.memory_space<smem>>
      %c36 = arith.constant 36 : index
      %240 = memref.load %arg2[%c36] : memref<98xf32, #tpu.memory_space<smem>>
      %c37 = arith.constant 37 : index
      %241 = memref.load %arg2[%c37] : memref<98xf32, #tpu.memory_space<smem>>
      %c38 = arith.constant 38 : index
      %242 = memref.load %arg2[%c38] : memref<98xf32, #tpu.memory_space<smem>>
      %c39 = arith.constant 39 : index
      %243 = memref.load %arg2[%c39] : memref<98xf32, #tpu.memory_space<smem>>
      %c40 = arith.constant 40 : index
      %244 = memref.load %arg2[%c40] : memref<98xf32, #tpu.memory_space<smem>>
      %c41 = arith.constant 41 : index
      %245 = memref.load %arg2[%c41] : memref<98xf32, #tpu.memory_space<smem>>
      %c42 = arith.constant 42 : index
      %246 = memref.load %arg2[%c42] : memref<98xf32, #tpu.memory_space<smem>>
      %c43 = arith.constant 43 : index
      %247 = memref.load %arg2[%c43] : memref<98xf32, #tpu.memory_space<smem>>
      %c44 = arith.constant 44 : index
      %248 = memref.load %arg2[%c44] : memref<98xf32, #tpu.memory_space<smem>>
      %c45 = arith.constant 45 : index
      %249 = memref.load %arg2[%c45] : memref<98xf32, #tpu.memory_space<smem>>
      %c46 = arith.constant 46 : index
      %250 = memref.load %arg2[%c46] : memref<98xf32, #tpu.memory_space<smem>>
      %c47 = arith.constant 47 : index
      %251 = memref.load %arg2[%c47] : memref<98xf32, #tpu.memory_space<smem>>
      %c48_170 = arith.constant 48 : index
      %252 = memref.load %arg2[%c48_170] : memref<98xf32, #tpu.memory_space<smem>>
      %c49 = arith.constant 49 : index
      %253 = memref.load %arg2[%c49] : memref<98xf32, #tpu.memory_space<smem>>
      %c50 = arith.constant 50 : index
      %254 = memref.load %arg2[%c50] : memref<98xf32, #tpu.memory_space<smem>>
      %c51 = arith.constant 51 : index
      %255 = memref.load %arg2[%c51] : memref<98xf32, #tpu.memory_space<smem>>
      %c52 = arith.constant 52 : index
      %256 = memref.load %arg2[%c52] : memref<98xf32, #tpu.memory_space<smem>>
      %c53 = arith.constant 53 : index
      %257 = memref.load %arg2[%c53] : memref<98xf32, #tpu.memory_space<smem>>
      %c54 = arith.constant 54 : index
      %258 = memref.load %arg2[%c54] : memref<98xf32, #tpu.memory_space<smem>>
      %c55 = arith.constant 55 : index
      %259 = memref.load %arg2[%c55] : memref<98xf32, #tpu.memory_space<smem>>
      %c56 = arith.constant 56 : index
      %260 = memref.load %arg2[%c56] : memref<98xf32, #tpu.memory_space<smem>>
      %c57 = arith.constant 57 : index
      %261 = memref.load %arg2[%c57] : memref<98xf32, #tpu.memory_space<smem>>
      %c58 = arith.constant 58 : index
      %262 = memref.load %arg2[%c58] : memref<98xf32, #tpu.memory_space<smem>>
      %c59 = arith.constant 59 : index
      %263 = memref.load %arg2[%c59] : memref<98xf32, #tpu.memory_space<smem>>
      %c60 = arith.constant 60 : index
      %264 = memref.load %arg2[%c60] : memref<98xf32, #tpu.memory_space<smem>>
      %c61 = arith.constant 61 : index
      %265 = memref.load %arg2[%c61] : memref<98xf32, #tpu.memory_space<smem>>
      %c62 = arith.constant 62 : index
      %266 = memref.load %arg2[%c62] : memref<98xf32, #tpu.memory_space<smem>>
      %c63 = arith.constant 63 : index
      %267 = memref.load %arg2[%c63] : memref<98xf32, #tpu.memory_space<smem>>
      %c64_171 = arith.constant 64 : index
      %268 = memref.load %arg2[%c64_171] : memref<98xf32, #tpu.memory_space<smem>>
      %c65 = arith.constant 65 : index
      %269 = memref.load %arg2[%c65] : memref<98xf32, #tpu.memory_space<smem>>
      %c66 = arith.constant 66 : index
      %270 = memref.load %arg2[%c66] : memref<98xf32, #tpu.memory_space<smem>>
      %c67 = arith.constant 67 : index
      %271 = memref.load %arg2[%c67] : memref<98xf32, #tpu.memory_space<smem>>
      %c68 = arith.constant 68 : index
      %272 = memref.load %arg2[%c68] : memref<98xf32, #tpu.memory_space<smem>>
      %c69 = arith.constant 69 : index
      %273 = memref.load %arg2[%c69] : memref<98xf32, #tpu.memory_space<smem>>
      %c70 = arith.constant 70 : index
      %274 = memref.load %arg2[%c70] : memref<98xf32, #tpu.memory_space<smem>>
      %c71 = arith.constant 71 : index
      %275 = memref.load %arg2[%c71] : memref<98xf32, #tpu.memory_space<smem>>
      %c72 = arith.constant 72 : index
      %276 = memref.load %arg2[%c72] : memref<98xf32, #tpu.memory_space<smem>>
      %c73 = arith.constant 73 : index
      %277 = memref.load %arg2[%c73] : memref<98xf32, #tpu.memory_space<smem>>
      %c74 = arith.constant 74 : index
      %278 = memref.load %arg2[%c74] : memref<98xf32, #tpu.memory_space<smem>>
      %c75 = arith.constant 75 : index
      %279 = memref.load %arg2[%c75] : memref<98xf32, #tpu.memory_space<smem>>
      %c76 = arith.constant 76 : index
      %280 = memref.load %arg2[%c76] : memref<98xf32, #tpu.memory_space<smem>>
      %c77 = arith.constant 77 : index
      %281 = memref.load %arg2[%c77] : memref<98xf32, #tpu.memory_space<smem>>
      %c78 = arith.constant 78 : index
      %282 = memref.load %arg2[%c78] : memref<98xf32, #tpu.memory_space<smem>>
      %c79 = arith.constant 79 : index
      %283 = memref.load %arg2[%c79] : memref<98xf32, #tpu.memory_space<smem>>
      %c80_172 = arith.constant 80 : index
      %284 = memref.load %arg2[%c80_172] : memref<98xf32, #tpu.memory_space<smem>>
      %c81 = arith.constant 81 : index
      %285 = memref.load %arg2[%c81] : memref<98xf32, #tpu.memory_space<smem>>
      %c82 = arith.constant 82 : index
      %286 = memref.load %arg2[%c82] : memref<98xf32, #tpu.memory_space<smem>>
      %c83 = arith.constant 83 : index
      %287 = memref.load %arg2[%c83] : memref<98xf32, #tpu.memory_space<smem>>
      %c84 = arith.constant 84 : index
      %288 = memref.load %arg2[%c84] : memref<98xf32, #tpu.memory_space<smem>>
      %c85 = arith.constant 85 : index
      %289 = memref.load %arg2[%c85] : memref<98xf32, #tpu.memory_space<smem>>
      %c86 = arith.constant 86 : index
      %290 = memref.load %arg2[%c86] : memref<98xf32, #tpu.memory_space<smem>>
      %c87 = arith.constant 87 : index
      %291 = memref.load %arg2[%c87] : memref<98xf32, #tpu.memory_space<smem>>
      %c88 = arith.constant 88 : index
      %292 = memref.load %arg2[%c88] : memref<98xf32, #tpu.memory_space<smem>>
      %c89 = arith.constant 89 : index
      %293 = memref.load %arg2[%c89] : memref<98xf32, #tpu.memory_space<smem>>
      %c90 = arith.constant 90 : index
      %294 = memref.load %arg2[%c90] : memref<98xf32, #tpu.memory_space<smem>>
      %c91 = arith.constant 91 : index
      %295 = memref.load %arg2[%c91] : memref<98xf32, #tpu.memory_space<smem>>
      %c92 = arith.constant 92 : index
      %296 = memref.load %arg2[%c92] : memref<98xf32, #tpu.memory_space<smem>>
      %c93 = arith.constant 93 : index
      %297 = memref.load %arg2[%c93] : memref<98xf32, #tpu.memory_space<smem>>
      %c94 = arith.constant 94 : index
      %298 = memref.load %arg2[%c94] : memref<98xf32, #tpu.memory_space<smem>>
      %c95 = arith.constant 95 : index
      %299 = memref.load %arg2[%c95] : memref<98xf32, #tpu.memory_space<smem>>
      %c96_173 = arith.constant 96 : index
      %300 = memref.load %arg2[%c96_173] : memref<98xf32, #tpu.memory_space<smem>>
      %c97 = arith.constant 97 : index
      %301 = memref.load %arg2[%c97] : memref<98xf32, #tpu.memory_space<smem>>
      %302 = vector.extract_strided_slice %192 {offsets = [0, 0], sizes = [22, 16], strides = [1, 1]} : vector<22x22xf32> to vector<22x16xf32>
      %303 = vector.extract_strided_slice %203 {offsets = [0, 0], sizes = [22, 16], strides = [1, 1]} : vector<22x22xf32> to vector<22x16xf32>
      %304 = vector.broadcast %204 : f32 to vector<22x16xf32>
      %305 = arith.mulf %304, %302 : vector<22x16xf32>
      %306 = vector.broadcast %253 : f32 to vector<22x16xf32>
      %307 = arith.mulf %306, %303 : vector<22x16xf32>
      %308 = arith.addf %305, %307 : vector<22x16xf32>
      %309 = vector.broadcast %211 : f32 to vector<22x16xf32>
      %310 = arith.mulf %309, %302 : vector<22x16xf32>
      %311 = vector.broadcast %260 : f32 to vector<22x16xf32>
      %312 = arith.mulf %311, %303 : vector<22x16xf32>
      %313 = arith.addf %310, %312 : vector<22x16xf32>
      %314 = vector.broadcast %218 : f32 to vector<22x16xf32>
      %315 = arith.mulf %314, %302 : vector<22x16xf32>
      %316 = vector.broadcast %267 : f32 to vector<22x16xf32>
      %317 = arith.mulf %316, %303 : vector<22x16xf32>
      %318 = arith.addf %315, %317 : vector<22x16xf32>
      %319 = vector.broadcast %225 : f32 to vector<22x16xf32>
      %320 = arith.mulf %319, %302 : vector<22x16xf32>
      %321 = vector.broadcast %274 : f32 to vector<22x16xf32>
      %322 = arith.mulf %321, %303 : vector<22x16xf32>
      %323 = arith.addf %320, %322 : vector<22x16xf32>
      %324 = vector.broadcast %232 : f32 to vector<22x16xf32>
      %325 = arith.mulf %324, %302 : vector<22x16xf32>
      %326 = vector.broadcast %281 : f32 to vector<22x16xf32>
      %327 = arith.mulf %326, %303 : vector<22x16xf32>
      %328 = arith.addf %325, %327 : vector<22x16xf32>
      %329 = vector.broadcast %239 : f32 to vector<22x16xf32>
      %330 = arith.mulf %329, %302 : vector<22x16xf32>
      %331 = vector.broadcast %288 : f32 to vector<22x16xf32>
      %332 = arith.mulf %331, %303 : vector<22x16xf32>
      %333 = arith.addf %330, %332 : vector<22x16xf32>
      %334 = vector.broadcast %246 : f32 to vector<22x16xf32>
      %335 = arith.mulf %334, %302 : vector<22x16xf32>
      %336 = vector.broadcast %295 : f32 to vector<22x16xf32>
      %337 = arith.mulf %336, %303 : vector<22x16xf32>
      %338 = arith.addf %335, %337 : vector<22x16xf32>
      %339 = vector.extract_strided_slice %192 {offsets = [0, 1], sizes = [22, 16], strides = [1, 1]} : vector<22x22xf32> to vector<22x16xf32>
      %340 = vector.extract_strided_slice %203 {offsets = [0, 1], sizes = [22, 16], strides = [1, 1]} : vector<22x22xf32> to vector<22x16xf32>
      %341 = vector.broadcast %205 : f32 to vector<22x16xf32>
      %342 = arith.mulf %341, %339 : vector<22x16xf32>
      %343 = vector.broadcast %254 : f32 to vector<22x16xf32>
      %344 = arith.mulf %343, %340 : vector<22x16xf32>
      %345 = arith.addf %342, %344 : vector<22x16xf32>
      %346 = arith.addf %308, %345 : vector<22x16xf32>
      %347 = vector.broadcast %212 : f32 to vector<22x16xf32>
      %348 = arith.mulf %347, %339 : vector<22x16xf32>
      %349 = vector.broadcast %261 : f32 to vector<22x16xf32>
      %350 = arith.mulf %349, %340 : vector<22x16xf32>
      %351 = arith.addf %348, %350 : vector<22x16xf32>
      %352 = arith.addf %313, %351 : vector<22x16xf32>
      %353 = vector.broadcast %219 : f32 to vector<22x16xf32>
      %354 = arith.mulf %353, %339 : vector<22x16xf32>
      %355 = vector.broadcast %268 : f32 to vector<22x16xf32>
      %356 = arith.mulf %355, %340 : vector<22x16xf32>
      %357 = arith.addf %354, %356 : vector<22x16xf32>
      %358 = arith.addf %318, %357 : vector<22x16xf32>
      %359 = vector.broadcast %226 : f32 to vector<22x16xf32>
      %360 = arith.mulf %359, %339 : vector<22x16xf32>
      %361 = vector.broadcast %275 : f32 to vector<22x16xf32>
      %362 = arith.mulf %361, %340 : vector<22x16xf32>
      %363 = arith.addf %360, %362 : vector<22x16xf32>
      %364 = arith.addf %323, %363 : vector<22x16xf32>
      %365 = vector.broadcast %233 : f32 to vector<22x16xf32>
      %366 = arith.mulf %365, %339 : vector<22x16xf32>
      %367 = vector.broadcast %282 : f32 to vector<22x16xf32>
      %368 = arith.mulf %367, %340 : vector<22x16xf32>
      %369 = arith.addf %366, %368 : vector<22x16xf32>
      %370 = arith.addf %328, %369 : vector<22x16xf32>
      %371 = vector.broadcast %240 : f32 to vector<22x16xf32>
      %372 = arith.mulf %371, %339 : vector<22x16xf32>
      %373 = vector.broadcast %289 : f32 to vector<22x16xf32>
      %374 = arith.mulf %373, %340 : vector<22x16xf32>
      %375 = arith.addf %372, %374 : vector<22x16xf32>
      %376 = arith.addf %333, %375 : vector<22x16xf32>
      %377 = vector.broadcast %247 : f32 to vector<22x16xf32>
      %378 = arith.mulf %377, %339 : vector<22x16xf32>
      %379 = vector.broadcast %296 : f32 to vector<22x16xf32>
      %380 = arith.mulf %379, %340 : vector<22x16xf32>
      %381 = arith.addf %378, %380 : vector<22x16xf32>
      %382 = arith.addf %338, %381 : vector<22x16xf32>
      %383 = vector.extract_strided_slice %192 {offsets = [0, 2], sizes = [22, 16], strides = [1, 1]} : vector<22x22xf32> to vector<22x16xf32>
      %384 = vector.extract_strided_slice %203 {offsets = [0, 2], sizes = [22, 16], strides = [1, 1]} : vector<22x22xf32> to vector<22x16xf32>
      %385 = vector.broadcast %206 : f32 to vector<22x16xf32>
      %386 = arith.mulf %385, %383 : vector<22x16xf32>
      %387 = vector.broadcast %255 : f32 to vector<22x16xf32>
      %388 = arith.mulf %387, %384 : vector<22x16xf32>
      %389 = arith.addf %386, %388 : vector<22x16xf32>
      %390 = arith.addf %346, %389 : vector<22x16xf32>
      %391 = vector.broadcast %213 : f32 to vector<22x16xf32>
      %392 = arith.mulf %391, %383 : vector<22x16xf32>
      %393 = vector.broadcast %262 : f32 to vector<22x16xf32>
      %394 = arith.mulf %393, %384 : vector<22x16xf32>
      %395 = arith.addf %392, %394 : vector<22x16xf32>
      %396 = arith.addf %352, %395 : vector<22x16xf32>
      %397 = vector.broadcast %220 : f32 to vector<22x16xf32>
      %398 = arith.mulf %397, %383 : vector<22x16xf32>
      %399 = vector.broadcast %269 : f32 to vector<22x16xf32>
      %400 = arith.mulf %399, %384 : vector<22x16xf32>
      %401 = arith.addf %398, %400 : vector<22x16xf32>
      %402 = arith.addf %358, %401 : vector<22x16xf32>
      %403 = vector.broadcast %227 : f32 to vector<22x16xf32>
      %404 = arith.mulf %403, %383 : vector<22x16xf32>
      %405 = vector.broadcast %276 : f32 to vector<22x16xf32>
      %406 = arith.mulf %405, %384 : vector<22x16xf32>
      %407 = arith.addf %404, %406 : vector<22x16xf32>
      %408 = arith.addf %364, %407 : vector<22x16xf32>
      %409 = vector.broadcast %234 : f32 to vector<22x16xf32>
      %410 = arith.mulf %409, %383 : vector<22x16xf32>
      %411 = vector.broadcast %283 : f32 to vector<22x16xf32>
      %412 = arith.mulf %411, %384 : vector<22x16xf32>
      %413 = arith.addf %410, %412 : vector<22x16xf32>
      %414 = arith.addf %370, %413 : vector<22x16xf32>
      %415 = vector.broadcast %241 : f32 to vector<22x16xf32>
      %416 = arith.mulf %415, %383 : vector<22x16xf32>
      %417 = vector.broadcast %290 : f32 to vector<22x16xf32>
      %418 = arith.mulf %417, %384 : vector<22x16xf32>
      %419 = arith.addf %416, %418 : vector<22x16xf32>
      %420 = arith.addf %376, %419 : vector<22x16xf32>
      %421 = vector.broadcast %248 : f32 to vector<22x16xf32>
      %422 = arith.mulf %421, %383 : vector<22x16xf32>
      %423 = vector.broadcast %297 : f32 to vector<22x16xf32>
      %424 = arith.mulf %423, %384 : vector<22x16xf32>
      %425 = arith.addf %422, %424 : vector<22x16xf32>
      %426 = arith.addf %382, %425 : vector<22x16xf32>
      %427 = vector.extract_strided_slice %192 {offsets = [0, 3], sizes = [22, 16], strides = [1, 1]} : vector<22x22xf32> to vector<22x16xf32>
      %428 = vector.extract_strided_slice %203 {offsets = [0, 3], sizes = [22, 16], strides = [1, 1]} : vector<22x22xf32> to vector<22x16xf32>
      %429 = vector.broadcast %207 : f32 to vector<22x16xf32>
      %430 = arith.mulf %429, %427 : vector<22x16xf32>
      %431 = vector.broadcast %256 : f32 to vector<22x16xf32>
      %432 = arith.mulf %431, %428 : vector<22x16xf32>
      %433 = arith.addf %430, %432 : vector<22x16xf32>
      %434 = arith.addf %390, %433 : vector<22x16xf32>
      %435 = vector.broadcast %214 : f32 to vector<22x16xf32>
      %436 = arith.mulf %435, %427 : vector<22x16xf32>
      %437 = vector.broadcast %263 : f32 to vector<22x16xf32>
      %438 = arith.mulf %437, %428 : vector<22x16xf32>
      %439 = arith.addf %436, %438 : vector<22x16xf32>
      %440 = arith.addf %396, %439 : vector<22x16xf32>
      %441 = vector.broadcast %221 : f32 to vector<22x16xf32>
      %442 = arith.mulf %441, %427 : vector<22x16xf32>
      %443 = vector.broadcast %270 : f32 to vector<22x16xf32>
      %444 = arith.mulf %443, %428 : vector<22x16xf32>
      %445 = arith.addf %442, %444 : vector<22x16xf32>
      %446 = arith.addf %402, %445 : vector<22x16xf32>
      %447 = vector.broadcast %228 : f32 to vector<22x16xf32>
      %448 = arith.mulf %447, %427 : vector<22x16xf32>
      %449 = vector.broadcast %277 : f32 to vector<22x16xf32>
      %450 = arith.mulf %449, %428 : vector<22x16xf32>
      %451 = arith.addf %448, %450 : vector<22x16xf32>
      %452 = arith.addf %408, %451 : vector<22x16xf32>
      %453 = vector.broadcast %235 : f32 to vector<22x16xf32>
      %454 = arith.mulf %453, %427 : vector<22x16xf32>
      %455 = vector.broadcast %284 : f32 to vector<22x16xf32>
      %456 = arith.mulf %455, %428 : vector<22x16xf32>
      %457 = arith.addf %454, %456 : vector<22x16xf32>
      %458 = arith.addf %414, %457 : vector<22x16xf32>
      %459 = vector.broadcast %242 : f32 to vector<22x16xf32>
      %460 = arith.mulf %459, %427 : vector<22x16xf32>
      %461 = vector.broadcast %291 : f32 to vector<22x16xf32>
      %462 = arith.mulf %461, %428 : vector<22x16xf32>
      %463 = arith.addf %460, %462 : vector<22x16xf32>
      %464 = arith.addf %420, %463 : vector<22x16xf32>
      %465 = vector.broadcast %249 : f32 to vector<22x16xf32>
      %466 = arith.mulf %465, %427 : vector<22x16xf32>
      %467 = vector.broadcast %298 : f32 to vector<22x16xf32>
      %468 = arith.mulf %467, %428 : vector<22x16xf32>
      %469 = arith.addf %466, %468 : vector<22x16xf32>
      %470 = arith.addf %426, %469 : vector<22x16xf32>
      %471 = vector.extract_strided_slice %192 {offsets = [0, 4], sizes = [22, 16], strides = [1, 1]} : vector<22x22xf32> to vector<22x16xf32>
      %472 = vector.extract_strided_slice %203 {offsets = [0, 4], sizes = [22, 16], strides = [1, 1]} : vector<22x22xf32> to vector<22x16xf32>
      %473 = vector.broadcast %208 : f32 to vector<22x16xf32>
      %474 = arith.mulf %473, %471 : vector<22x16xf32>
      %475 = vector.broadcast %257 : f32 to vector<22x16xf32>
      %476 = arith.mulf %475, %472 : vector<22x16xf32>
      %477 = arith.addf %474, %476 : vector<22x16xf32>
      %478 = arith.addf %434, %477 : vector<22x16xf32>
      %479 = vector.broadcast %215 : f32 to vector<22x16xf32>
      %480 = arith.mulf %479, %471 : vector<22x16xf32>
      %481 = vector.broadcast %264 : f32 to vector<22x16xf32>
      %482 = arith.mulf %481, %472 : vector<22x16xf32>
      %483 = arith.addf %480, %482 : vector<22x16xf32>
      %484 = arith.addf %440, %483 : vector<22x16xf32>
      %485 = vector.broadcast %222 : f32 to vector<22x16xf32>
      %486 = arith.mulf %485, %471 : vector<22x16xf32>
      %487 = vector.broadcast %271 : f32 to vector<22x16xf32>
      %488 = arith.mulf %487, %472 : vector<22x16xf32>
      %489 = arith.addf %486, %488 : vector<22x16xf32>
      %490 = arith.addf %446, %489 : vector<22x16xf32>
      %491 = vector.broadcast %229 : f32 to vector<22x16xf32>
      %492 = arith.mulf %491, %471 : vector<22x16xf32>
      %493 = vector.broadcast %278 : f32 to vector<22x16xf32>
      %494 = arith.mulf %493, %472 : vector<22x16xf32>
      %495 = arith.addf %492, %494 : vector<22x16xf32>
      %496 = arith.addf %452, %495 : vector<22x16xf32>
      %497 = vector.broadcast %236 : f32 to vector<22x16xf32>
      %498 = arith.mulf %497, %471 : vector<22x16xf32>
      %499 = vector.broadcast %285 : f32 to vector<22x16xf32>
      %500 = arith.mulf %499, %472 : vector<22x16xf32>
      %501 = arith.addf %498, %500 : vector<22x16xf32>
      %502 = arith.addf %458, %501 : vector<22x16xf32>
      %503 = vector.broadcast %243 : f32 to vector<22x16xf32>
      %504 = arith.mulf %503, %471 : vector<22x16xf32>
      %505 = vector.broadcast %292 : f32 to vector<22x16xf32>
      %506 = arith.mulf %505, %472 : vector<22x16xf32>
      %507 = arith.addf %504, %506 : vector<22x16xf32>
      %508 = arith.addf %464, %507 : vector<22x16xf32>
      %509 = vector.broadcast %250 : f32 to vector<22x16xf32>
      %510 = arith.mulf %509, %471 : vector<22x16xf32>
      %511 = vector.broadcast %299 : f32 to vector<22x16xf32>
      %512 = arith.mulf %511, %472 : vector<22x16xf32>
      %513 = arith.addf %510, %512 : vector<22x16xf32>
      %514 = arith.addf %470, %513 : vector<22x16xf32>
      %515 = vector.extract_strided_slice %192 {offsets = [0, 5], sizes = [22, 16], strides = [1, 1]} : vector<22x22xf32> to vector<22x16xf32>
      %516 = vector.extract_strided_slice %203 {offsets = [0, 5], sizes = [22, 16], strides = [1, 1]} : vector<22x22xf32> to vector<22x16xf32>
      %517 = vector.broadcast %209 : f32 to vector<22x16xf32>
      %518 = arith.mulf %517, %515 : vector<22x16xf32>
      %519 = vector.broadcast %258 : f32 to vector<22x16xf32>
      %520 = arith.mulf %519, %516 : vector<22x16xf32>
      %521 = arith.addf %518, %520 : vector<22x16xf32>
      %522 = arith.addf %478, %521 : vector<22x16xf32>
      %523 = vector.broadcast %216 : f32 to vector<22x16xf32>
      %524 = arith.mulf %523, %515 : vector<22x16xf32>
      %525 = vector.broadcast %265 : f32 to vector<22x16xf32>
      %526 = arith.mulf %525, %516 : vector<22x16xf32>
      %527 = arith.addf %524, %526 : vector<22x16xf32>
      %528 = arith.addf %484, %527 : vector<22x16xf32>
      %529 = vector.broadcast %223 : f32 to vector<22x16xf32>
      %530 = arith.mulf %529, %515 : vector<22x16xf32>
      %531 = vector.broadcast %272 : f32 to vector<22x16xf32>
      %532 = arith.mulf %531, %516 : vector<22x16xf32>
      %533 = arith.addf %530, %532 : vector<22x16xf32>
      %534 = arith.addf %490, %533 : vector<22x16xf32>
      %535 = vector.broadcast %230 : f32 to vector<22x16xf32>
      %536 = arith.mulf %535, %515 : vector<22x16xf32>
      %537 = vector.broadcast %279 : f32 to vector<22x16xf32>
      %538 = arith.mulf %537, %516 : vector<22x16xf32>
      %539 = arith.addf %536, %538 : vector<22x16xf32>
      %540 = arith.addf %496, %539 : vector<22x16xf32>
      %541 = vector.broadcast %237 : f32 to vector<22x16xf32>
      %542 = arith.mulf %541, %515 : vector<22x16xf32>
      %543 = vector.broadcast %286 : f32 to vector<22x16xf32>
      %544 = arith.mulf %543, %516 : vector<22x16xf32>
      %545 = arith.addf %542, %544 : vector<22x16xf32>
      %546 = arith.addf %502, %545 : vector<22x16xf32>
      %547 = vector.broadcast %244 : f32 to vector<22x16xf32>
      %548 = arith.mulf %547, %515 : vector<22x16xf32>
      %549 = vector.broadcast %293 : f32 to vector<22x16xf32>
      %550 = arith.mulf %549, %516 : vector<22x16xf32>
      %551 = arith.addf %548, %550 : vector<22x16xf32>
      %552 = arith.addf %508, %551 : vector<22x16xf32>
      %553 = vector.broadcast %251 : f32 to vector<22x16xf32>
      %554 = arith.mulf %553, %515 : vector<22x16xf32>
      %555 = vector.broadcast %300 : f32 to vector<22x16xf32>
      %556 = arith.mulf %555, %516 : vector<22x16xf32>
      %557 = arith.addf %554, %556 : vector<22x16xf32>
      %558 = arith.addf %514, %557 : vector<22x16xf32>
      %559 = vector.extract_strided_slice %192 {offsets = [0, 6], sizes = [22, 16], strides = [1, 1]} : vector<22x22xf32> to vector<22x16xf32>
      %560 = vector.extract_strided_slice %203 {offsets = [0, 6], sizes = [22, 16], strides = [1, 1]} : vector<22x22xf32> to vector<22x16xf32>
      %561 = vector.broadcast %210 : f32 to vector<22x16xf32>
      %562 = arith.mulf %561, %559 : vector<22x16xf32>
      %563 = vector.broadcast %259 : f32 to vector<22x16xf32>
      %564 = arith.mulf %563, %560 : vector<22x16xf32>
      %565 = arith.addf %562, %564 : vector<22x16xf32>
      %566 = arith.addf %522, %565 : vector<22x16xf32>
      %567 = vector.broadcast %217 : f32 to vector<22x16xf32>
      %568 = arith.mulf %567, %559 : vector<22x16xf32>
      %569 = vector.broadcast %266 : f32 to vector<22x16xf32>
      %570 = arith.mulf %569, %560 : vector<22x16xf32>
      %571 = arith.addf %568, %570 : vector<22x16xf32>
      %572 = arith.addf %528, %571 : vector<22x16xf32>
      %573 = vector.broadcast %224 : f32 to vector<22x16xf32>
      %574 = arith.mulf %573, %559 : vector<22x16xf32>
      %575 = vector.broadcast %273 : f32 to vector<22x16xf32>
      %576 = arith.mulf %575, %560 : vector<22x16xf32>
      %577 = arith.addf %574, %576 : vector<22x16xf32>
      %578 = arith.addf %534, %577 : vector<22x16xf32>
      %579 = vector.broadcast %231 : f32 to vector<22x16xf32>
      %580 = arith.mulf %579, %559 : vector<22x16xf32>
      %581 = vector.broadcast %280 : f32 to vector<22x16xf32>
      %582 = arith.mulf %581, %560 : vector<22x16xf32>
      %583 = arith.addf %580, %582 : vector<22x16xf32>
      %584 = arith.addf %540, %583 : vector<22x16xf32>
      %585 = vector.broadcast %238 : f32 to vector<22x16xf32>
      %586 = arith.mulf %585, %559 : vector<22x16xf32>
      %587 = vector.broadcast %287 : f32 to vector<22x16xf32>
      %588 = arith.mulf %587, %560 : vector<22x16xf32>
      %589 = arith.addf %586, %588 : vector<22x16xf32>
      %590 = arith.addf %546, %589 : vector<22x16xf32>
      %591 = vector.broadcast %245 : f32 to vector<22x16xf32>
      %592 = arith.mulf %591, %559 : vector<22x16xf32>
      %593 = vector.broadcast %294 : f32 to vector<22x16xf32>
      %594 = arith.mulf %593, %560 : vector<22x16xf32>
      %595 = arith.addf %592, %594 : vector<22x16xf32>
      %596 = arith.addf %552, %595 : vector<22x16xf32>
      %597 = vector.broadcast %252 : f32 to vector<22x16xf32>
      %598 = arith.mulf %597, %559 : vector<22x16xf32>
      %599 = vector.broadcast %301 : f32 to vector<22x16xf32>
      %600 = arith.mulf %599, %560 : vector<22x16xf32>
      %601 = arith.addf %598, %600 : vector<22x16xf32>
      %602 = arith.addf %558, %601 : vector<22x16xf32>
      %603 = vector.extract_strided_slice %566 {offsets = [0, 0], sizes = [16, 16], strides = [1, 1]} : vector<22x16xf32> to vector<16x16xf32>
      %604 = vector.extract_strided_slice %572 {offsets = [1, 0], sizes = [16, 16], strides = [1, 1]} : vector<22x16xf32> to vector<16x16xf32>
      %605 = arith.addf %603, %604 : vector<16x16xf32>
      %606 = vector.extract_strided_slice %578 {offsets = [2, 0], sizes = [16, 16], strides = [1, 1]} : vector<22x16xf32> to vector<16x16xf32>
      %607 = arith.addf %605, %606 : vector<16x16xf32>
      %608 = vector.extract_strided_slice %584 {offsets = [3, 0], sizes = [16, 16], strides = [1, 1]} : vector<22x16xf32> to vector<16x16xf32>
      %609 = arith.addf %607, %608 : vector<16x16xf32>
      %610 = vector.extract_strided_slice %590 {offsets = [4, 0], sizes = [16, 16], strides = [1, 1]} : vector<22x16xf32> to vector<16x16xf32>
      %611 = arith.addf %609, %610 : vector<16x16xf32>
      %612 = vector.extract_strided_slice %596 {offsets = [5, 0], sizes = [16, 16], strides = [1, 1]} : vector<22x16xf32> to vector<16x16xf32>
      %613 = arith.addf %611, %612 : vector<16x16xf32>
      %614 = vector.extract_strided_slice %602 {offsets = [6, 0], sizes = [16, 16], strides = [1, 1]} : vector<22x16xf32> to vector<16x16xf32>
      %615 = arith.addf %613, %614 : vector<16x16xf32>
      %616 = arith.negf %615 : vector<16x16xf32>
      %617 = math.exp %616 : vector<16x16xf32>
      %cst_174 = arith.constant 1.000000e+00 : f32
      %618 = vector.broadcast %cst_174 : f32 to vector<16x16xf32>
      %619 = arith.addf %618, %617 : vector<16x16xf32>
      %620 = arith.divf %618, %619 : vector<16x16xf32>
      %c0_175 = arith.constant 0 : index
      %c0_176 = arith.constant 0 : index
      %c0_177 = arith.constant 0 : index
      %c0_178 = arith.constant 0 : index
      %621 = vector.load %arg4[%c0_175, %c0_176, %c0_177, %c0_178] : memref<1x1x16x16xf32, #tpu.memory_space<vmem>>, vector<1x1x16x16xf32>
      %622 = vector.shape_cast %621 : vector<1x1x16x16xf32> to vector<16x16xf32>
      %623 = vector.shape_cast %620 : vector<16x16xf32> to vector<1x1x16x16xf32>
      tpu.vector_store %arg4[%c0_175, %c0_176, %c0_177, %c0_178], %623 {strides = array<i32>} : memref<1x1x16x16xf32, #tpu.memory_space<vmem>>, vector<1x1x16x16xf32>,
    } else {
    }
    return
  }
  func.func @transform_0(%arg0: i32, %arg1: i32) -> i32 {
    %c0_i32 = arith.constant 0 : i32
    %c0_i32_0 = arith.constant 0 : i32
    return %c0_i32 : i32
  }
  func.func @transform_1(%arg0: i32, %arg1: i32) -> (i32, i32, i32) {
    %c0_i32 = arith.constant 0 : i32
    %c0_i32_0 = arith.constant 0 : i32
    return %arg0, %arg1, %c0_i32 : i32, i32, i32
  }
  func.func @transform_2(%arg0: i32, %arg1: i32) -> (i32, i32, i32, i32) {
    %c0_i32 = arith.constant 0 : i32
    %c0_i32_0 = arith.constant 0 : i32
    %c0_i32_1 = arith.constant 0 : i32
    %c0_i32_2 = arith.constant 0 : i32
    return %arg0, %c0_i32, %c0_i32_0, %c0_i32_1 : i32, i32, i32, i32
  }
}

</mosaic_0001>

<bundles_post_ra>
// kernel: tpu_custom_call.1
= control target key start
LH: loop header
LB: loop body
LE: loop exit
PB: predicated region body
PF: predicated region fallthrough
CT: control target
= control target key end

     0   :  { %7 = vsyncpa [#allocation7], 0  ;;  %s3567_s0 = inlined_call_operand.hbm [shape: f32[98], index: 0, kind: input, shape index: {}]   ;;  %s3568_s1 = inlined_call_operand.hbm [shape: f32[2,4,256], index: 1, kind: input, shape index: {}]   ;;  %s3569_s2 = inlined_call_operand.hbm [shape: f32[2,1,16,16], index: 2, kind: output, shape index: {}]  }
   0x1   :  { %8 = vsyncpa [#allocation5], 0 }
   0x2   :  { %10 = vsyncpa [#allocation5 + $0x1], 0 }
   0x3   :  { %11 = vsyncpa [#allocation6], 0 }
   0x4   :  { %13 = vsyncpa [#allocation6 + $0x1], 0  ;;  %s2391_s9 = smov 0   ;;  %s2393_s10 = smov 0  }
   0x5   :  { %s2395_s11 = smov 0   ;;  %s2397_s12 = smov 0  }
   0x6   :  { %s2399_s13 = smov 0   ;;  %s2401_s14 = smov 0  }
   0x7 LB: > { %s1979_s15 = sadd.s32 4294967295, %s2355_s14   ;;  %s1980_s16 = sadd.s32 4294967294, %s2355_s14   ;;  %s2355_s14 = sphi %s2401_s14, %s19_s14   ;;  %s2351_s13 = sphi %s2399_s13, %s3583_s13   ;;  %s2347_s12 = sphi %s2397_s12, %s3582_s12   ;;  %s2343_s11 = sphi %s2395_s11, %s3581_s11   ;;  %s2339_s10 = sphi %s2393_s10, %s3580_s10   ;;  %s2335_s9 = sphi %s2391_s9, %s3579_s9  }
   0x8   : > { %p74_p0 = scmp.ne.s32.totalorder %s2339_s10, %s2335_s9  ;;  %p2425_p1 = scmp.eq.s32.totalorder %s1979_s15, 0 }
   0x9   : > { %p2429_p2 = scmp.eq.s32.totalorder %s1979_s15, 1  ;;  %p104_p3 = scmp.eq.s32.totalorder %s1980_s16, 1 }
   0xa   : > { %p2435_p4 = por %p2425_p1, %p74_p0  ;;  %p1981_p5 = scmp.ge.s32.totalorder %s2355_s14, 1 }
   0xb   : > { %p2440_p6 = por %p104_p3, %p74_p0  ;;  %p111_p7 = scmp.lt.s32.totalorder %s2355_s14, 3 }
   0xc   : > { %s123_s23 = sshll.u32 %s3567_s0, 4  ;;  %s31_s25 = sadd.s32 1, %s2351_s13  ;;  %s124_s23 = int_to_ptr.hbm [resolvable:$true] %s123_s23 }
   0xd   : > { %p2448_p8 = pnand %p1981_p5, %p111_p7  ;;  %s61_s26 = sadd.s32 1, %s2343_s11 }
   0xe   : > { %p33_p12 = scmp.ge.s32.totalorder %s31_s25, 2  ;;  %s2357_s27 = smov [#allocation4]  }
   0xf   : > { %p2105_p10 = pneg %p2448_p8  ;;  %p68_p13 = scmp.ne.s32.totalorder %s2343_s11, %s2339_s10 }
  0x10   : > { %s3585_s25 = smov (%p33_p12, %s31_s25), 0  ;;  %p69_p0 = scmp.eq.s32.totalorder %s2355_s14, 0 }
  0x11   : > { %p2106_p11 = pnand %p2105_p10, %p2425_p1  ;;  %s56_s28 = ssub.s32 %s2351_s13, %s3585_s25 }
  0x12   : > { %p2118_p3 = scmp.lt.s32.totalorder %s2355_s14, 2  ;;  %p59_p5 = scmp.eq.s32.totalorder %s56_s28, 0 }
  0x13   : > { %2108 = dma.hbm_to_smem (!%p2106_p11), %s124_s23, 16, %s2357_s27, [#allocation7]  }
  0x14   : > { %p70_p7 = por %p69_p0, %p68_p13  ;;  %p2469_p9 = por %p2429_p2, %p68_p13 }
  0x15   : > { %s134_s30 = sand.u32 1, %s2343_s11   ;;  %s2095_s5 = sshll.u32 %s2351_s13, 3 }
  0x16   : > { %s2475_s3 = scalar_select %p59_p5, %s2343_s11, %s61_s26  }
  0x17   : > { %s1984_s4 = sshll.u32 %s134_s30, 3  ;;  %s145_s8 = scalar_lea.hbm %s3568_s1, %s2095_s5 }
  0x18   : > { %s138_s15 = scalar_lea.vmem [#allocation8], %s1984_s4  ;;  %s147_s21 = sshll.u32 %s145_s8, 4  ;;  %s148_s21 = int_to_ptr.hbm [resolvable:$true] %s147_s21 }
  0x19   : > { %s149_s16 = sshll.u32 %s138_s15, 4  ;;  %p2110_p10 = pnand %p2118_p3, %p70_p7  ;;  %s150_s16 = int_to_ptr.vmem [resolvable:$true] %s149_s16 }
  0x1a   : > { %s135_s18 = scalar_lea.sflag [#allocation5], %s134_s30  ;;  %158 = sbr.rel (%p2448_p8) target bundleno = 836 (0x344), region = 28 }
  0x1b   : > { %2112 = dma.hbm_to_vmem [thread:$0]  (!%p2110_p10), %s148_s21, 128, %s150_s16, %s135_s18  }
  0x1f   : > { %2322 = dma.done.wait (%p2425_p1), [#allocation7], 16  }
  0x20   : > { %2324 = vsyncadd (%p2425_p1), [#allocation7], 4294967280  ;;  %s2490_s22 = sand.u32 1, %s2339_s10  }
  0x21   : > { %s1989_s23 = sshll.u32 %s2490_s22, 3  ;;  %s166_s26 = scalar_lea.sflag [#allocation5], %s2490_s22 }
  0x22   : > { %s169_s27 = scalar_lea.vmem [#allocation8], %s1989_s23 }
  0x23   : > { %2326 = dma.done.wait (%p2435_p4), %s166_s26, 128  }
  0x24   : > { %2328 = vsyncadd (%p2435_p4), %s166_s26, 4294967168 }
  0x25   : > { %175 = sfence }
  0x26   : > { %v196_v0 = vlaneseq  ;;  %v203_v1 = vld [vmem:[%s169_s27] sm:$0xff]  ;;  %v2358_v3 = vmov 0.0   ;;  %vm210_vm1 = vcmask 1043456   ;;  %vm248_vm2 = vcmask 1040384   ;;  %s2360_s17 = smov 80   ;;  %s2361_s19 = smov 112  }
  0x27   : > { %205 = vst [vmem:[#allocation1] ss:$2 sm:$0xff] %v203_v1  ;;  %v2359_v35 = vmov -inf   ;;  %s2362_s24 = smov 48   ;;  %s2363_s28 = smov 64   ;;  %vm270_vm3 = vcmask 122880  }
  0x28   : > { %vm2498_vm0 = vcmp.lt.s32.totalorder %v196_v0, 256  ;;  %s2364_s30 = smov 96   ;;  %s2365_s4 = smov 32   ;;  %vm479_vm4 = vcmask 1042432   ;;  %vm498_vm5 = vcmask 23552   ;;  %vm502_vm6 = vcmask 154624  }
  0x29   : > { %200 = vst.msk [vmem:[#allocation2] ss:$2 sm:$0x3] %vm2498_vm0, %v2358_v3  ;;  %s2366_s5 = smov 16   ;;  %s2367_s6 = smov 3   ;;  %vm1753_vm7 = vcmask 1046528  }
  0x2a   : > { %202 = vst.msk [vmem:[#allocation2 + $0x1] ss:$2 sm:$0x3] %vm2498_vm0, %v2359_v35  ;;  %s1991_s7 = sld [smem:[#allocation4 + $0x1]]  ;;  %s2368_s26 = smov 127   ;;  %vm1766_vm8 = vcmask 1045504  }
  0x2b   : > { %s2047_s8 = sld [smem:[#allocation4 + $0x39]]  ;;  %vm1779_vm9 = vcmask 1044480   ;;  %vm1816_vm10 = vcmask 1041408  }
  0x2c   : > { %s2040_s15 = sld [smem:[#allocation4 + $0x32]] }
  0x2d   : > { %s1998_s16 = sld [smem:[#allocation4 + $0x8]] }
  0x2e   : > { %v206_v4 = vld.sshfl [vmem:[#allocation1] sm:$0xff pattern:$0x75316420]  ;;  %v207_v5 = vld.sshfl [vmem:[#allocation1 + $0x8] sm:$0xff pattern:$0x75316420] }
  0x2f   : > { %v211_v6 = vsel %vm210_vm1, %v206_v4, 0.0  ;;  %v218_v7 = vsel %vm210_vm1, %v207_v5, 0.0  ;;  %225 = vst [vmem:[#allocation1] ss:$2 sm:$0xff] %v203_v1  ;;  %s2054_s21 = sld [smem:[#allocation4 + $0x40]] }
  0x30   : > { %v212_v8 = vrot.slane %v211_v6, 4  ;;  %v219_v9 = vrot.slane %v218_v7, 4  ;;  %v244_v27 = vld [vmem:[#allocation2] ss:$2 sm:$0x3]  ;;  %s2005_s18 = sld [smem:[#allocation4 + $0xf]] }
  0x31   : > { %v258_v43 = vld [vmem:[#allocation2 + $0x1] ss:$2 sm:$0x3]  ;;  %s2061_s23 = sld [smem:[#allocation4 + $0x47]] }
  0x32   : > { %v213_v10 = vadd.f32 %v212_v8, %v211_v6  ;;  %v220_v11 = vadd.f32 %v219_v9, %v218_v7  ;;  %s2012_s27 = sld [smem:[#allocation4 + $0x16]] }
  0x34   : > { %v214_v12 = vrot.slane %v213_v10, 2  ;;  %v221_v13 = vrot.slane %v220_v11, 2 }
  0x36   : > { %v215_v14 = vadd.f32 %v214_v12, %v213_v10  ;;  %v222_v15 = vadd.f32 %v221_v13, %v220_v11  ;;  %v227_v16 = vld.sshfl [vmem:[#allocation1 + $0x8] sm:$0xff pattern:$0x75316420]  ;;  %v226_v20 = vld.sshfl [vmem:[#allocation1] sm:$0xff pattern:$0x75316420] }
  0x37   : > { %v237_v19 = vsel %vm210_vm1, %v227_v16, -inf  ;;  %v230_v24 = vsel %vm210_vm1, %v226_v20, -inf }
  0x38   : > { %v216_v17 = vrot.slane %v215_v14, 1  ;;  %v223_v18 = vrot.slane %v222_v15, 1  ;;  %v238_v21 = vrot.slane %v237_v19, 4  ;;  %v231_v25 = vrot.slane %v230_v24, 4 }
  0x3a   : > { %v217_v22 = vadd.f32 %v216_v17, %v215_v14  ;;  %v224_v23 = vadd.f32 %v223_v18, %v222_v15  ;;  %v239_v26 = vmax.f32 %v237_v19, %v238_v21  ;;  %v232_v29 = vmax.f32 %v230_v24, %v231_v25 }
  0x3c   : > { %v247_v28 = vrot.slane %v224_v23, 7  ;;  %v240_v30 = vrot.slane %v239_v26, 2  ;;  %v233_v33 = vrot.slane %v232_v29, 2 }
  0x3e   : > { %v249_v31 = vsel %vm248_vm2, %v217_v22, %v247_v28  ;;  %v241_v34 = vmax.f32 %v239_v26, %v240_v30  ;;  %v234_v36 = vmax.f32 %v232_v29, %v233_v33 }
  0x3f   : > { %v251_v32 = vadd.f32 %v249_v31, %v244_v27 }
  0x40   : > { %v242_v37 = vrot.slane %v241_v34, 1  ;;  %v235_v38 = vrot.slane %v234_v36, 1 }
  0x41   : > { %256 = vst.msk [vmem:[#allocation2] ss:$2 sm:$0x3] %vm2498_vm0, %v251_v32 }
  0x42   : > { %v243_v39 = vmax.f32 %v241_v34, %v242_v37  ;;  %v236_v40 = vmax.f32 %v234_v36, %v235_v38 }
  0x44   : > { %v261_v41 = vrot.slane %v243_v39, 7 }
  0x46   : > { %v262_v45 = vsel %vm248_vm2, %v236_v40, %v261_v41 }
  0x47   : > { %v264_v47 = vmax.f32 %v258_v43, %v262_v45 }
  0x48   : > { %v2188_v42 = vld [vmem:[#allocation2] ss:$0 sm:$0xff]  ;;  %v2192_v51 = vld [vmem:[#allocation2 + $0x2] ss:$0 sm:$0xff] }
  0x49   : > { %v2189_v44 = vld [vmem:[#allocation2] ss:$0 sm:$0xff]  ;;  %289 = vrot.lane.b32.xlu1 %v2188_v42, %s2360_s17  ;;  %265 = vst.msk [vmem:[#allocation2 + $0x1] ss:$2 sm:$0x3] %vm2498_vm0, %v264_v47  ;;  %vm1864_vm0 = vcmask 130048  }
  0x4a   : > { %275 = vrot.lane.b32.xlu0 %v2189_v44, %s2361_s19  ;;  %v2194_v46 = vld [vmem:[#allocation2] ss:$0 sm:$0xff]  ;;  %v2200_v53 = vld [vmem:[#allocation2 + $0x2] ss:$0 sm:$0xff] }
  0x4b   : > { %v2190_v48 = vld [vmem:[#allocation2] ss:$0 sm:$0xff]  ;;  %303 = vrot.lane.b32.xlu2 %v2194_v46, %s2362_s24  ;;  %v2195_v54 = vld [vmem:[#allocation2 + $0x2] ss:$0 sm:$0xff] }
  0x4c   : > { %v2191_v49 = vld [vmem:[#allocation2] ss:$0 sm:$0xff]  ;;  %v2196_v55 = vld [vmem:[#allocation2 + $0x2] ss:$0 sm:$0xff] }
  0x4d   : > { %v2197_v50 = vld [vmem:[#allocation2] ss:$0 sm:$0xff]  ;;  %v2203_v56 = vld [vmem:[#allocation2 + $0x2] ss:$0 sm:$0xff] }
  0x4e   : > { %v2193_v52 = vld [vmem:[#allocation2] ss:$0 sm:$0xff]  ;;  %v2198_v57 = vld [vmem:[#allocation2 + $0x2] ss:$0 sm:$0xff] }
  0x4f   : > { %v2199_v58 = vld [vmem:[#allocation2 + $0x2] ss:$0 sm:$0xff]  ;;  %v269_v10 = vld [vmem:[#allocation2] sm:$0x1] }
  0x50   : > { %v2206_v59 = vld [vmem:[#allocation2 + $0x1] ss:$0 sm:$0xff]  ;;  %v2209_v2 = vld [vmem:[#allocation2 + $0x3] ss:$0 sm:$0xff]  ;;  %271 = vst.msk [vmem:[#allocation3] sm:$0x1] %vm270_vm3, %v269_v10 }
  0x51   : > { %296 = vrot.lane.b32.xlu1 %v2190_v48, %s2363_s28  ;;  %v2201_v60 = vld [vmem:[#allocation2 + $0x1] ss:$0 sm:$0xff]  ;;  %v2207_v3 = vld [vmem:[#allocation2 + $0x3] ss:$0 sm:$0xff]  ;;  %v321_v15 = vld [vmem:[#allocation2 + $0x2] sm:$0x1] }
  0x52   : > { %282 = vrot.lane.b32.xlu0 %v2191_v49, %s2364_s30  ;;  %v2202_v61 = vld [vmem:[#allocation2 + $0x1] ss:$0 sm:$0xff]  ;;  %v2214_v4 = vld [vmem:[#allocation2 + $0x3] ss:$0 sm:$0xff]  ;;  %322 = vst.msk [vmem:[#allocation3 + $0x8] sm:$0x1] %vm270_vm3, %v321_v15 }
  0x53   : > { %310 = vrot.lane.b32.xlu2 %v2197_v50, %s2365_s4  ;;  %v2208_v62 = vld [vmem:[#allocation2 + $0x1] ss:$0 sm:$0xff]  ;;  %v2212_v5 = vld [vmem:[#allocation2 + $0x3] ss:$0 sm:$0xff] }
  0x54   : > { %v2204_v63 = vld [vmem:[#allocation2 + $0x1] ss:$0 sm:$0xff]  ;;  %v2210_v6 = vld [vmem:[#allocation2 + $0x3] ss:$0 sm:$0xff] }
  0x55   : > { %v2205_v0 = vld [vmem:[#allocation2 + $0x1] ss:$0 sm:$0xff]  ;;  %v2215_v7 = vld [vmem:[#allocation2 + $0x3] ss:$0 sm:$0xff] }
  0x56   : > { %v2211_v1 = vld [vmem:[#allocation2 + $0x1] ss:$0 sm:$0xff]  ;;  %v2213_v8 = vld [vmem:[#allocation2 + $0x3] ss:$0 sm:$0xff] }
  0x57   : > { %v372_v22 = vld [vmem:[#allocation2 + $0x1] sm:$0x1]  ;;  %v424_v36 = vld [vmem:[#allocation2 + $0x3] sm:$0x1] }
  0x58   : > { %374 = vst.msk [vmem:[#allocation3 + $0x10] sm:$0x1] %vm270_vm3, %v372_v22 }
  0x59   : > { %326 = vrot.lane.b32.xlu1 %v2192_v51, %s2361_s19  ;;  %425 = vst.msk [vmem:[#allocation3 + $0x18] sm:$0x1] %vm270_vm3, %v424_v36 }
  0x5a   : > { %317 = vrot.lane.b32.xlu0 %v2193_v52, %s2366_s5 }
  0x5b   : > { %333 = vrot.lane.b32.xlu2 %v2200_v53, %s2364_s30 }
  0x61   : > { %347 = vrot.lane.b32.xlu1 %v2195_v54, %s2363_s28 }
  0x62   : > { %340 = vrot.lane.b32.xlu0 %v2196_v55, %s2360_s17 }
  0x63   : > { %354 = vrot.lane.b32.xlu2 %v2203_v56, %s2362_s24 }
  0x69   : > { %368 = vrot.lane.b32.xlu1 %v2198_v57, %s2366_s5 }
  0x6a   : > { %361 = vrot.lane.b32.xlu0 %v2199_v58, %s2365_s4 }
  0x6b   : > { %378 = vrot.lane.b32.xlu2 %v2206_v59, %s2361_s19 }
  0x71   : > { %392 = vrot.lane.b32.xlu1 %v2201_v60, %s2360_s17 }
  0x72   : > { %385 = vrot.lane.b32.xlu0 %v2202_v61, %s2364_s30  ;;  %v706_v61 = vstv %s1991_s7  ;;  %s2048_s7 = sld [smem:[#allocation4 + $0x3a]] }
  0x73   : > { %399 = vrot.lane.b32.xlu2 %v2208_v62, %s2363_s28 }
  0x79   : > { %413 = vrot.lane.b32.xlu1 %v2204_v63, %s2365_s4 }
  0x7a   : > { %406 = vrot.lane.b32.xlu0 %v2205_v0, %s2362_s24  ;;  %v728_v0 = vstv %s2047_s8  ;;  %s1999_s8 = sld [smem:[#allocation4 + $0x9]] }
  0x7b   : > { %420 = vrot.lane.b32.xlu2 %v2211_v1, %s2366_s5  ;;  %v709_v1 = vstv %s2040_s15  ;;  %s2055_s15 = sld [smem:[#allocation4 + $0x41]] }
  0x81   : > { %436 = vrot.lane.b32.xlu1 %v2209_v2, %s2364_s30  ;;  %s2082_s30 = sld [smem:[#allocation4 + $0x5c]] }
  0x82   : > { %429 = vrot.lane.b32.xlu0 %v2207_v3, %s2361_s19  ;;  %s2019_s19 = sld [smem:[#allocation4 + $0x1d]] }
  0x83   : > { %443 = vrot.lane.b32.xlu2 %v2214_v4, %s2360_s17  ;;  %v724_v4 = vstv %s1998_s16  ;;  %s2068_s17 = sld [smem:[#allocation4 + $0x4e]]  ;;  %s2369_s16 = smov 126  }
  0x89   : > { %457 = vrot.lane.b32.xlu1 %v2212_v5, %s2362_s24  ;;  %s2075_s24 = sld [smem:[#allocation4 + $0x55]] }
  0x8a   : > { %450 = vrot.lane.b32.xlu0 %v2210_v6, %s2363_s28  ;;  %s2026_s28 = sld [smem:[#allocation4 + $0x24]] }
  0x8b   : > { %464 = vrot.lane.b32.xlu2 %v2215_v7, %s2365_s4  ;;  %s2033_s4 = sld [smem:[#allocation4 + $0x2b]] }
  0x92   : > { %471 = vrot.lane.b32.xlu0 %v2213_v8, %s2366_s5  ;;  %s2648_s5 = sld [smem:[#allocation4 + $0x33]] }
  0xa5   : > { %v304_v9 = vpop.permute.xlu2 %303 }
  0xa6   : > { %306 = vst.msk [vmem:[#allocation3 + $0x5] sm:$0x1] %vm270_vm3, %v304_v9 }
  0xad   : > { %v311_v11 = vpop.permute.xlu2 %310 }
  0xae   : > { %313 = vst.msk [vmem:[#allocation3 + $0x6] sm:$0x1] %vm270_vm3, %v311_v11 }
  0xb5   : > { %v334_v12 = vpop.permute.xlu2 %333 }
  0xb6   : > { %336 = vst.msk [vmem:[#allocation3 + $0xa] sm:$0x1] %vm270_vm3, %v334_v12 }
  0xbb   : > { %v290_v13 = vpop.permute.xlu1 %289 }
  0xbc   : > { %292 = vst.msk [vmem:[#allocation3 + $0x3] sm:$0x1] %vm270_vm3, %v290_v13  ;;  %v276_v14 = vpop.permute.xlu0 %275 }
  0xbd   : > { %278 = vst.msk [vmem:[#allocation3 + $0x1] sm:$0x1] %vm270_vm3, %v276_v14  ;;  %v355_v16 = vpop.permute.xlu2 %354 }
  0xbe   : > { %357 = vst.msk [vmem:[#allocation3 + $0xd] sm:$0x1] %vm270_vm3, %v355_v16  ;;  %v754_v16 = vstv %s2054_s21  ;;  %s2006_s21 = sld [smem:[#allocation4 + $0x10]] }
  0xc3   : > { %v297_v17 = vpop.permute.xlu1 %296 }
  0xc4   : > { %299 = vst.msk [vmem:[#allocation3 + $0x4] sm:$0x1] %vm270_vm3, %v297_v17  ;;  %v283_v18 = vpop.permute.xlu0 %282 }
  0xc5   : > { %285 = vst.msk [vmem:[#allocation3 + $0x2] sm:$0x1] %vm270_vm3, %v283_v18  ;;  %v379_v19 = vpop.permute.xlu2 %378 }
  0xc6   : > { %381 = vst.msk [vmem:[#allocation3 + $0x11] sm:$0x1] %vm270_vm3, %v379_v19  ;;  %v750_v19 = vstv %s2005_s18  ;;  %s2062_s18 = sld [smem:[#allocation4 + $0x48]] }
  0xcb   : > { %v327_v20 = vpop.permute.xlu1 %326 }
  0xcc   : > { %329 = vst.msk [vmem:[#allocation3 + $0x9] sm:$0x1] %vm270_vm3, %v327_v20  ;;  %v318_v21 = vpop.permute.xlu0 %317 }
  0xcd   : > { %320 = vst.msk [vmem:[#allocation3 + $0x7] sm:$0x1] %vm270_vm3, %v318_v21  ;;  %v400_v23 = vpop.permute.xlu2 %399 }
  0xce   : > { %402 = vst.msk [vmem:[#allocation3 + $0x14] sm:$0x1] %vm270_vm3, %v400_v23 }
  0xd3   : > { %v348_v24 = vpop.permute.xlu1 %347 }
  0xd4   : > { %350 = vst.msk [vmem:[#allocation3 + $0xc] sm:$0x1] %vm270_vm3, %v348_v24  ;;  %v341_v25 = vpop.permute.xlu0 %340  ;;  %v475_v26 = vld [vmem:[#allocation3] sm:$0xff]  ;;  %v780_v24 = vstv %s2061_s23  ;;  %s2013_s23 = sld [smem:[#allocation4 + $0x17]] }
  0xd5   : > { %343 = vst.msk [vmem:[#allocation3 + $0xb] sm:$0x1] %vm270_vm3, %v341_v25  ;;  %v480_v27 = vrot.slane %v475_v26, 5  ;;  %v421_v29 = vpop.permute.xlu2 %420 }
  0xd6   : > { %423 = vst.msk [vmem:[#allocation3 + $0x17] sm:$0x1] %vm270_vm3, %v421_v29 }
  0xd7   : > { %v485_v28 = vsel %vm479_vm4, 0.0, %v480_v27 }
  0xd8   : > { %489 = vrot.lane.b32.xlu1 %v485_v28, %s2367_s6  ;;  %v776_v28 = vstv %s2012_s27  ;;  %s2069_s27 = sld [smem:[#allocation4 + $0x4f]] }
  0xdb   : > { %v369_v30 = vpop.permute.xlu1 %368 }
  0xdc   : > { %371 = vst.msk [vmem:[#allocation3 + $0xf] sm:$0x1] %vm270_vm3, %v369_v30  ;;  %v362_v31 = vpop.permute.xlu0 %361 }
  0xdd   : > { %364 = vst.msk [vmem:[#allocation3 + $0xe] sm:$0x1] %vm270_vm3, %v362_v31  ;;  %v444_v32 = vpop.permute.xlu2 %443 }
  0xde   : > { %446 = vst.msk [vmem:[#allocation3 + $0x1b] sm:$0x1] %vm270_vm3, %v444_v32 }
  0xe3   : > { %v393_v33 = vpop.permute.xlu1 %392 }
  0xe4   : > { %395 = vst.msk [vmem:[#allocation3 + $0x13] sm:$0x1] %vm270_vm3, %v393_v33  ;;  %v386_v34 = vpop.permute.xlu0 %385  ;;  %v476_v35 = vld [vmem:[#allocation3 + $0x8] sm:$0xff] }
  0xe5   : > { %388 = vst.msk [vmem:[#allocation3 + $0x12] sm:$0x1] %vm270_vm3, %v386_v34  ;;  %v481_v37 = vrot.slane %v476_v35, 5  ;;  %v465_v40 = vpop.permute.xlu2 %464  ;;  %v806_v34 = vstv %s2068_s17  ;;  %s2020_s17 = sld [smem:[#allocation4 + $0x1e]] }
  0xe6   : > { %467 = vst.msk [vmem:[#allocation3 + $0x1e] sm:$0x1] %vm270_vm3, %v465_v40 }
  0xe7   : > { %v486_v38 = vsel %vm479_vm4, %v481_v37, 0.0  ;;  %v482_v39 = vsel %vm479_vm4, %v480_v27, %v481_v37 }
  0xe8   : > { %493 = vrot.lane.b32.xlu0 %v486_v38, %s2367_s6  ;;  %491 = vrot.lane.b32.xlu2 %v482_v39, %s2367_s6 }
  0xeb   : > { %v414_v41 = vpop.permute.xlu1 %413 }
  0xec   : > { %416 = vst.msk [vmem:[#allocation3 + $0x16] sm:$0x1] %vm270_vm3, %v414_v41  ;;  %v407_v42 = vpop.permute.xlu0 %406  ;;  %v802_v41 = vstv %s2019_s19  ;;  %s2076_s19 = sld [smem:[#allocation4 + $0x56]] }
  0xed   : > { %409 = vst.msk [vmem:[#allocation3 + $0x15] sm:$0x1] %vm270_vm3, %v407_v42 }
  0xf3   : > { %v437_v43 = vpop.permute.xlu1 %436 }
  0xf4   : > { %v430_v44 = vpop.permute.xlu0 %429  ;;  %v506_v45 = vld [vmem:[#allocation3 + $0x10] sm:$0xff]  ;;  %439 = vst.msk [vmem:[#allocation3 + $0x1a] sm:$0x1] %vm270_vm3, %v437_v43 }
  0xf5   : > { %432 = vst.msk [vmem:[#allocation3 + $0x19] sm:$0x1] %vm270_vm3, %v430_v44  ;;  %v510_v46 = vrot.slane %v506_v45, 5 }
  0xf7   : > { %v515_v47 = vsel %vm479_vm4, 0.0, %v510_v46 }
  0xf8   : > { %519 = vrot.lane.b32.xlu1 %v515_v47, %s2367_s6 }
  0xfb   : > { %v458_v48 = vpop.permute.xlu1 %457 }
  0xfc   : > { %v451_v49 = vpop.permute.xlu0 %450  ;;  %460 = vst.msk [vmem:[#allocation3 + $0x1d] sm:$0x1] %vm270_vm3, %v458_v48 }
  0xfd   : > { %453 = vst.msk [vmem:[#allocation3 + $0x1c] sm:$0x1] %vm270_vm3, %v451_v49  ;;  %v832_v49 = vstv %s2075_s24  ;;  %s2083_s24 = sld [smem:[#allocation4 + $0x5d]] }
 0x104   : > { %v472_v50 = vpop.permute.xlu0 %471 }
 0x105   : > { %474 = vst.msk [vmem:[#allocation3 + $0x1f] sm:$0x1] %vm270_vm3, %v472_v50 }
 0x10c   : > { %v507_v51 = vld [vmem:[#allocation3 + $0x18] sm:$0xff] }
 0x10d   : > { %v511_v52 = vrot.slane %v507_v51, 5 }
 0x10f   : > { %v516_v53 = vsel %vm479_vm4, %v511_v52, 0.0  ;;  %v512_v54 = vsel %vm479_vm4, %v510_v46, %v511_v52  ;;  %v828_v52 = vstv %s2026_s28  ;;  %s2034_s28 = sld [smem:[#allocation4 + $0x2c]] }
 0x110   : > { %523 = vrot.lane.b32.xlu0 %v516_v53, %s2367_s6  ;;  %521 = vrot.lane.b32.xlu2 %v512_v54, %s2367_s6  ;;  %s2656_s6 = sld [smem:[#allocation4 + $0x2]] }
 0x142   : > { %v492_v55 = vpop.permute.xlu2 %491 }
 0x143   : > { %v500_v57 = vsel %vm498_vm5, 0.0, %v492_v55 }
 0x144   : > { %v2591_v59 = vsel %vm502_vm6, %v500_v57, 0.0 }
 0x145   : > { %v708_v8 = vmul.f32 %v706_v61, %v2591_v59  ;;  %v726_v21 = vmul.f32 %v724_v4, %v2591_v59  ;;  %v752_v30 = vmul.f32 %v750_v19, %v2591_v59  ;;  %v778_v43 = vmul.f32 %v776_v28, %v2591_v59 }
 0x146   : > { %v804_v55 = vmul.f32 %v802_v41, %v2591_v59 }
 0x14a   : > { %v490_v56 = vpop.permute.xlu1 %489 }
 0x14b   : > { %v499_v58 = vsel %vm498_vm5, 0.0, %v490_v56 }
 0x14c   : > { %v2594_v60 = vsel %vm502_vm6, %v499_v58, 0.0 }
 0x14d   : > { %v725_v7 = vmul.f32 %v724_v4, %v2594_v60  ;;  %v707_v10 = vmul.f32 %v706_v61, %v2594_v60  ;;  %v751_v20 = vmul.f32 %v750_v19, %v2594_v60  ;;  %v777_v29 = vmul.f32 %v776_v28, %v2594_v60 }
 0x14e   : > { %v803_v42 = vmul.f32 %v802_v41, %v2594_v60  ;;  %v829_v54 = vmul.f32 %v828_v52, %v2594_v60 }
 0x15a   : > { %v494_v25 = vpop.permute.xlu0 %493 }
 0x15b   : > { %v501_v31 = vsel %vm498_vm5, 0.0, %v494_v25 }
 0x15c   : > { %v2627_v35 = vsel %vm502_vm6, %v501_v31, 0.0 }
 0x15d   : > { %v727_v44 = vmul.f32 %v724_v4, %v2627_v35  ;;  %v753_v56 = vmul.f32 %v750_v19, %v2627_v35  ;;  %v830_v4 = vmul.f32 %v828_v52, %v2591_v59 }
 0x16a   : > { %v520_v62 = vpop.permute.xlu1 %519  ;;  %v522_v63 = vpop.permute.xlu2 %521 }
 0x16b   : > { %v528_v2 = vsel %vm498_vm5, 0.0, %v520_v62  ;;  %v529_v3 = vsel %vm498_vm5, 0.0, %v522_v63  ;;  %v858_v62 = vstv %s2082_s30  ;;  %s2717_s30 = sld [smem:[#allocation4 + $0x34]] }
 0x16c   : > { %v2599_v5 = vsel %vm502_vm6, %v528_v2, 0.0  ;;  %v2602_v6 = vsel %vm502_vm6, %v529_v3, 0.0 }
 0x16d   : > { %v729_v9 = vmul.f32 %v728_v0, %v2599_v5  ;;  %v710_v11 = vmul.f32 %v709_v1, %v2599_v5  ;;  %v711_v12 = vmul.f32 %v709_v1, %v2602_v6  ;;  %v755_v17 = vmul.f32 %v754_v16, %v2599_v5 }
 0x16e   : > { %v730_v18 = vmul.f32 %v728_v0, %v2602_v6  ;;  %v781_v26 = vmul.f32 %v780_v24, %v2599_v5  ;;  %v756_v27 = vmul.f32 %v754_v16, %v2602_v6  ;;  %v807_v38 = vmul.f32 %v806_v34, %v2599_v5 }
 0x16f   : > { %v732_v13 = vadd.f32 %v729_v9, %v725_v7  ;;  %v712_v14 = vadd.f32 %v710_v11, %v707_v10  ;;  %v713_v15 = vadd.f32 %v711_v12, %v708_v8  ;;  %v758_v22 = vadd.f32 %v755_v17, %v751_v20 }
 0x170   : > { %v733_v23 = vadd.f32 %v730_v18, %v726_v21  ;;  %v784_v32 = vadd.f32 %v781_v26, %v777_v29  ;;  %v759_v33 = vadd.f32 %v756_v27, %v752_v30  ;;  %v782_v39 = vmul.f32 %v780_v24, %v2602_v6 }
 0x171   : > { %738 = vrot.lane.b32.xlu0 %v732_v13, %s2368_s26  ;;  %716 = vrot.lane.b32.xlu1 %v712_v14, %s2368_s26  ;;  %v810_v46 = vadd.f32 %v807_v38, %v803_v42  ;;  %v833_v50 = vmul.f32 %v832_v49, %v2599_v5  ;;  %v808_v51 = vmul.f32 %v806_v34, %v2602_v6  ;;  %v854_v1 = vstv %s2033_s4  ;;  %s2722_s4 = sld [smem:[#allocation4 + $0x3]] }
 0x172   : > { %718 = vrot.lane.b32.xlu2 %v713_v15, %s2368_s26  ;;  %v785_v47 = vadd.f32 %v782_v39, %v778_v43  ;;  %v859_v63 = vmul.f32 %v858_v62, %v2599_v5  ;;  %v855_v3 = vmul.f32 %v854_v1, %v2594_v60  ;;  %v779_v7 = vmul.f32 %v776_v28, %v2627_v35 }
 0x173   : > { %v836_v57 = vadd.f32 %v833_v50, %v829_v54  ;;  %v811_v58 = vadd.f32 %v808_v51, %v804_v55  ;;  %v883_v11 = vstv %s2648_s5  ;;  %v860_v13 = vmul.f32 %v858_v62, %v2602_v6  ;;  %s2049_s5 = sld [smem:[#allocation4 + $0x3b]] }
 0x174   : > { %v862_v8 = vadd.f32 %v859_v63, %v855_v3  ;;  %v884_v12 = vmul.f32 %v883_v11, %v2599_v5  ;;  %v880_v14 = vstv %s2656_s6  ;;  %v856_v17 = vmul.f32 %v854_v1, %v2591_v59  ;;  %s2000_s6 = sld [smem:[#allocation4 + $0xa]] }
 0x175   : > { %v805_v18 = vmul.f32 %v802_v41, %v2627_v35  ;;  %v885_v25 = vmul.f32 %v883_v11, %v2602_v6  ;;  %v882_v28 = vmul.f32 %v880_v14, %v2591_v59  ;;  %v831_v29 = vmul.f32 %v828_v52, %v2627_v35 }
 0x176   : > { %v863_v20 = vadd.f32 %v860_v13, %v856_v17  ;;  %v857_v42 = vmul.f32 %v854_v1, %v2627_v35 }
 0x177   : > { %v887_v31 = vadd.f32 %v885_v25, %v882_v28 }
 0x179   : > { %764 = vrot.lane.b32.xlu0 %v758_v22, %s2368_s26  ;;  %740 = vrot.lane.b32.xlu1 %v733_v23, %s2368_s26  ;;  %v902_v22 = vstv %s2048_s7  ;;  %v898_v23 = vstv %s1999_s8  ;;  %s2056_s7 = sld [smem:[#allocation4 + $0x42]]  ;;  %s2370_s8 = smov 125  }
 0x17a   : > { %v900_v27 = vmul.f32 %v898_v23, %v2591_v59  ;;  %v901_v41 = vmul.f32 %v898_v23, %v2627_v35  ;;  %v903_v50 = vmul.f32 %v902_v22, %v2599_v5 }
 0x181   : > { %790 = vrot.lane.b32.xlu0 %v784_v32, %s2368_s26  ;;  %766 = vrot.lane.b32.xlu1 %v759_v33, %s2368_s26  ;;  %v928_v33 = vstv %s2055_s15  ;;  %s2007_s15 = sld [smem:[#allocation4 + $0x11]] }
 0x182   : > { %v524_v36 = vpop.permute.xlu0 %523  ;;  %v929_v63 = vmul.f32 %v928_v33, %v2599_v5 }
 0x183   : > { %v530_v37 = vsel %vm498_vm5, 0.0, %v524_v36  ;;  %v930_v36 = vmul.f32 %v928_v33, %v2602_v6 }
 0x184   : > { %v2633_v40 = vsel %vm502_vm6, %v530_v37, 0.0 }
 0x185   : > { %v731_v45 = vmul.f32 %v728_v0, %v2633_v40  ;;  %v757_v53 = vmul.f32 %v754_v16, %v2633_v40  ;;  %v834_v0 = vmul.f32 %v832_v49, %v2602_v6  ;;  %v783_v2 = vmul.f32 %v780_v24, %v2633_v40 }
 0x186   : > { %v809_v15 = vmul.f32 %v806_v34, %v2633_v40  ;;  %v881_v16 = vmul.f32 %v880_v14, %v2594_v60  ;;  %v904_v24 = vmul.f32 %v902_v22, %v2602_v6  ;;  %v835_v26 = vmul.f32 %v832_v49, %v2633_v40 }
 0x187   : > { %v734_v48 = vadd.f32 %v731_v45, %v727_v44  ;;  %v760_v61 = vadd.f32 %v757_v53, %v753_v56  ;;  %v837_v9 = vadd.f32 %v834_v0, %v830_v4  ;;  %v786_v10 = vadd.f32 %v783_v2, %v779_v7 }
 0x188   : > { %v886_v19 = vadd.f32 %v884_v12, %v881_v16  ;;  %v812_v21 = vadd.f32 %v809_v15, %v805_v18  ;;  %v907_v30 = vadd.f32 %v904_v24, %v900_v27  ;;  %v838_v32 = vadd.f32 %v835_v26, %v831_v29 }
 0x189   : > { %816 = vrot.lane.b32.xlu0 %v810_v46, %s2368_s26  ;;  %792 = vrot.lane.b32.xlu1 %v785_v47, %s2368_s26  ;;  %v924_v34 = vstv %s2006_s21  ;;  %v905_v37 = vmul.f32 %v902_v22, %v2633_v40  ;;  %v861_v38 = vmul.f32 %v858_v62, %v2633_v40  ;;  %v954_v46 = vstv %s2062_s18  ;;  %s2063_s21 = sld [smem:[#allocation4 + $0x49]] }
 0x18a   : > { %742 = vrot.lane.b32.xlu2 %v734_v48, %s2368_s26  ;;  %v926_v39 = vmul.f32 %v924_v34, %v2591_v59  ;;  %v950_v47 = vstv %s2013_s23  ;;  %v956_v48 = vmul.f32 %v954_v46, %v2602_v6  ;;  %v931_v49 = vmul.f32 %v928_v33, %v2633_v40  ;;  %s2014_s18 = sld [smem:[#allocation4 + $0x18]] }
 0x18b   : > { %v908_v44 = vadd.f32 %v905_v37, %v901_v41  ;;  %v864_v45 = vadd.f32 %v861_v38, %v857_v42  ;;  %v952_v51 = vmul.f32 %v950_v47, %v2591_v59  ;;  %v927_v52 = vmul.f32 %v924_v34, %v2627_v35  ;;  %s2021_s23 = sld [smem:[#allocation4 + $0x1f]] }
 0x18c   : > { %v933_v43 = vadd.f32 %v930_v36, %v926_v39  ;;  %v899_v53 = vmul.f32 %v898_v23, %v2594_v60  ;;  %v957_v62 = vmul.f32 %v954_v46, %v2633_v40  ;;  %v953_v1 = vmul.f32 %v950_v47, %v2627_v35 }
 0x18d   : > { %v959_v54 = vadd.f32 %v956_v48, %v952_v51  ;;  %v934_v55 = vadd.f32 %v931_v49, %v927_v52  ;;  %v925_v2 = vmul.f32 %v924_v34, %v2594_v60  ;;  %v955_v12 = vmul.f32 %v954_v46, %v2599_v5 }
 0x18e   : > { %v906_v56 = vadd.f32 %v903_v50, %v899_v53  ;;  %v960_v4 = vadd.f32 %v957_v62, %v953_v1  ;;  %v951_v15 = vmul.f32 %v950_v47, %v2594_v60  ;;  %v1072_v47 = vstv %s2000_s6  ;;  %s2834_s6 = sld [smem:[#allocation4 + $0x4]] }
 0x18f   : > { %v932_v7 = vadd.f32 %v929_v63, %v925_v2  ;;  %v1075_v49 = vmul.f32 %v1072_v47, %v2627_v35  ;;  %v1073_v50 = vmul.f32 %v1072_v47, %v2594_v60  ;;  %v1098_v63 = vstv %s2007_s15  ;;  %s1997_s15 = sld [smem:[#allocation4 + $0x7]] }
 0x190   : > { %v958_v18 = vadd.f32 %v955_v12, %v951_v15  ;;  %v1101_v1 = vmul.f32 %v1098_v63, %v2627_v35  ;;  %v1099_v2 = vmul.f32 %v1098_v63, %v2594_v60  ;;  %v1124_v15 = vstv %s2014_s18  ;;  %s2851_s18 = sld [smem:[#allocation4 + $0x3f]] }
 0x191   : > { %842 = vrot.lane.b32.xlu0 %v836_v57, %s2368_s26  ;;  %818 = vrot.lane.b32.xlu1 %v811_v58, %s2368_s26  ;;  %v980_v57 = vstv %s2069_s27  ;;  %v976_v58 = vstv %s2020_s17  ;;  %s2077_s27 = sld [smem:[#allocation4 + $0x57]] }
 0x192   : > { %768 = vrot.lane.b32.xlu2 %v760_v61, %s2368_s26  ;;  %v982_v61 = vmul.f32 %v980_v57, %v2602_v6  ;;  %v978_v0 = vmul.f32 %v976_v58, %v2591_v59  ;;  %v983_v11 = vmul.f32 %v980_v57, %v2633_v40  ;;  %v979_v14 = vmul.f32 %v976_v58, %v2627_v35  ;;  %s2028_s17 = sld [smem:[#allocation4 + $0x26]] }
 0x193   : > { %v981_v23 = vmul.f32 %v980_v57, %v2599_v5  ;;  %v977_v26 = vmul.f32 %v976_v58, %v2594_v60 }
 0x194   : > { %v985_v3 = vadd.f32 %v982_v61, %v978_v0  ;;  %v986_v17 = vadd.f32 %v983_v11, %v979_v14 }
 0x195   : > { %v984_v29 = vadd.f32 %v981_v23, %v977_v26 }
 0x199   : > { %868 = vrot.lane.b32.xlu0 %v862_v8, %s2368_s26  ;;  %844 = vrot.lane.b32.xlu1 %v837_v9, %s2368_s26  ;;  %v1006_v8 = vstv %s2076_s19  ;;  %s2084_s19 = sld [smem:[#allocation4 + $0x5e]] }
 0x19a   : > { %794 = vrot.lane.b32.xlu2 %v786_v10, %s2368_s26  ;;  %v1008_v10 = vmul.f32 %v1006_v8, %v2602_v6  ;;  %v1009_v22 = vmul.f32 %v1006_v8, %v2633_v40  ;;  %v1007_v34 = vmul.f32 %v1006_v8, %v2599_v5 }
 0x1a1   : > { %890 = vrot.lane.b32.xlu0 %v886_v19, %s2369_s16  ;;  %870 = vrot.lane.b32.xlu1 %v863_v20, %s2368_s26  ;;  %v1032_v19 = vstv %s2083_s24  ;;  %v1028_v20 = vstv %s2034_s28  ;;  %s2050_s24 = sld [smem:[#allocation4 + $0x3c]] }
 0x1a2   : > { %820 = vrot.lane.b32.xlu2 %v812_v21, %s2368_s26  ;;  %v1034_v21 = vmul.f32 %v1032_v19, %v2602_v6  ;;  %v1030_v24 = vmul.f32 %v1028_v20, %v2591_v59  ;;  %v1035_v33 = vmul.f32 %v1032_v19, %v2633_v40  ;;  %v1031_v37 = vmul.f32 %v1028_v20, %v2627_v35  ;;  %s2814_s28 = sld [smem:[#allocation4 + $0x35]] }
 0x1a3   : > { %v1033_v48 = vmul.f32 %v1032_v19, %v2599_v5  ;;  %v1029_v51 = vmul.f32 %v1028_v20, %v2594_v60  ;;  %v1074_v19 = vmul.f32 %v1072_v47, %v2591_v59 }
 0x1a4   : > { %v1037_v27 = vadd.f32 %v1034_v21, %v1030_v24  ;;  %v1038_v41 = vadd.f32 %v1035_v33, %v1031_v37  ;;  %v1100_v33 = vmul.f32 %v1098_v63, %v2591_v59 }
 0x1a9   : > { %914 = vrot.lane.b32.xlu0 %v907_v30, %s2369_s16  ;;  %892 = vrot.lane.b32.xlu1 %v887_v31, %s2369_s16  ;;  %v1057_v30 = vstv %s2717_s30  ;;  %v1054_v31 = vstv %s2722_s4  ;;  %s2816_s30 = sld [smem:[#allocation4 + $0x31]] }
 0x1aa   : > { %846 = vrot.lane.b32.xlu2 %v838_v32, %s2368_s26  ;;  %v1059_v32 = vmul.f32 %v1057_v30, %v2602_v6  ;;  %v1056_v36 = vmul.f32 %v1054_v31, %v2591_v59  ;;  %v1058_v0 = vmul.f32 %v1057_v30, %v2599_v5  ;;  %s2046_s4 = sld [smem:[#allocation4 + $0x38]] }
 0x1ac   : > { %v1061_v39 = vadd.f32 %v1059_v32, %v1056_v36 }
 0x1b1   : > { %940 = vrot.lane.b32.xlu0 %v933_v43, %s2369_s16  ;;  %916 = vrot.lane.b32.xlu1 %v908_v44, %s2369_s16  ;;  %v1076_v43 = vstv %s2049_s5  ;;  %s2001_s5 = sld [smem:[#allocation4 + $0xb]] }
 0x1b2   : > { %872 = vrot.lane.b32.xlu2 %v864_v45, %s2368_s26  ;;  %s2027_s26 = sld [smem:[#allocation4 + $0x25]]  ;;  %v1079_v44 = vmul.f32 %v1076_v43, %v2633_v40  ;;  %v1077_v45 = vmul.f32 %v1076_v43, %v2599_v5 }
 0x1b4   : > { %v1082_v52 = vadd.f32 %v1079_v44, %v1075_v49  ;;  %v1080_v53 = vadd.f32 %v1077_v45, %v1073_v50  ;;  %v1176_v45 = vstv %s2028_s17  ;;  %v1126_v50 = vmul.f32 %v1124_v15, %v2591_v59  ;;  %s2892_s17 = sld [smem:[#allocation4 + $0x46]] }
 0x1b5   : > { %v1177_v49 = vmul.f32 %v1176_v45, %v2594_v60 }
 0x1b8   : > { %v1002_v9 = vstv %s2027_s26  ;;  %s2035_s26 = sld [smem:[#allocation4 + $0x2d]] }
 0x1b9   : > { %966 = vrot.lane.b32.xlu0 %v959_v54, %s2369_s16  ;;  %942 = vrot.lane.b32.xlu1 %v934_v55, %s2369_s16  ;;  %v1004_v13 = vmul.f32 %v1002_v9, %v2591_v59  ;;  %v1005_v25 = vmul.f32 %v1002_v9, %v2627_v35  ;;  %v1003_v38 = vmul.f32 %v1002_v9, %v2594_v60  ;;  %v1102_v55 = vstv %s2056_s7  ;;  %s2836_s7 = sld [smem:[#allocation4]] }
 0x1ba   : > { %912 = vrot.lane.b32.xlu2 %v906_v56, %s2369_s16  ;;  %v1036_v54 = vadd.f32 %v1033_v48, %v1029_v51  ;;  %v1105_v58 = vmul.f32 %v1102_v55, %v2633_v40  ;;  %v1103_v61 = vmul.f32 %v1102_v55, %v2599_v5  ;;  %v1128_v9 = vstv %s2063_s21  ;;  %s2057_s21 = sld [smem:[#allocation4 + $0x43]] }
 0x1bb   : > { %v1011_v16 = vadd.f32 %v1008_v10, %v1004_v13  ;;  %v1012_v28 = vadd.f32 %v1009_v22, %v1005_v25  ;;  %v1010_v42 = vadd.f32 %v1007_v34, %v1003_v38  ;;  %v1131_v12 = vmul.f32 %v1128_v9, %v2633_v40 }
 0x1bc   : > { %v1129_v13 = vmul.f32 %v1128_v9, %v2599_v5  ;;  %v1104_v30 = vmul.f32 %v1102_v55, %v2602_v6  ;;  %v1180_v38 = vstv %s2077_s27  ;;  %v1130_v47 = vmul.f32 %v1128_v9, %v2602_v6  ;;  %s2890_s27 = sld [smem:[#allocation4 + $0x4a]] }
 0x1bd   : > { %v1179_v48 = vmul.f32 %v1176_v45, %v2627_v35 }
 0x1be   : > { %v1107_v37 = vadd.f32 %v1104_v30, %v1100_v33 }
 0x1bf   : > { %v632_v30 = vstv %s2836_s7  ;;  %s3012_s7 = sld [smem:[#allocation4 + $0x54]] }
 0x1c1   : > { %992 = vrot.lane.b32.xlu0 %v985_v3, %s2369_s16  ;;  %968 = vrot.lane.b32.xlu1 %v960_v4, %s2369_s16  ;;  %v1055_v3 = vmul.f32 %v1054_v31, %v2594_v60  ;;  %v1108_v4 = vadd.f32 %v1105_v58, %v1101_v1  ;;  %v2831_v1 = vstv %s2035_s26  ;;  %s2901_s26 = sld [smem:[#allocation4 + $0x19]] }
 0x1c2   : > { %938 = vrot.lane.b32.xlu2 %v932_v7, %s2369_s16  ;;  %v1106_v7 = vadd.f32 %v1103_v61, %v1099_v2 }
 0x1c3   : > { %v1060_v8 = vadd.f32 %v1058_v0, %v1055_v3  ;;  %v1205_v3 = vmul.f32 %v2831_v1, %v2627_v35 }
 0x1c9   : > { %1018 = vrot.lane.b32.xlu0 %v1011_v16, %s2369_s16  ;;  %994 = vrot.lane.b32.xlu1 %v986_v17, %s2369_s16  ;;  %v1078_v16 = vmul.f32 %v1076_v43, %v2602_v6  ;;  %v1127_v17 = vmul.f32 %v1124_v15, %v2627_v35  ;;  %v1181_v43 = vmul.f32 %v1180_v38, %v2599_v5 }
 0x1ca   : > { %964 = vrot.lane.b32.xlu2 %v958_v18, %s2369_s16  ;;  %v1125_v18 = vmul.f32 %v1124_v15, %v2594_v60  ;;  %v1231_v15 = vstv %s2814_s28  ;;  %s3001_s28 = sld [smem:[#allocation4 + $0x58]] }
 0x1cb   : > { %v1134_v20 = vadd.f32 %v1131_v12, %v1127_v17  ;;  %v1081_v22 = vadd.f32 %v1078_v16, %v1074_v19  ;;  %v635_v16 = vstv %s2816_s30  ;;  %v2849_v17 = vstv %s2046_s4  ;;  %s2943_s30 = sld [smem:[#allocation4 + $0x51]] }
 0x1cc   : > { %v2746_v46 = vpop.permute.xlu2 %718  ;;  %v1132_v21 = vadd.f32 %v1129_v13, %v1125_v18  ;;  %v2843_v13 = vstv %s2050_s24  ;;  %s2934_s24 = sld [smem:[#allocation4 + $0x15]] }
 0x1cd   : > { %s2945_s4 = sld [smem:[#allocation4 + $0x4d]] }
 0x1d1   : > { %1044 = vrot.lane.b32.xlu0 %v1037_v27, %s2369_s16  ;;  %1020 = vrot.lane.b32.xlu1 %v1012_v28, %s2369_s16 }
 0x1d2   : > { %990 = vrot.lane.b32.xlu2 %v984_v29, %s2369_s16  ;;  %v1150_v29 = vstv %s2021_s23  ;;  %s2883_s23 = sld [smem:[#allocation4 + $0xe]] }
 0x1d3   : > { %v1153_v31 = vmul.f32 %v1150_v29, %v2627_v35  ;;  %v1151_v32 = vmul.f32 %v1150_v29, %v2594_v60 }
 0x1d9   : > { %1066 = vrot.lane.b32.xlu0 %v1061_v39, %s2370_s8  ;;  %1046 = vrot.lane.b32.xlu1 %v1038_v41, %s2369_s16 }
 0x1da   : > { %1016 = vrot.lane.b32.xlu2 %v1010_v42, %s2369_s16  ;;  %v1183_v42 = vmul.f32 %v1180_v38, %v2633_v40 }
 0x1dc   : > { %v1186_v51 = vadd.f32 %v1183_v42, %v1179_v48 }
 0x1e1   : > { %1090 = vrot.lane.b32.xlu0 %v1082_v52, %s2370_s8  ;;  %1086 = vrot.lane.b32.xlu1 %v1080_v53, %s2370_s8  ;;  %v1184_v52 = vadd.f32 %v1181_v43, %v1177_v49  ;;  %v1133_v53 = vadd.f32 %v1130_v47, %v1126_v50  ;;  %v2888_v49 = vstv %s2057_s21  ;;  %s3057_s21 = sld [smem:[#allocation4 + $0x5f]] }
 0x1e2   : > { %1042 = vrot.lane.b32.xlu2 %v1036_v54, %s2369_s16  ;;  %s2070_s16 = sld [smem:[#allocation4 + $0x50]]  ;;  %v2812_v54 = vstv %s2084_s19  ;;  %s2371_s19 = smov 124  }
 0x1e3   : > { %v2755_v56 = vpop.permute.xlu0 %738  ;;  %v2757_v57 = vpop.permute.xlu1 %716  ;;  %v1209_v61 = vmul.f32 %v2812_v54, %v2633_v40  ;;  %v1207_v63 = vmul.f32 %v2812_v54, %v2599_v5 }
 0x1e4   : > { %v2761_v62 = vpop.permute.xlu2 %742 }
 0x1e8   : > { %v1154_v23 = vstv %s2070_s16  ;;  %s2863_s16 = sld [smem:[#allocation4 + $0x12]] }
 0x1e9   : > { %1116 = vrot.lane.b32.xlu0 %v1108_v4, %s2370_s8  ;;  %1112 = vrot.lane.b32.xlu1 %v1106_v7, %s2370_s8  ;;  %v1157_v26 = vmul.f32 %v1154_v23, %v2633_v40  ;;  %v1155_v27 = vmul.f32 %v1154_v23, %v2599_v5  ;;  %v1156_v2 = vmul.f32 %v1154_v23, %v2602_v6 }
 0x1ea   : > { %1064 = vrot.lane.b32.xlu2 %v1060_v8, %s2370_s8  ;;  %v1203_v4 = vmul.f32 %v2831_v1, %v2594_v60  ;;  %v1152_v7 = vmul.f32 %v1150_v29, %v2591_v59  ;;  %v1212_v8 = vadd.f32 %v1209_v61, %v1205_v3  ;;  %v1182_v29 = vmul.f32 %v1180_v38, %v2602_v6 }
 0x1eb   : > { %v2770_v10 = vpop.permute.xlu0 %764  ;;  %v2772_v11 = vpop.permute.xlu1 %740  ;;  %v1160_v34 = vadd.f32 %v1157_v26, %v1153_v31  ;;  %v1158_v36 = vadd.f32 %v1155_v27, %v1151_v32  ;;  %v2868_v26 = vstv %s2001_s5  ;;  %v1228_v27 = vstv %s2834_s6  ;;  %s2958_s5 = sld [smem:[#allocation4 + $0x20]] }
 0x1ec   : > { %v2776_v14 = vpop.permute.xlu2 %768  ;;  %v1210_v9 = vadd.f32 %v1207_v63, %v1203_v4  ;;  %v1159_v12 = vadd.f32 %v1156_v2, %v1152_v7  ;;  %v645_v31 = vmul.f32 %v2849_v17, %v2599_v5  ;;  %v1247_v32 = vmul.f32 %v2868_v26, %v2594_v60  ;;  %s3005_s6 = sld [smem:[#allocation4 + $0x27]] }
 0x1ed   : > { %v1229_v33 = vmul.f32 %v1228_v27, %v2594_v60  ;;  %v1277_v2 = vmul.f32 %v2888_v49, %v2599_v5  ;;  %v637_v3 = vmul.f32 %v635_v16, %v2602_v6  ;;  %v646_v4 = vmul.f32 %v2849_v17, %v2602_v6 }
 0x1ee   : > { %v2907_v63 = vstv %s2863_s16  ;;  %s3068_s16 = sld [smem:[#allocation4 + $0x5b]] }
 0x1f1   : > { %1142 = vrot.lane.b32.xlu0 %v1134_v20, %s2370_s8  ;;  %1138 = vrot.lane.b32.xlu1 %v1132_v21, %s2370_s8  ;;  %v1251_v20 = vmul.f32 %v2843_v13, %v2599_v5  ;;  %v1232_v21 = vmul.f32 %v1231_v15, %v2599_v5 }
 0x1f2   : > { %1088 = vrot.lane.b32.xlu2 %v1081_v22, %s2370_s8  ;;  %v636_v22 = vmul.f32 %v635_v16, %v2599_v5  ;;  %v1248_v16 = vmul.f32 %v2868_v26, %v2591_v59 }
 0x1f3   : > { %v2785_v24 = vpop.permute.xlu0 %790  ;;  %v2787_v25 = vpop.permute.xlu1 %766  ;;  %v1254_v42 = vadd.f32 %v1251_v20, %v1247_v32  ;;  %v1234_v43 = vadd.f32 %v1232_v21, %v1229_v33  ;;  %v1273_v20 = vmul.f32 %v2907_v63, %v2594_v60  ;;  %v634_v21 = vmul.f32 %v632_v30, %v2591_v59 }
 0x1f4   : > { %v2791_v28 = vpop.permute.xlu2 %794 }
 0x1f5   : > { %v1280_v32 = vadd.f32 %v1277_v2, %v1273_v20  ;;  %v647_v2 = vmul.f32 %v2849_v17, %v2633_v40  ;;  %v1274_v17 = vmul.f32 %v2907_v63, %v2591_v59 }
 0x1f9   : > { %1168 = vrot.lane.b32.xlu0 %v1160_v34, %s2370_s8  ;;  %1164 = vrot.lane.b32.xlu1 %v1158_v36, %s2370_s8  ;;  %v2880_v34 = vstv %s1997_s15  ;;  %v633_v36 = vmul.f32 %v632_v30, %v2594_v60  ;;  %s3048_s15 = sld [smem:[#allocation4 + $0x23]] }
 0x1fa   : > { %1114 = vrot.lane.b32.xlu2 %v1107_v37, %s2370_s8  ;;  %v1178_v37 = vmul.f32 %v1176_v45, %v2591_v59  ;;  %v641_v38 = vmul.f32 %v2880_v34, %v2594_v60  ;;  %v643_v20 = vmul.f32 %v2880_v34, %v2627_v35 }
 0x1fb   : > { %v2800_v39 = vpop.permute.xlu0 %816  ;;  %v2802_v41 = vpop.permute.xlu1 %792  ;;  %v638_v47 = vadd.f32 %v636_v22, %v633_v36  ;;  %v2930_v22 = vstv %s2883_s23  ;;  %v639_v36 = vadd.f32 %v637_v3, %v634_v21  ;;  %v1230_v21 = vmul.f32 %v1228_v27, %v2591_v59  ;;  %s3104_s23 = sld [smem:[#allocation4 + $0x2a]] }
 0x1fc   : > { %v2806_v44 = vpop.permute.xlu2 %820  ;;  %v1185_v48 = vadd.f32 %v1182_v29, %v1178_v37  ;;  %v648_v50 = vadd.f32 %v645_v31, %v641_v38  ;;  %v642_v29 = vmul.f32 %v2880_v34, %v2591_v59  ;;  %v652_v31 = vmul.f32 %v2930_v22, %v2594_v60 }
 0x1fd   : > { %v722_v45 = vadd.f32 %v2757_v57, %v638_v47  ;;  %v1252_v57 = vmul.f32 %v2843_v13, %v2602_v6  ;;  %v2941_v38 = vstv %s2890_s27  ;;  %v2952_v47 = vstv %s2892_s17  ;;  %s3113_s27 = sld [smem:[#allocation4 + $0x36]] }
 0x1fe   : > { %v649_v37 = vadd.f32 %v646_v4, %v642_v29  ;;  %v1233_v4 = vmul.f32 %v1231_v15, %v2602_v6  ;;  %v653_v15 = vmul.f32 %v2930_v22, %v2591_v59  ;;  %s3126_s17 = sld [smem:[#allocation4 + $0x5]] }
 0x1ff   : > { %v1255_v33 = vadd.f32 %v1252_v57, %v1248_v16  ;;  %v2987_v16 = vstv %s2934_s24  ;;  %s3171_s24 = sld [smem:[#allocation4 + $0xc]] }
 0x200   : > { %v663_v29 = vmul.f32 %v2987_v16, %v2594_v60  ;;  %v1235_v34 = vadd.f32 %v1233_v4, %v1230_v21 }
 0x201   : > { %1194 = vrot.lane.b32.xlu0 %v1186_v51, %s2370_s8  ;;  %1190 = vrot.lane.b32.xlu1 %v1184_v52, %s2370_s8  ;;  %v2898_v51 = vstv %s2851_s18  ;;  %v747_v52 = vadd.f32 %v2755_v56, %v648_v50  ;;  %s3061_s18 = sld [smem:[#allocation4 + $0x2e]] }
 0x202   : > { %1140 = vrot.lane.b32.xlu2 %v1133_v53, %s2370_s8 }
 0x203   : > { %v2821_v55 = vpop.permute.xlu0 %842  ;;  %v2823_v58 = vpop.permute.xlu1 %818 }
 0x204   : > { %v2829_v0 = vpop.permute.xlu2 %846 }
 0x209   : > { %1220 = vrot.lane.b32.xlu0 %v1212_v8, %s2370_s8  ;;  %1216 = vrot.lane.b32.xlu1 %v1210_v9, %s2370_s8  ;;  %v1208_v8 = vmul.f32 %v2812_v54, %v2602_v6  ;;  %v656_v9 = vmul.f32 %v2898_v51, %v2599_v5  ;;  %v1204_v54 = vmul.f32 %v2831_v1, %v2591_v59 }
 0x20a   : > { %1166 = vrot.lane.b32.xlu2 %v1159_v12, %s2370_s8  ;;  %v723_v1 = vadd.f32 %v2746_v46, %v639_v36  ;;  %v1303_v46 = vmul.f32 %v2941_v38, %v2599_v5  ;;  %v2999_v36 = vstv %s2943_s30  ;;  %s2058_s30 = sld [smem:[#allocation4 + $0x44]] }
 0x20b   : > { %v2854_v18 = vpop.permute.xlu0 %868  ;;  %v2856_v19 = vpop.permute.xlu1 %844  ;;  %v1211_v30 = vadd.f32 %v1208_v8, %v1204_v54 }
 0x20c   : > { %v2866_v23 = vpop.permute.xlu2 %872 }
 0x211   : > { %1260 = vrot.lane.b32.xlu0 %v1254_v42, %s2371_s19  ;;  %1238 = vrot.lane.b32.xlu1 %v1234_v43, %s2371_s19  ;;  %v659_v42 = vadd.f32 %v656_v9, %v652_v31  ;;  %v748_v43 = vadd.f32 %v2772_v11, %v649_v37  ;;  %v1278_v11 = vmul.f32 %v2888_v49, %v2602_v6 }
 0x212   : > { %1192 = vrot.lane.b32.xlu2 %v1185_v48, %s2370_s8  ;;  %v2956_v48 = vstv %s2901_s26  ;;  %s3163_s26 = sld [smem:[#allocation4 + $0x3d]] }
 0x213   : > { %v891_v53 = vpop.permute.xlu0 %890  ;;  %v2904_v61 = vpop.permute.xlu1 %870  ;;  %v773_v50 = vadd.f32 %v2770_v10, %v659_v42  ;;  %v1299_v9 = vmul.f32 %v2956_v48, %v2594_v60  ;;  %v1281_v31 = vadd.f32 %v1278_v11, %v1274_v17  ;;  %v3010_v42 = vstv %s2945_s4  ;;  %s2372_s4 = smov 123  }
 0x214   : > { %v2916_v7 = vadd.f32 %v891_v53, %v722_v45  ;;  %v913_v56 = vpop.permute.xlu2 %912  ;;  %v657_v45 = vmul.f32 %v2898_v51, %v2602_v6 }
 0x215   : > { %v2922_v12 = vadd.f32 %v913_v56, %v747_v52  ;;  %v667_v56 = vmul.f32 %v2952_v47, %v2599_v5  ;;  %v1306_v54 = vadd.f32 %v1303_v46, %v1299_v9  ;;  %v654_v9 = vmul.f32 %v2930_v22, %v2627_v35 }
 0x217   : > { %v670_v37 = vadd.f32 %v667_v56, %v663_v29 }
 0x219   : > { %1286 = vrot.lane.b32.xlu0 %v1280_v32, %s2371_s19  ;;  %1262 = vrot.lane.b32.xlu1 %v1255_v33, %s2371_s19  ;;  %v650_v32 = vadd.f32 %v647_v2, %v643_v20  ;;  %v660_v33 = vadd.f32 %v657_v45, %v653_v15  ;;  %v1253_v2 = vmul.f32 %v2843_v13, %v2633_v40 }
 0x21a   : > { %1218 = vrot.lane.b32.xlu2 %v1211_v30, %s2370_s8  ;;  %s2991_s8 = sld [smem:[#allocation4 + $0x1c]]  ;;  %v664_v13 = vmul.f32 %v2987_v16, %v2591_v59  ;;  %v1249_v20 = vmul.f32 %v2868_v26, %v2627_v35 }
 0x21b   : > { %v915_v52 = vpop.permute.xlu0 %914  ;;  %v893_v53 = vpop.permute.xlu1 %892  ;;  %v749_v27 = vadd.f32 %v2761_v62, %v650_v32  ;;  %v774_v30 = vadd.f32 %v2787_v25, %v660_v33  ;;  %v1329_v62 = vmul.f32 %v2999_v36, %v2599_v5  ;;  %v1304_v25 = vmul.f32 %v2941_v38, %v2602_v6 }
 0x21c   : > { %v2969_v57 = vadd.f32 %v915_v52, %v748_v43  ;;  %v2971_v3 = vadd.f32 %v893_v53, %v723_v1  ;;  %v939_v10 = vpop.permute.xlu2 %938  ;;  %v3016_v1 = vstv %s2958_s5  ;;  %v799_v43 = vadd.f32 %v2785_v24, %v670_v37  ;;  %s2009_s5 = sld [smem:[#allocation4 + $0x13]] }
 0x21d   : > { %v2978_v8 = vadd.f32 %v939_v10, %v773_v50  ;;  %v668_v50 = vmul.f32 %v2952_v47, %v2602_v6  ;;  %v658_v53 = vmul.f32 %v2898_v51, %v2633_v40  ;;  %v678_v10 = vmul.f32 %v3010_v42, %v2599_v5 }
 0x21e   : > { %v1325_v56 = vmul.f32 %v3016_v1, %v2594_v60  ;;  %v1300_v51 = vmul.f32 %v2956_v48, %v2591_v59  ;;  %v1256_v22 = vadd.f32 %v1253_v2, %v1249_v20  ;;  %v3055_v32 = vstv %s3001_s28  ;;  %s2016_s28 = sld [smem:[#allocation4 + $0x1a]] }
 0x21f   : > { %v3066_v37 = vstv %s3012_s7  ;;  %s2003_s7 = sld [smem:[#allocation4 + $0xd]] }
 0x220   : > { %v3044_v17 = vstv %s2991_s8  ;;  %v1332_v21 = vadd.f32 %v1329_v62, %v1325_v56  ;;  %v1307_v29 = vadd.f32 %v1304_v25, %v1300_v51  ;;  %v665_v56 = vmul.f32 %v2987_v16, %v2627_v35  ;;  %s2065_s8 = sld [smem:[#allocation4 + $0x4b]] }
 0x221   : > { %1312 = vrot.lane.b32.xlu0 %v1306_v54, %s2371_s19  ;;  %1288 = vrot.lane.b32.xlu1 %v1281_v31, %s2371_s19  ;;  %v674_v15 = vmul.f32 %v3044_v17, %v2594_v60  ;;  %v661_v54 = vadd.f32 %v658_v53, %v654_v9  ;;  %v671_v31 = vadd.f32 %v668_v50, %v664_v13  ;;  %v3100_v51 = vstv %s3048_s15  ;;  %s2010_s15 = sld [smem:[#allocation4 + $0x14]] }
 0x222   : > { %1240 = vrot.lane.b32.xlu2 %v1235_v34, %s2371_s19  ;;  %v1275_v9 = vmul.f32 %v2907_v63, %v2627_v35  ;;  %v685_v13 = vmul.f32 %v3100_v51, %v2594_v60 }
 0x223   : > { %v941_v45 = vpop.permute.xlu0 %940  ;;  %v917_v52 = vpop.permute.xlu1 %916  ;;  %v681_v33 = vadd.f32 %v678_v10, %v674_v15  ;;  %v775_v26 = vadd.f32 %v2776_v14, %v661_v54  ;;  %v800_v34 = vadd.f32 %v2802_v41, %v671_v31  ;;  %v1355_v14 = vmul.f32 %v3055_v32, %v2599_v5 }
 0x224   : > { %v3027_v46 = vadd.f32 %v941_v45, %v774_v30  ;;  %v3029_v11 = vadd.f32 %v917_v52, %v749_v27  ;;  %v965_v24 = vpop.permute.xlu2 %964  ;;  %v3072_v27 = vstv %s3005_s6  ;;  %v669_v30 = vmul.f32 %v2952_v47, %v2633_v40  ;;  %s2052_s6 = sld [smem:[#allocation4 + $0x3e]] }
 0x225   : > { %v3035_v4 = vadd.f32 %v965_v24, %v799_v43  ;;  %v825_v43 = vadd.f32 %v2800_v39, %v681_v33  ;;  %v1330_v41 = vmul.f32 %v2999_v36, %v2602_v6  ;;  %v679_v52 = vmul.f32 %v3010_v42, %v2602_v6 }
 0x226   : > { %v1279_v47 = vmul.f32 %v2888_v49, %v2633_v40  ;;  %v689_v39 = vmul.f32 %v3066_v37, %v2599_v5  ;;  %v1351_v2 = vmul.f32 %v3072_v27, %v2594_v60  ;;  %v1326_v10 = vmul.f32 %v3016_v1, %v2591_v59 }
 0x227   : > { %v675_v49 = vmul.f32 %v3044_v17, %v2591_v59  ;;  %v3111_v54 = vstv %s3057_s21  ;;  %v3120_v33 = vstv %s3068_s16  ;;  %s3293_s21 = sld [smem:[#allocation4 + $0x37]] }
 0x228   : > { %v1358_v20 = vadd.f32 %v1355_v14, %v1351_v2  ;;  %v1333_v15 = vadd.f32 %v1330_v41, %v1326_v10  ;;  %v1282_v16 = vadd.f32 %v1279_v47, %v1275_v9  ;;  %v692_v31 = vadd.f32 %v689_v39, %v685_v13  ;;  %s2072_s16 = sld [smem:[#allocation4 + $0x52]] }
 0x229   : > { %1338 = vrot.lane.b32.xlu0 %v1332_v21, %s2371_s19  ;;  %1314 = vrot.lane.b32.xlu1 %v1307_v29, %s2371_s19  ;;  %v672_v21 = vadd.f32 %v669_v30, %v665_v56  ;;  %v682_v29 = vadd.f32 %v679_v52, %v675_v49  ;;  %v1352_v39 = vmul.f32 %v3072_v27, %v2591_v59  ;;  %v3154_v10 = vstv %s3104_s23  ;;  %s3311_s23 = sld [smem:[#allocation4 + $0x6]] }
 0x22a   : > { %1264 = vrot.lane.b32.xlu2 %v1256_v22, %s2371_s19  ;;  %v851_v30 = vadd.f32 %v2821_v55, %v692_v31  ;;  %v1305_v55 = vmul.f32 %v2941_v38, %v2633_v40  ;;  %v676_v2 = vmul.f32 %v3044_v17, %v2627_v35  ;;  %v686_v56 = vmul.f32 %v3100_v51, %v2591_v59 }
 0x22b   : > { %v967_v50 = vpop.permute.xlu0 %966  ;;  %v943_v45 = vpop.permute.xlu1 %942  ;;  %v801_v63 = vadd.f32 %v2791_v28, %v672_v21  ;;  %v826_v22 = vadd.f32 %v2823_v58, %v682_v29  ;;  %v1381_v28 = vmul.f32 %v3111_v54, %v2599_v5  ;;  %v1356_v58 = vmul.f32 %v3055_v32, %v2602_v6 }
 0x22c   : > { %v3083_v62 = vadd.f32 %v967_v50, %v800_v34  ;;  %v3085_v25 = vadd.f32 %v943_v45, %v775_v26  ;;  %v991_v53 = vpop.permute.xlu2 %990  ;;  %v3124_v26 = vstv %s3061_s18  ;;  %v680_v34 = vmul.f32 %v3010_v42, %v2633_v40  ;;  %s2373_s18 = smov 122  }
 0x22d   : > { %v3091_v24 = vadd.f32 %v991_v53, %v825_v43  ;;  %v690_v45 = vmul.f32 %v3066_v37, %v2602_v6  ;;  %v700_v42 = vmul.f32 %v3120_v33, %v2599_v5  ;;  %v1377_v47 = vmul.f32 %v3124_v26, %v2594_v60 }
 0x22e   : > { %v1301_v38 = vmul.f32 %v2956_v48, %v2627_v35  ;;  %v696_v49 = vmul.f32 %v3154_v10, %v2594_v60  ;;  %v1359_v13 = vadd.f32 %v1356_v58, %v1352_v39  ;;  %v1405_v29 = vstv %s3113_s27  ;;  %s2023_s27 = sld [smem:[#allocation4 + $0x21]] }
 0x22f   : > { %v1384_v9 = vadd.f32 %v1381_v28, %v1377_v47  ;;  %v1402_v31 = vstv %s3126_s17  ;;  %v1327_v47 = vmul.f32 %v3016_v1, %v2627_v35  ;;  %v1420_v1 = vstv %s3171_s24  ;;  %s2066_s17 = sld [smem:[#allocation4 + $0x4c]] }
 0x230   : > { %v1308_v21 = vadd.f32 %v1305_v55, %v1301_v38  ;;  %v703_v17 = vadd.f32 %v700_v42, %v696_v49  ;;  %v687_v55 = vmul.f32 %v3100_v51, %v2627_v35  ;;  %v697_v42 = vmul.f32 %v3154_v10, %v2591_v59  ;;  %s2079_s24 = sld [smem:[#allocation4 + $0x59]] }
 0x231   : > { %1364 = vrot.lane.b32.xlu0 %v1358_v20, %s2371_s19  ;;  %1340 = vrot.lane.b32.xlu1 %v1333_v15, %s2371_s19  ;;  %v683_v20 = vadd.f32 %v680_v34, %v676_v2  ;;  %v693_v15 = vadd.f32 %v690_v45, %v686_v56  ;;  %v1403_v45 = vmul.f32 %v1402_v31, %v2594_v60  ;;  %v3199_v49 = vstv %s3163_s26  ;;  %s2017_s26 = sld [smem:[#allocation4 + $0x1b]] }
 0x232   : > { %1290 = vrot.lane.b32.xlu2 %v1282_v16, %s2371_s19 }
 0x233   : > { %v993_v43 = vpop.permute.xlu0 %992  ;;  %v969_v50 = vpop.permute.xlu1 %968  ;;  %v827_v16 = vadd.f32 %v2806_v44, %v683_v20  ;;  %v852_v48 = vadd.f32 %v2856_v19, %v693_v15  ;;  %v701_v44 = vmul.f32 %v3120_v33, %v2602_v6  ;;  %v1426_v15 = vmul.f32 %v3199_v49, %v2602_v6 }
 0x234   : > { %v3137_v14 = vadd.f32 %v993_v43, %v826_v22  ;;  %v3139_v41 = vadd.f32 %v969_v50, %v801_v63  ;;  %v1017_v52 = vpop.permute.xlu2 %1016  ;;  %v691_v63 = vmul.f32 %v3066_v37, %v2633_v40  ;;  %v877_v22 = vadd.f32 %v2854_v18, %v703_v17 }
 0x235   : > { %v3145_v53 = vadd.f32 %v1017_v52, %v851_v30  ;;  %v1406_v43 = vmul.f32 %v1405_v29, %v2599_v5  ;;  %v1382_v50 = vmul.f32 %v3111_v54, %v2602_v6  ;;  %v1331_v37 = vmul.f32 %v2999_v36, %v2633_v40 }
 0x236   : > { %v1378_v52 = vmul.f32 %v3124_v26, %v2591_v59  ;;  %v694_v36 = vadd.f32 %v691_v63, %v687_v55  ;;  %v704_v56 = vadd.f32 %v701_v44, %v697_v42  ;;  %v702_v17 = vmul.f32 %v3120_v33, %v2633_v40 }
 0x237   : > { %v1408_v39 = vadd.f32 %v1406_v43, %v1403_v45  ;;  %v1334_v38 = vadd.f32 %v1331_v37, %v1327_v47  ;;  %v1353_v33 = vmul.f32 %v3072_v27, %v2627_v35  ;;  %v1427_v37 = vmul.f32 %v3199_v49, %v2633_v40 }
 0x238   : > { %v1385_v2 = vadd.f32 %v1382_v50, %v1378_v52  ;;  %v853_v51 = vadd.f32 %v2829_v0, %v694_v36 }
 0x239   : > { %1390 = vrot.lane.b32.xlu0 %v1384_v9, %s2371_s19  ;;  %1366 = vrot.lane.b32.xlu1 %v1359_v13, %s2371_s19  ;;  %v878_v9 = vadd.f32 %v2904_v61, %v704_v56  ;;  %v1357_v61 = vmul.f32 %v3055_v32, %v2633_v40  ;;  %v1446_v32 = vstv %s2009_s5  ;;  %s2073_s5 = sld [smem:[#allocation4 + $0x53]] }
 0x23a   : > { %1316 = vrot.lane.b32.xlu2 %v1308_v21, %s2371_s19  ;;  %v1407_v21 = vmul.f32 %v1405_v29, %v2602_v6  ;;  %v698_v29 = vmul.f32 %v3154_v10, %v2627_v35  ;;  %v1448_v47 = vmul.f32 %v1446_v32, %v2591_v59 }
 0x23b   : > { %v1019_v34 = vpop.permute.xlu0 %1018  ;;  %v995_v30 = vpop.permute.xlu1 %994  ;;  %v1360_v44 = vadd.f32 %v1357_v61, %v1353_v33  ;;  %v1449_v61 = vmul.f32 %v1446_v32, %v2627_v35  ;;  %v3267_v33 = vstv %s2052_s6  ;;  %s2037_s6 = sld [smem:[#allocation4 + $0x2f]] }
 0x23c   : > { %v3181_v19 = vadd.f32 %v1019_v34, %v852_v48  ;;  %v3183_v28 = vadd.f32 %v995_v30, %v827_v16  ;;  %v1043_v58 = vpop.permute.xlu2 %1042  ;;  %v1404_v34 = vmul.f32 %v1402_v31, %v2591_v59  ;;  %v705_v50 = vadd.f32 %v702_v17, %v698_v29 }
 0x23d   : > { %v3187_v18 = vadd.f32 %v1043_v58, %v877_v22  ;;  %v1422_v22 = vmul.f32 %v1420_v1, %v2591_v59  ;;  %v1450_v58 = vstv %s2058_s30  ;;  %s2030_s30 = sld [smem:[#allocation4 + $0x28]] }
 0x23e   : > { %v1409_v43 = vadd.f32 %v1407_v21, %v1404_v34  ;;  %v1452_v27 = vmul.f32 %v1450_v58, %v2602_v6  ;;  %v1425_v21 = vmul.f32 %v3199_v49, %v2599_v5  ;;  %v1599_v49 = vmul.f32 %v3267_v33, %v2599_v5 }
 0x23f   : > { %v1429_v30 = vadd.f32 %v1426_v15, %v1422_v22  ;;  %v1421_v22 = vmul.f32 %v1420_v1, %v2594_v60 }
 0x240   : > { %v1455_v36 = vadd.f32 %v1452_v27, %v1448_v47  ;;  %v1600_v47 = vmul.f32 %v3267_v33, %v2602_v6 }
 0x241   : > { %1412 = vrot.lane.b32.xlu0 %v1408_v39, %s2372_s4  ;;  %1392 = vrot.lane.b32.xlu1 %v1385_v2, %s2371_s19  ;;  %v1423_v39 = vmul.f32 %v1420_v1, %v2627_v35  ;;  %v1379_v2 = vmul.f32 %v3124_v26, %v2627_v35  ;;  %v1428_v29 = vadd.f32 %v1425_v21, %v1421_v22  ;;  %v1579_v21 = vstv %s3293_s21  ;;  %s2038_s21 = sld [smem:[#allocation4 + $0x30]] }
 0x242   : > { %1342 = vrot.lane.b32.xlu2 %v1334_v38, %s2371_s19  ;;  %v1476_v38 = vstv %s2065_s8  ;;  %s2024_s8 = sld [smem:[#allocation4 + $0x22]] }
 0x243   : > { %v1045_v13 = vpop.permute.xlu0 %1044  ;;  %v1021_v20 = vpop.permute.xlu1 %1020  ;;  %v1430_v56 = vadd.f32 %v1427_v37, %v1423_v39 }
 0x244   : > { %v3212_v16 = vadd.f32 %v1045_v13, %v878_v9  ;;  %v3214_v48 = vadd.f32 %v1021_v20, %v853_v51  ;;  %v1065_v0 = vpop.permute.xlu2 %1064  ;;  %v1478_v9 = vmul.f32 %v1476_v38, %v2602_v6  ;;  %v1453_v13 = vmul.f32 %v1450_v58, %v2633_v40 }
 0x245   : > { %v3219_v63 = vadd.f32 %v1065_v0, %v2916_v7  ;;  %v879_v7 = vadd.f32 %v2866_v23, %v705_v50  ;;  %v1383_v23 = vmul.f32 %v3111_v54, %v2633_v40 }
 0x249   : > { %1436 = vrot.lane.b32.xlu0 %v1429_v30, %s2372_s4  ;;  %1414 = vrot.lane.b32.xlu1 %v1409_v43, %s2372_s4  ;;  %v1479_v30 = vmul.f32 %v1476_v38, %v2633_v40 }
 0x24a   : > { %1368 = vrot.lane.b32.xlu2 %v1360_v44, %s2371_s19  ;;  %v3281_v44 = vstv %s2003_s7  ;;  %s2080_s7 = sld [smem:[#allocation4 + $0x5a]] }
 0x24b   : > { %v1067_v10 = vpop.permute.xlu0 %1066  ;;  %v1047_v31 = vpop.permute.xlu1 %1046 }
 0x24c   : > { %v3235_v45 = vadd.f32 %v1067_v10, %v2971_v3  ;;  %v3237_v52 = vadd.f32 %v1047_v31, %v879_v7  ;;  %v1089_v55 = vpop.permute.xlu2 %1088  ;;  %v1386_v3 = vadd.f32 %v1383_v23, %v1379_v2  ;;  %v1451_v7 = vmul.f32 %v1450_v58, %v2599_v5 }
 0x24d   : > { %v3242_v42 = vadd.f32 %v1089_v55, %v2969_v57  ;;  %v1472_v57 = vstv %s2016_s28  ;;  %v1595_v31 = vmul.f32 %v3281_v44, %v2594_v60  ;;  %s2086_s28 = sld [smem:[#allocation4 + $0x60]] }
 0x24e   : > { %v1474_v0 = vmul.f32 %v1472_v57, %v2591_v59  ;;  %v1475_v27 = vmul.f32 %v1472_v57, %v2627_v35 }
 0x24f   : > { %v1602_v37 = vadd.f32 %v1599_v49, %v1595_v31 }
 0x250   : > { %v1481_v34 = vadd.f32 %v1478_v9, %v1474_v0  ;;  %v1482_v55 = vadd.f32 %v1479_v30, %v1475_v27 }
 0x251   : > { %1462 = vrot.lane.b32.xlu0 %v1455_v36, %s2372_s4  ;;  %1438 = vrot.lane.b32.xlu1 %v1430_v56, %s2372_s4  ;;  %v3308_v56 = vstv %s2010_s15  ;;  %s2087_s15 = sld [smem:[#allocation4 + $0x61]] }
 0x252   : > { %1394 = vrot.lane.b32.xlu2 %v1386_v3, %s2371_s19  ;;  %s2059_s19 = sld [smem:[#allocation4 + $0x45]]  ;;  %v1477_v3 = vmul.f32 %v1476_v38, %v2599_v5  ;;  %v1622_v30 = vmul.f32 %v3308_v56, %v2591_v59 }
 0x253   : > { %v1091_v54 = vpop.permute.xlu0 %1090  ;;  %v1087_v51 = vpop.permute.xlu1 %1086 }
 0x254   : > { %v3254_v26 = vadd.f32 %v1091_v54, %v3029_v11  ;;  %v3257_v20 = vadd.f32 %v1087_v51, %v2922_v12  ;;  %v1115_v15 = vpop.permute.xlu2 %1114  ;;  %v1456_v11 = vadd.f32 %v1453_v13, %v1449_v61  ;;  %v1621_v51 = vmul.f32 %v3308_v56, %v2594_v60 }
 0x255   : > { %v3262_v17 = vadd.f32 %v1115_v15, %v3027_v46  ;;  %v1580_v61 = vmul.f32 %v1579_v21, %v2599_v5 }
 0x258   : > { %v3291_v23 = vstv %s2059_s19  ;;  %s2031_s19 = sld [smem:[#allocation4 + $0x29]] }
 0x259   : > { %1488 = vrot.lane.b32.xlu0 %v1481_v34, %s2372_s4  ;;  %1464 = vrot.lane.b32.xlu1 %v1456_v11, %s2372_s4 }
 0x25a   : > { %1434 = vrot.lane.b32.xlu2 %v1428_v29, %s2372_s4  ;;  %v1576_v29 = vstv %s3311_s23 }
 0x25b   : > { %v1117_v12 = vpop.permute.xlu0 %1116  ;;  %v1113_v46 = vpop.permute.xlu1 %1112  ;;  %v1577_v49 = vmul.f32 %v1576_v29, %v2594_v60 }
 0x25c   : > { %v3276_v1 = vadd.f32 %v1117_v12, %v3085_v25  ;;  %v3279_v43 = vadd.f32 %v1113_v46, %v2978_v8  ;;  %v1141_v50 = vpop.permute.xlu2 %1140  ;;  %v1447_v25 = vmul.f32 %v1446_v32, %v2594_v60  ;;  %v1625_v32 = vmul.f32 %v3291_v23, %v2599_v5 }
 0x25d   : > { %v3285_v10 = vadd.f32 %v1141_v50, %v3083_v62  ;;  %v3345_v50 = vstv %s2023_s27 }
 0x25e   : > { %v1454_v8 = vadd.f32 %v1451_v7, %v1447_v25  ;;  %v1628_v9 = vadd.f32 %v1625_v32, %v1621_v51 }
 0x261   : > { %1608 = vrot.lane.b32.xlu0 %v1602_v37, %s2373_s18  ;;  %1490 = vrot.lane.b32.xlu1 %v1482_v55, %s2372_s4  ;;  %v1581_v37 = vmul.f32 %v1579_v21, %v2602_v6  ;;  %v1646_v21 = vstv %s2017_s26 }
 0x262   : > { %1460 = vrot.lane.b32.xlu2 %v1454_v8, %s2372_s4 }
 0x263   : > { %v1143_v62 = vpop.permute.xlu0 %1142  ;;  %v1139_v58 = vpop.permute.xlu1 %1138 }
 0x264   : > { %v3303_v39 = vadd.f32 %v1143_v62, %v3139_v41  ;;  %v3306_v2 = vadd.f32 %v1139_v58, %v3035_v4  ;;  %v1167_v36 = vpop.permute.xlu2 %1166  ;;  %v1596_v41 = vmul.f32 %v3281_v44, %v2591_v59  ;;  %v1473_v4 = vmul.f32 %v1472_v57, %v2594_v60 }
 0x265   : > { %v3314_v54 = vadd.f32 %v1167_v36, %v3137_v14  ;;  %v3324_v14 = vstv %s2072_s16  ;;  %v1626_v57 = vmul.f32 %v3291_v23, %v2602_v6  ;;  %v1601_v58 = vmul.f32 %v3267_v33, %v2633_v40 }
 0x266   : > { %v1603_v13 = vadd.f32 %v1600_v47, %v1596_v41  ;;  %v1480_v15 = vadd.f32 %v1477_v3, %v1473_v4  ;;  %v1503_v12 = vmul.f32 %v3324_v14, %v2599_v5  ;;  %v1505_v25 = vmul.f32 %v3324_v14, %v2633_v40 }
 0x267   : > { %v1629_v7 = vadd.f32 %v1626_v57, %v1622_v30  ;;  %v1501_v47 = vmul.f32 %v3345_v50, %v2627_v35  ;;  %v1578_v36 = vmul.f32 %v1576_v29, %v2591_v59  ;;  %v1650_v41 = vstv %s2066_s17 }
 0x268   : > { %v1653_v4 = vmul.f32 %v1650_v41, %v2633_v40  ;;  %v1647_v57 = vmul.f32 %v1646_v21, %v2594_v60 }
 0x269   : > { %1634 = vrot.lane.b32.xlu0 %v1628_v9, %s2373_s18  ;;  %1610 = vrot.lane.b32.xlu1 %v1603_v13, %s2373_s18  ;;  %v1508_v3 = vadd.f32 %v1505_v25, %v1501_v47  ;;  %v1583_v51 = vadd.f32 %v1581_v37, %v1578_v36  ;;  %v1651_v9 = vmul.f32 %v1650_v41, %v2599_v5 }
 0x26a   : > { %1486 = vrot.lane.b32.xlu2 %v1480_v15, %s2372_s4 }
 0x26b   : > { %v1169_v38 = vpop.permute.xlu0 %1168  ;;  %v1165_v0 = vpop.permute.xlu1 %1164  ;;  %v1654_v29 = vadd.f32 %v1651_v9, %v1647_v57  ;;  %v1648_v9 = vmul.f32 %v1646_v21, %v2591_v59 }
 0x26c   : > { %v3331_v22 = vadd.f32 %v1169_v38, %v3183_v28  ;;  %v3334_v34 = vadd.f32 %v1165_v0, %v3091_v24  ;;  %v1193_v11 = vpop.permute.xlu2 %1192  ;;  %v1499_v28 = vmul.f32 %v3345_v50, %v2594_v60  ;;  %v1582_v24 = vadd.f32 %v1580_v61, %v1577_v49 }
 0x26d   : > { %v3340_v46 = vadd.f32 %v1193_v11, %v3181_v19  ;;  %v1627_v38 = vmul.f32 %v3291_v23, %v2633_v40  ;;  %v1649_v61 = vmul.f32 %v1646_v21, %v2627_v35 }
 0x26e   : > { %v1506_v31 = vadd.f32 %v1503_v12, %v1499_v28  ;;  %v1528_v12 = vstv %s2079_s24  ;;  %s1868_s24 = scalar_lea.sflag [#allocation6], %s2490_s22 }
 0x26f   : > { %v1656_v11 = vadd.f32 %v1653_v4, %v1649_v61  ;;  %v1531_v49 = vmul.f32 %v1528_v12, %v2633_v40  ;;  %v1529_v30 = vmul.f32 %v1528_v12, %v2599_v5  ;;  %v1554_v61 = vstv %s2086_s28 }
 0x270   : > { %v1555_v57 = vmul.f32 %v1554_v61, %v2599_v5 }
 0x271   : > { %1586 = vrot.lane.b32.xlu0 %v1582_v24, %s2373_s18  ;;  %1636 = vrot.lane.b32.xlu1 %v1629_v7, %s2373_s18  ;;  %v1524_v7 = vstv %s2030_s30 }
 0x272   : > { %1512 = vrot.lane.b32.xlu2 %v1506_v31, %s2372_s4  ;;  %v1504_v31 = vmul.f32 %v3324_v14, %v2602_v6  ;;  %v1525_v25 = vmul.f32 %v1524_v7, %v2594_v60 }
 0x273   : > { %v1195_v19 = vpop.permute.xlu0 %1194  ;;  %v1191_v27 = vpop.permute.xlu1 %1190 }
 0x274   : > { %v3356_v55 = vadd.f32 %v1195_v19, %v3214_v48  ;;  %v3359_v8 = vadd.f32 %v1191_v27, %v3145_v53  ;;  %v1219_v62 = vpop.permute.xlu2 %1218  ;;  %v1597_v48 = vmul.f32 %v3281_v44, %v2627_v35  ;;  %v1527_v27 = vmul.f32 %v1524_v7, %v2627_v35 }
 0x275   : > { %v3364_v32 = vadd.f32 %v1219_v62, %v3212_v16  ;;  %v1532_v62 = vadd.f32 %v1529_v30, %v1525_v25  ;;  %v1526_v30 = vmul.f32 %v1524_v7, %v2591_v59 }
 0x276   : > { %v1604_v53 = vadd.f32 %v1601_v58, %v1597_v48  ;;  %v1534_v37 = vadd.f32 %v1531_v49, %v1527_v27  ;;  %v1676_v58 = vstv %s2073_s5  ;;  %v1702_v27 = vstv %s2080_s7 }
 0x277   : > { %v1679_v47 = vmul.f32 %v1676_v58, %v2633_v40  ;;  %v1677_v36 = vmul.f32 %v1676_v58, %v2599_v5  ;;  %v1703_v25 = vmul.f32 %v1702_v27, %v2599_v5 }
 0x279   : > { %1516 = vrot.lane.b32.xlu0 %v1508_v3, %s2372_s4  ;;  %1588 = vrot.lane.b32.xlu1 %v1583_v51, %s2373_s18  ;;  %v1672_v51 = vstv %s2024_s8 }
 0x27a   : > { %1612 = vrot.lane.b32.xlu2 %v1604_v53, %s2373_s18  ;;  %v1652_v53 = vmul.f32 %v1650_v41, %v2602_v6  ;;  %v1673_v4 = vmul.f32 %v1672_v51, %v2594_v60  ;;  %v1557_v41 = vmul.f32 %v1554_v61, %v2633_v40 }
 0x27b   : > { %v1221_v16 = vpop.permute.xlu0 %1220  ;;  %v1217_v33 = vpop.permute.xlu1 %1216 }
 0x27c   : > { %v3377_v13 = vadd.f32 %v1221_v16, %v3237_v52  ;;  %v3380_v44 = vadd.f32 %v1217_v33, %v3187_v18  ;;  %v1241_v15 = vpop.permute.xlu2 %1240  ;;  %v1623_v52 = vmul.f32 %v3308_v56, %v2627_v35  ;;  %v1675_v33 = vmul.f32 %v1672_v51, %v2627_v35 }
 0x27d   : > { %v3385_v0 = vadd.f32 %v1241_v15, %v3235_v45 }
 0x27e   : > { %v1630_v18 = vadd.f32 %v1627_v38, %v1623_v52  ;;  %v1682_v15 = vadd.f32 %v1679_v47, %v1675_v33  ;;  %v1655_v38 = vadd.f32 %v1652_v53, %v1648_v9  ;;  %v1728_v33 = vstv %s2087_s15 }
 0x281   : > { %1664 = vrot.lane.b32.xlu0 %v1656_v11, %s2373_s18  ;;  %1660 = vrot.lane.b32.xlu1 %v1654_v29, %s2373_s18  ;;  %v1550_v29 = vstv %s2037_s6  ;;  %s2289_s6 = scalar_lea.hbm %s3569_s2, 32 }
 0x282   : > { %1638 = vrot.lane.b32.xlu2 %v1630_v18, %s2373_s18  ;;  %v1530_v18 = vmul.f32 %v1528_v12, %v2602_v6  ;;  %v1551_v49 = vmul.f32 %v1550_v29, %v2594_v60  ;;  %v1705_v12 = vmul.f32 %v1702_v27, %v2633_v40 }
 0x283   : > { %v1261_v45 = vpop.permute.xlu0 %1260  ;;  %v1239_v23 = vpop.permute.xlu1 %1238 }
 0x284   : > { %v3397_v28 = vadd.f32 %v1261_v45, %v3257_v20  ;;  %v3400_v56 = vadd.f32 %v1239_v23, %v3219_v63  ;;  %v1265_v24 = vpop.permute.xlu2 %1264  ;;  %v1500_v20 = vmul.f32 %v3345_v50, %v2591_v59  ;;  %v1553_v23 = vmul.f32 %v1550_v29, %v2627_v35 }
 0x285   : > { %v3405_v19 = vadd.f32 %v1265_v24, %v3254_v26 }
 0x286   : > { %v1507_v63 = vadd.f32 %v1504_v31, %v1500_v20  ;;  %v1560_v24 = vadd.f32 %v1557_v41, %v1553_v23  ;;  %v1533_v31 = vadd.f32 %v1530_v18, %v1526_v30 }
 0x289   : > { %1542 = vrot.lane.b32.xlu0 %v1534_v37, %s2372_s4  ;;  %1538 = vrot.lane.b32.xlu1 %v1532_v62, %s2372_s4  ;;  %v1698_v62 = vstv %s2031_s19 }
 0x28a   : > { %1514 = vrot.lane.b32.xlu2 %v1507_v63, %s2372_s4  ;;  %v1678_v63 = vmul.f32 %v1676_v58, %v2602_v6  ;;  %v1699_v47 = vmul.f32 %v1698_v62, %v2594_v60  ;;  %v1700_v18 = vmul.f32 %v1698_v62, %v2591_v59 }
 0x28b   : > { %v1287_v26 = vpop.permute.xlu0 %1286  ;;  %v1263_v14 = vpop.permute.xlu1 %1262 }
 0x28c   : > { %v3417_v48 = vadd.f32 %v1287_v26, %v3279_v43  ;;  %v3420_v50 = vadd.f32 %v1263_v14, %v3242_v42  ;;  %v1291_v3 = vpop.permute.xlu2 %1290  ;;  %v1680_v43 = vadd.f32 %v1677_v36, %v1673_v4  ;;  %v1701_v14 = vmul.f32 %v1698_v62, %v2627_v35 }
 0x28d   : > { %v3424_v16 = vadd.f32 %v1291_v3, %v3276_v1  ;;  %v1674_v36 = vmul.f32 %v1672_v51, %v2591_v59  ;;  %v1729_v4 = vmul.f32 %v1728_v33, %v2599_v5 }
 0x28e   : > { %v1708_v3 = vadd.f32 %v1705_v12, %v1701_v14 }
 0x28f   : > { %v1681_v53 = vadd.f32 %v1678_v63, %v1674_v36 }
 0x291   : > { %1690 = vrot.lane.b32.xlu0 %v1682_v15, %s2373_s18  ;;  %1686 = vrot.lane.b32.xlu1 %v1680_v43, %s2373_s18  ;;  %v1724_v43 = vstv %s2038_s21 }
 0x292   : > { %1662 = vrot.lane.b32.xlu2 %v1655_v38, %s2373_s18  ;;  %v1556_v38 = vmul.f32 %v1554_v61, %v2602_v6  ;;  %v1725_v41 = vmul.f32 %v1724_v43, %v2594_v60 }
 0x293   : > { %v1313_v42 = vpop.permute.xlu0 %1312  ;;  %v1289_v1 = vpop.permute.xlu1 %1288 }
 0x294   : > { %v3435_v52 = vadd.f32 %v1313_v42, %v3306_v2  ;;  %v3438_v21 = vadd.f32 %v1289_v1, %v3262_v17  ;;  %v1317_v11 = vpop.permute.xlu2 %1316  ;;  %v1558_v2 = vadd.f32 %v1555_v57, %v1551_v49  ;;  %v1727_v1 = vmul.f32 %v1724_v43, %v2627_v35 }
 0x295   : > { %v3442_v45 = vadd.f32 %v1317_v11, %v3303_v39  ;;  %v1732_v57 = vadd.f32 %v1729_v4, %v1725_v41  ;;  %v1704_v11 = vmul.f32 %v1702_v27, %v2602_v6 }
 0x297   : > { %v1707_v23 = vadd.f32 %v1704_v11, %v1700_v18 }
 0x299   : > { %1568 = vrot.lane.b32.xlu0 %v1560_v24, %s2372_s4  ;;  %1564 = vrot.lane.b32.xlu1 %v1558_v2, %s2372_s4  ;;  %v1730_v2 = vmul.f32 %v1728_v33, %v2602_v6 }
 0x29a   : > { %1540 = vrot.lane.b32.xlu2 %v1533_v31, %s2372_s4 }
 0x29b   : > { %v1339_v17 = vpop.permute.xlu0 %1338  ;;  %v1315_v39 = vpop.permute.xlu1 %1314 }
 0x29c   : > { %v3453_v20 = vadd.f32 %v1339_v17, %v3334_v34  ;;  %v3456_v7 = vadd.f32 %v1315_v39, %v3285_v10  ;;  %v1343_v37 = vpop.permute.xlu2 %1342  ;;  %v1706_v34 = vadd.f32 %v1703_v25, %v1699_v47 }
 0x29d   : > { %v3460_v26 = vadd.f32 %v1343_v37, %v3331_v22  ;;  %v1731_v22 = vmul.f32 %v1728_v33, %v2633_v40  ;;  %v1552_v40 = vmul.f32 %v1550_v29, %v2591_v59 }
 0x29f   : > { %v1734_v5 = vadd.f32 %v1731_v22, %v1727_v1 }
 0x2a1   : > { %1716 = vrot.lane.b32.xlu0 %v1708_v3, %s2373_s18  ;;  %1712 = vrot.lane.b32.xlu1 %v1706_v34, %s2373_s18 }
 0x2a2   : > { %1688 = vrot.lane.b32.xlu2 %v1681_v53, %s2373_s18 }
 0x2a3   : > { %v1365_v10 = vpop.permute.xlu0 %1364  ;;  %v1341_v58 = vpop.permute.xlu1 %1340 }
 0x2a4   : > { %v3471_v9 = vadd.f32 %v1365_v10, %v3359_v8  ;;  %v3474_v51 = vadd.f32 %v1341_v58, %v3314_v54  ;;  %v1369_v15 = vpop.permute.xlu2 %1368  ;;  %v1559_v8 = vadd.f32 %v1556_v38, %v1552_v40 }
 0x2a5   : > { %v3478_v42 = vadd.f32 %v1369_v15, %v3356_v55 }
 0x2a9   : > { %1742 = vrot.lane.b32.xlu0 %v1734_v5, %s2373_s18  ;;  %1738 = vrot.lane.b32.xlu1 %v1732_v57, %s2373_s18 }
 0x2aa   : > { %1566 = vrot.lane.b32.xlu2 %v1559_v8, %s2372_s4  ;;  %s1990_s4 = sshll.u32 %s2490_s22, 4 }
 0x2ab   : > { %v1391_v54 = vpop.permute.xlu0 %1390  ;;  %v1367_v61 = vpop.permute.xlu1 %1366  ;;  %s191_s17 = scalar_lea.vmem [#allocation9], %s1990_s4 }
 0x2ac   : > { %v3487_v55 = vadd.f32 %v1391_v54, %v3380_v44  ;;  %v3490_v35 = vadd.f32 %v1367_v61, %v3340_v46  ;;  %v1395_v60 = vpop.permute.xlu2 %1394  ;;  %s1880_s26 = sshll.u32 %s191_s17, 4  ;;  %s1881_s26 = int_to_ptr.vmem [resolvable:$true] %s1880_s26 }
 0x2ad   : > { %v3494_v29 = vadd.f32 %v1395_v60, %v3377_v13  ;;  %v1726_v13 = vmul.f32 %v1724_v43, %v2591_v59 }
 0x2af   : > { %v1733_v27 = vadd.f32 %v1730_v2, %v1726_v13 }
 0x2b2   : > { %1714 = vrot.lane.b32.xlu2 %v1707_v23, %s2373_s18 }
 0x2b3   : > { %v1413_v49 = vpop.permute.xlu0 %1412  ;;  %v1393_v30 = vpop.permute.xlu1 %1392 }
 0x2b4   : > { %v1418_v24 = vadd.f32 %v1413_v49, %v3400_v56  ;;  %v3500_v44 = vadd.f32 %v1393_v30, %v3364_v32  ;;  %v1435_v46 = vpop.permute.xlu2 %1434 }
 0x2b5   : > { %v1443_v31 = vadd.f32 %v1435_v46, %v3397_v28 }
 0x2ba   : > { %1740 = vrot.lane.b32.xlu2 %v1733_v27, %s2373_s18  ;;  %s2096_s18 = sshll.u32 %s2347_s12, 4 }
 0x2bb   : > { %v1437_v17 = vpop.permute.xlu0 %1436  ;;  %v1415_v39 = vpop.permute.xlu1 %1414  ;;  %s1879_s27 = scalar_lea.hbm %s3569_s2, %s2096_s18 }
 0x2bc   : > { %v1444_v12 = vadd.f32 %v1437_v17, %v3420_v50  ;;  %v1419_v25 = vadd.f32 %v1415_v39, %v3385_v0  ;;  %v1461_v56 = vpop.permute.xlu2 %1460  ;;  %s1882_s12 = sshll.u32 %s1879_s27, 4  ;;  %s1883_s12 = int_to_ptr.hbm [resolvable:$true] %s1882_s12 }
 0x2bd   : > { %v1469_v32 = vadd.f32 %v1461_v56, %v3417_v48  ;;  %s2283_s30 = sshra.s32 %s1883_s12, 4  ;;  %s2284_s30 = int_to_ptr.hbm [resolvable:$true] %s2283_s30 }
 0x2be   : > { %s2285_s5 = scalar_lea.hbm %s2284_s30, 16  ;;  %p2290_p8 = scmp.lt.s32.totalorder %s2284_s30, %s3569_s2 }
 0x2bf   : > { %p2286_p1 = scmp.ne.s32.totalorder %s2284_s30, %s2285_s5  ;;  %p2291_p11 = scmp.lt.s32.totalorder %s2289_s6, %s2285_s5 }
 0x2c1   : > { %p2287_p2 = pnand %p2286_p1, %p2469_p9  ;;  %p2292_p12 = por %p2291_p11, %p2290_p8 }
 0x2c3   : > { %v1463_v37 = vpop.permute.xlu0 %1462  ;;  %v1439_v62 = vpop.permute.xlu1 %1438  ;;  %p2288_p4 = pneg %p2287_p2 }
 0x2c4   : > { %v1470_v6 = vadd.f32 %v1463_v37, %v3438_v21  ;;  %v1445_v28 = vadd.f32 %v1439_v62, %v3405_v19  ;;  %v1487_v63 = vpop.permute.xlu2 %1486 }
 0x2c5   : > { %v1495_v59 = vadd.f32 %v1487_v63, %v3435_v52  ;;  %p2293_p13 = pnand %p2292_p12, %p2288_p4 }
 0x2cb   : > { %v1489_v14 = vpop.permute.xlu0 %1488  ;;  %v1465_v47 = vpop.permute.xlu1 %1464 }
 0x2cc   : > { %v1496_v36 = vadd.f32 %v1489_v14, %v3456_v7  ;;  %v1471_v50 = vadd.f32 %v1465_v47, %v3424_v16  ;;  %v1513_v3 = vpop.permute.xlu2 %1512 }
 0x2cd   : > { %v1521_v0 = vadd.f32 %v1513_v3, %v3453_v20 }
 0x2d3   : > { %v1609_v34 = vpop.permute.xlu0 %1608  ;;  %v1491_v48 = vpop.permute.xlu1 %1490 }
 0x2d4   : > { %v1613_v53 = vpop.permute.xlu2 %1612  ;;  %v1617_v33 = vadd.f32 %v1609_v34, %v1443_v31  ;;  %v1497_v13 = vadd.f32 %v1491_v48, %v3442_v45 }
 0x2d5   : > { %v1619_v10 = vadd.f32 %v1613_v53, %v1445_v28 }
 0x2d6   : > { %v1754_v52 = vrot.slane %v1617_v33, 1 }
 0x2d7   : > { %v1757_v4 = vrot.slane %v1619_v10, 1 }
 0x2db   : > { %v1635_v21 = vpop.permute.xlu0 %1634  ;;  %v1611_v58 = vpop.permute.xlu1 %1610 }
 0x2dc   : > { %v1618_v19 = vadd.f32 %v1611_v58, %v1444_v12  ;;  %v1639_v22 = vpop.permute.xlu2 %1638  ;;  %v1643_v38 = vadd.f32 %v1635_v21, %v1469_v32 }
 0x2dd   : > { %v1645_v16 = vadd.f32 %v1639_v22, %v1471_v50 }
 0x2de   : > { %v1755_v15 = vrot.slane %v1618_v19, 1  ;;  %v1767_v57 = vrot.slane %v1643_v38, 2 }
 0x2df   : > { %v1770_v8 = vrot.slane %v1645_v16, 2 }
 0x2e0   : > { %v1756_v43 = vsel %vm1753_vm7, %v1754_v52, %v1755_v15  ;;  %v1758_v7 = vsel %vm1753_vm7, %v1755_v15, %v1757_v4 }
 0x2e3   : > { %v1587_v1 = vpop.permute.xlu0 %1586  ;;  %v1637_v41 = vpop.permute.xlu1 %1636 }
 0x2e4   : > { %v1592_v20 = vadd.f32 %v1587_v1, %v1418_v24  ;;  %v1644_v40 = vadd.f32 %v1637_v41, %v1470_v6  ;;  %v1515_v5 = vpop.permute.xlu2 %1514 }
 0x2e5   : > { %v1522_v3 = vadd.f32 %v1515_v5, %v3474_v51 }
 0x2e6   : > { %v1761_v54 = vadd.f32 %v1756_v43, %v1592_v20  ;;  %v1768_v61 = vrot.slane %v1644_v40, 2 }
 0x2e8   : > { %v1769_v60 = vsel %vm1766_vm8, %v1767_v57, %v1768_v61  ;;  %v1771_v11 = vsel %vm1766_vm8, %v1768_v61, %v1770_v8 }
 0x2e9   : > { %v1774_v18 = vadd.f32 %v1769_v60, %v1761_v54 }
 0x2eb   : > { %v1517_v23 = vpop.permute.xlu0 %1516  ;;  %v1589_v49 = vpop.permute.xlu1 %1588 }
 0x2ec   : > { %v1593_v30 = vadd.f32 %v1589_v49, %v1419_v25  ;;  %v1663_v46 = vpop.permute.xlu2 %1662  ;;  %v1523_v45 = vadd.f32 %v1517_v23, %v3460_v26 }
 0x2ed   : > { %v1670_v27 = vadd.f32 %v1663_v46, %v1496_v36 }
 0x2ee   : > { %v1762_v2 = vadd.f32 %v1758_v7, %v1593_v30 }
 0x2ef   : > { %v1781_v32 = vrot.slane %v1670_v27, 3 }
 0x2f0   : > { %v1775_v31 = vadd.f32 %v1771_v11, %v1762_v2 }
 0x2f3   : > { %v1665_v24 = vpop.permute.xlu0 %1664  ;;  %v1661_v17 = vpop.permute.xlu1 %1660 }
 0x2f4   : > { %v1671_v39 = vadd.f32 %v1665_v24, %v1497_v13  ;;  %v1669_v12 = vadd.f32 %v1661_v17, %v1495_v59  ;;  %v1541_v56 = vpop.permute.xlu2 %1540 }
 0x2f5   : > { %v1548_v26 = vadd.f32 %v1541_v56, %v3490_v35 }
 0x2f6   : > { %v1783_v37 = vrot.slane %v1671_v39, 3  ;;  %v1780_v62 = vrot.slane %v1669_v12, 3 }
 0x2f8   : > { %v1784_v6 = vsel %vm1779_vm9, %v1781_v32, %v1783_v37  ;;  %v1782_v28 = vsel %vm1779_vm9, %v1780_v62, %v1781_v32 }
 0x2f9   : > { %v1788_v63 = vadd.f32 %v1784_v6, %v1775_v31  ;;  %v1787_v14 = vadd.f32 %v1782_v28, %v1774_v18 }
 0x2fb   : > { %v1543_v25 = vpop.permute.xlu0 %1542  ;;  %v1539_v47 = vpop.permute.xlu1 %1538 }
 0x2fc   : > { %v1689_v50 = vpop.permute.xlu2 %1688  ;;  %v1549_v7 = vadd.f32 %v1543_v25, %v3478_v42  ;;  %v1547_v38 = vadd.f32 %v1539_v47, %v3471_v9 }
 0x2fd   : > { %v1696_v36 = vadd.f32 %v1689_v50, %v1522_v3 }
 0x2ff   : > { %v1793_v10 = vrot.slane %v1696_v36, 4 }
 0x303   : > { %v1691_v34 = vpop.permute.xlu0 %1690  ;;  %v1687_v48 = vpop.permute.xlu1 %1686 }
 0x304   : > { %v1697_v59 = vadd.f32 %v1691_v34, %v1523_v45  ;;  %v1695_v53 = vadd.f32 %v1687_v48, %v1521_v0  ;;  %v1567_v33 = vpop.permute.xlu2 %1566 }
 0x305   : > { %v1574_v54 = vadd.f32 %v1567_v33, %v3500_v44 }
 0x306   : > { %v1795_v21 = vrot.slane %v1697_v59, 4  ;;  %v1792_v58 = vrot.slane %v1695_v53, 4 }
 0x308   : > { %v1796_v19 = vsel %vm210_vm1, %v1793_v10, %v1795_v21  ;;  %v1794_v22 = vsel %vm210_vm1, %v1792_v58, %v1793_v10 }
 0x309   : > { %v1800_v52 = vadd.f32 %v1796_v19, %v1788_v63  ;;  %v1799_v4 = vadd.f32 %v1794_v22, %v1787_v14 }
 0x30b   : > { %v1569_v15 = vpop.permute.xlu0 %1568  ;;  %v1565_v43 = vpop.permute.xlu1 %1564 }
 0x30c   : > { %v1715_v51 = vpop.permute.xlu2 %1714  ;;  %v1575_v42 = vadd.f32 %v1569_v15, %v3494_v29  ;;  %v1573_v9 = vadd.f32 %v1565_v43, %v3487_v55 }
 0x30d   : > { %v1722_v0 = vadd.f32 %v1715_v51, %v1548_v26 }
 0x30f   : > { %v1805_v40 = vrot.slane %v1722_v0, 5 }
 0x313   : > { %v1717_v16 = vpop.permute.xlu0 %1716  ;;  %v1713_v1 = vpop.permute.xlu1 %1712 }
 0x314   : > { %v1723_v41 = vadd.f32 %v1717_v16, %v1549_v7  ;;  %v1721_v20 = vadd.f32 %v1713_v1, %v1547_v38  ;;  %v1741_v8 = vpop.permute.xlu2 %1740 }
 0x315   : > { %v1748_v18 = vadd.f32 %v1741_v8, %v1574_v54 }
 0x316   : > { %v1807_v5 = vrot.slane %v1723_v41, 5  ;;  %v1804_v57 = vrot.slane %v1721_v20, 5 }
 0x317   : > { %v1818_v2 = vrot.slane %v1748_v18, 6 }
 0x318   : > { %v1808_v61 = vsel %vm479_vm4, %v1805_v40, %v1807_v5  ;;  %v1806_v60 = vsel %vm479_vm4, %v1804_v57, %v1805_v40 }
 0x319   : > { %v1812_v35 = vadd.f32 %v1808_v61, %v1800_v52  ;;  %v1811_v11 = vadd.f32 %v1806_v60, %v1799_v4 }
 0x31b   : > { %v1743_v23 = vpop.permute.xlu0 %1742  ;;  %v1739_v49 = vpop.permute.xlu1 %1738 }
 0x31c   : > { %v1749_v30 = vadd.f32 %v1743_v23, %v1575_v42  ;;  %v1747_v46 = vadd.f32 %v1739_v49, %v1573_v9 }
 0x31e   : > { %v1820_v31 = vrot.slane %v1749_v30, 6  ;;  %v1817_v13 = vrot.slane %v1747_v46, 6 }
 0x320   : > { %v1821_v44 = vsel %vm1816_vm10, %v1818_v2, %v1820_v31  ;;  %v1819_v27 = vsel %vm1816_vm10, %v1817_v13, %v1818_v2 }
 0x321   : > { %v1825_v24 = vadd.f32 %v1821_v44, %v1812_v35  ;;  %v1824_v17 = vadd.f32 %v1819_v27, %v1811_v11 }
 0x323   : > { %v2089_v39 = vmul.f32 -1.442695, %v1825_v24  ;;  %v2088_v12 = vmul.f32 -1.442695, %v1824_v17 }
 0x325   : > { %2216 = vpow2.f32 %v2089_v39 }
 0x326   : > { %2218 = vpow2.f32 %v2088_v12 }
 0x32b   : > { %v2217_v55 = vpop.eup %2216 }
 0x32c   : > { %v2219_v29 = vpop.eup %2218  ;;  %v1833_v56 = vadd.f32 1.0, %v2217_v55 }
 0x32d   : > { %v1832_v32 = vadd.f32 1.0, %v2219_v29 }
 0x32e   : > { %2220 = vrcp.f32 %v1833_v56  ;;  %v1860_v25 = vand.u32 2147483648, %v1833_v56  ;;  %v1858_v3 = vand.u32 2147483647, %v1833_v56  ;;  %vm1854_vm13 = vweird.f32 %v1833_v56 }
 0x32f   : > { %2222 = vrcp.f32 %v1832_v32  ;;  %v1845_v47 = vand.u32 2147483648, %v1832_v32  ;;  %v1843_v36 = vand.u32 2147483647, %v1832_v32  ;;  %vm1839_vm14 = vweird.f32 %v1832_v32 }
 0x330   : > { %v1861_v59 = vor.u32 1.1754944e-38, %v1860_v25  ;;  %vm1859_vm2 = vcmp.eq.f32.partialorder %v1858_v3, 8.507059e+37 }
 0x331   : > { %v1846_v53 = vor.u32 1.1754944e-38, %v1845_v47  ;;  %vm1844_vm3 = vcmp.eq.f32.partialorder %v1843_v36, 8.507059e+37 }
 0x334   : > { %v2221_v37 = vpop.eup %2220 }
 0x335   : > { %v2223_v62 = vpop.eup %2222  ;;  %v1850_v6 = vmul.f32 %v2221_v37, %v1833_v56  ;;  %vm1855_vm11 = vweird.f32 %v2221_v37 }
 0x336   : > { %v1835_v28 = vmul.f32 %v2223_v62, %v1832_v32  ;;  %vm1840_vm12 = vweird.f32 %v2223_v62  ;;  %vm1856_vm15 = vmor %vm1854_vm13, %vm1855_vm11 }
 0x337   : > { %v1851_v63 = vsub.f32 1.0, %v1850_v6  ;;  %vm1841_vm1 = vmor %vm1839_vm14, %vm1840_vm12 }
 0x338   : > { %v1836_v14 = vsub.f32 1.0, %v1835_v28 }
 0x339   : > { %v1852_v50 = vmul.f32 %v2221_v37, %v1851_v63 }
 0x33a   : > { %v1837_v45 = vmul.f32 %v2223_v62, %v1836_v14 }
 0x33b   : > { %v1853_v34 = vadd.f32 %v2221_v37, %v1852_v50 }
 0x33c   : > { %v1838_v48 = vadd.f32 %v2223_v62, %v1837_v45 }
 0x33d   : > { %v1857_v33 = vsel %vm1856_vm15, %v2221_v37, %v1853_v34 }
 0x33e   : > { %v1842_v10 = vsel %vm1841_vm1, %v2223_v62, %v1838_v48  ;;  %v1862_v21 = vsel %vm1859_vm2, %v1861_v59, %v1857_v33 }
 0x33f   : > { %v1847_v58 = vsel %vm1844_vm3, %v1846_v53, %v1842_v10  ;;  %1866 = vst.msk [vmem:[%s191_s17 + $0x8] sm:$0xff] %vm1864_vm0, %v1862_v21 }
 0x340   : > { %1865 = vst.msk [vmem:[%s191_s17] sm:$0xff] %vm1864_vm0, %v1847_v58 }
 0x341   : > { %2296 = shalt.err (!%p2293_p13)
}
 0x342   : > { %s2374_s22 = smov 128   ;;  %s2375_s15 = smov 8  }
 0x343   : > { %2103 = dma.vmem_to_hbm [thread:$0]  (%p2469_p9), %s1881_s26, 256, %s1883_s12, %s1868_s24, %s2374_s22, %s2374_s22, %s2375_s15  }
 0x344 PF: > { %s1897_s21 = sand.u32 1, %s2335_s9   ;;  %p3578_p0 = scmp.ge.s32.totalorder %s2355_s14, 2 }
 0x345   : > { %s1898_s4 = scalar_lea.sflag [#allocation6], %s1897_s21 }
 0x346   : > { %p2114_p3 = pnand %p3578_p0, %p2440_p6 }
 0x348   : > { %p2115_p5 = pneg %p2114_p3 }
 0x34a   : > { %2330 = dma.done.wait (%p2115_p5), %s1898_s4, 256  }
 0x34b   : > { %2332 = vsyncadd (%p2115_p5), %s1898_s4, 4294967040  ;;  %s19_s14 = sadd.s32 1, %s2355_s14   ;;  %s3579_s9 = smov %s2339_s10 }
 0x34c   : > { %p16_p7 = scmp.ge.s32.totalorder %s19_s14, 4   ;;  %s3580_s10 = smov %s2343_s11 }
 0x34d   : > { %s3581_s11 = smov %s2475_s3  ;;  %s3582_s12 = smov %s2351_s13 }
 0x34e   : > { %s3583_s13 = smov %s3585_s25  ;;  %18 = sbr.rel (!%p16_p7) target bundleno = 7 (0x7), region = 89 }
 0x353   :  { %1904 = vsyncpa [#allocation5], 1 }
 0x354   :  { %1906 = vsyncpa [#allocation5 + $0x1], 1 }
 0x355   :  { %1907 = vsyncpa [#allocation6], 1 }
 0x356   :  { %1909 = vsyncpa [#allocation6 + $0x1], 1 }
 0x357   :  { %1910 = vsyncpa [#allocation7], 1 }
 0x358   :  { %1912 = vsyncpa [#allocation7 + $0x1], 1 }

</bundles_post_ra>
